<compile_context>
chip_gen: v7x
topology: tpu7x:2x2x1
jax: 0.10.0
libtpu: 0.0.40
codegen_flags: <defaults>
</compile_context>

<pallas_src>
import functools

import jax
import jax.numpy as jnp
from jax.experimental import pallas as pl
from jax.experimental.pallas import tpu as pltpu


# ----------------------------------------------------------------------------
# Fused full-decoder kernel (one grid step per batch element)
# ----------------------------------------------------------------------------

def _decoder_kernel(
    x_ref, enc_ref, tmask_ref, smask_ref,
    # self-attention (+ post-attn LayerNorm), stacked over layers
    wqkv_s_ref, wo_s_ref, bo_s_ref, g0_ref, be0_ref,
    # cross-attention (+ LayerNorm1)
    wq_c_ref, wkv_c_ref, wo_c_ref, bo_c_ref, g1_ref, be1_ref,
    # feed-forward (+ LayerNorm2)
    w1_ref, bf1_ref, w2_ref, bf2_ref, g2_ref, be2_ref,
    # final vocab projection (lane-padded)
    fcw_ref, fcb_ref,
    o_ref, *, num_layers, heads):
    """Entire Decoder forward for one batch element.

    x_ref   : (1, L,  E)   decoder stream         enc_ref : (1, Ls, E)
    tmask   : (1, L,  L)   additive (0 keep / -1e20 masked)
    smask   : (1, L,  Ls)  additive
    wqkv_s  : (nl, 3h, E, d)  head-partitioned (scale folded into the Q blocks)
    wq_c    : (nl, h,  E, d)   wkv_c : (nl, 2h, E, d)
    wo_*    : (nl, h, d, E)    bo_*  : (nl, 1, E)
    w1      : (nl, E, H)  w2 : (nl, H, E)   fcw : (E, Vpad)  fcb : (1, Vpad)
    """
    f32 = jnp.float32
    x = x_ref[0]          # (L, E)
    enc = enc_ref[0]      # (Ls, E)
    tmask = tmask_ref[0]  # (L, L)
    smask = smask_ref[0]  # (L, Ls)

    def layernorm(y, g, b):
        mu = jnp.mean(y, axis=-1, keepdims=True)
        var = jnp.mean((y - mu) * (y - mu), axis=-1, keepdims=True)
        return (y - mu) * jax.lax.rsqrt(var + 1e-5) * g + b

    def heads_project(inp, w):
        # inp (S, E); w (n, E, d) head-partitioned blocks -> (n, S, d).
        # The MXU emits the head-batched layout directly: no lane shuffles.
        inp_b = jnp.broadcast_to(inp[None], (w.shape[0],) + inp.shape)
        return jnp.einsum('hse,hed->hsd', inp_b, w, preferred_element_type=f32)

    def mha(q_h, k_h, v_h, addmask, wo_h, bo):
        # q_h (h, Lq, d); k_h/v_h (h, Lk, d); addmask (Lq, Lk); wo_h (h, d, E)
        s = jnp.einsum('hqd,hkd->hqk', q_h, k_h, preferred_element_type=f32)
        s = s + addmask[None]                       # scale already folded in Wq
        s = s - jnp.max(s, axis=-1, keepdims=True)
        p = jnp.exp(s)
        p = p * pl.reciprocal(jnp.sum(p, axis=-1, keepdims=True), approx=True)
        ctx = jnp.einsum('hqk,hkd->hqd', p, v_h, preferred_element_type=f32)
        out = jnp.dot(ctx[0], wo_h[0], preferred_element_type=f32)
        for h in range(1, heads):                   # accumulate heads on the MXU
            out = out + jnp.dot(ctx[h], wo_h[h], preferred_element_type=f32)
        return out + bo

    for l in range(num_layers):                     # unrolled; weights stay in VMEM
        # --- masked self-attention ---
        qkv = heads_project(x, wqkv_s_ref[l])       # (3*heads, L, d)
        attn = mha(qkv[:heads], qkv[heads:2 * heads], qkv[2 * heads:],
                   tmask, wo_s_ref[l], bo_s_ref[l])
        query = layernorm(attn + x, g0_ref[l], be0_ref[l])

        # --- cross-attention (K, V from encoder output) ---
        q_c = heads_project(query, wq_c_ref[l])     # (heads, L, d)
        kv = heads_project(enc, wkv_c_ref[l])       # (2*heads, Ls, d)
        attn_c = mha(q_c, kv[:heads], kv[heads:],
                     smask, wo_c_ref[l], bo_c_ref[l])
        x2 = layernorm(attn_c + query, g1_ref[l], be1_ref[l])

        # --- feed-forward ---
        h1 = jnp.dot(x2, w1_ref[l], preferred_element_type=f32) + bf1_ref[l]
        h1 = jnp.maximum(h1, 0.0)
        ff = jnp.dot(h1, w2_ref[l], preferred_element_type=f32) + bf2_ref[l]
        x = layernorm(ff + x2, g2_ref[l], be2_ref[l])

    # --- fc_out: the only HBM store, lane-dense (Vpad multiple of 128) ---
    logits = jnp.dot(x, fcw_ref[...], preferred_element_type=f32) + fcb_ref[...]
    o_ref[0] = logits.astype(o_ref.dtype)


# ----------------------------------------------------------------------------
# pallas_call wrapper
# ----------------------------------------------------------------------------

def decoder_pallas(x_emb, enc_out, tmask_add, smask_add, P, *,
                   num_layers, heads, head_dim):
    N, L, E = x_emb.shape
    Ls = enc_out.shape[1]
    H = P["w1"].shape[-1]
    Vp = P["fcw"].shape[-1]
    d = head_dim

    kernel = functools.partial(_decoder_kernel, num_layers=num_layers,
                               heads=heads)

    def cst(shape):  # constant-index (resident) weight block = whole array
        return pl.BlockSpec(shape, lambda n, _nd=len(shape): (0,) * _nd)

    return pl.pallas_call(
        kernel,
        out_shape=jax.ShapeDtypeStruct((N, L, Vp), jnp.float32),
        grid=(N,),
        in_specs=[
            pl.BlockSpec((1, L, E), lambda n: (n, 0, 0)),     # x
            pl.BlockSpec((1, Ls, E), lambda n: (n, 0, 0)),    # enc_out
            pl.BlockSpec((1, L, L), lambda n: (n, 0, 0)),     # additive trg mask
            pl.BlockSpec((1, L, Ls), lambda n: (n, 0, 0)),    # additive src mask
            cst((num_layers, 3 * heads, E, d)),               # wqkv_s
            cst((num_layers, heads, d, E)),                   # wo_s
            cst((num_layers, 1, E)),                          # bo_s
            cst((num_layers, 1, E)), cst((num_layers, 1, E)), # g0, be0
            cst((num_layers, heads, E, d)),                   # wq_c
            cst((num_layers, 2 * heads, E, d)),               # wkv_c
            cst((num_layers, heads, d, E)),                   # wo_c
            cst((num_layers, 1, E)),                          # bo_c
            cst((num_layers, 1, E)), cst((num_layers, 1, E)), # g1, be1
            cst((num_layers, E, H)), cst((num_layers, 1, H)), # w1, bf1
            cst((num_layers, H, E)), cst((num_layers, 1, E)), # w2, bf2
            cst((num_layers, 1, E)), cst((num_layers, 1, E)), # g2, be2
            cst((E, Vp)), cst((1, Vp)),                       # fc_out (padded)
        ],
        out_specs=pl.BlockSpec((1, L, Vp), lambda n: (n, 0, 0)),
        compiler_params=pltpu.CompilerParams(
            dimension_semantics=("parallel",),
            vmem_limit_bytes=32 * 1024 * 1024),
    )(x_emb, enc_out, tmask_add, smask_add,
      P["wqkv_s"], P["wo_s"], P["bo_s"], P["g0"], P["be0"],
      P["wq_c"], P["wkv_c"], P["wo_c"], P["bo_c"], P["g1"], P["be1"],
      P["w1"], P["bf1"], P["w2"], P["bf2"], P["g2"], P["be2"],
      P["fcw"], P["fcb"])


# ----------------------------------------------------------------------------
# Parameter construction (deterministic; forward-pass shapes match the module)
# ----------------------------------------------------------------------------

def _head_partition(w_t, heads, scale=1.0):
    """Shared per-head (d, d) weight -> (heads, E, d) block-row matrices."""
    d = w_t.shape[0]
    E = heads * d
    out = jnp.zeros((heads, E, d), jnp.float32)
    for h in range(heads):
        out = out.at[h, h * d:(h + 1) * d, :].set(w_t * scale)
    return out


def _init_layer(key, E, heads, forward_expansion):
    d = E // heads
    H = forward_expansion * E
    scale = 1.0 / (float(E) ** 0.5)          # softmax scale folded into Wq
    ks = jax.random.split(key, 14)
    r = lambda k, shp: jax.random.normal(k, shp, jnp.float32) * 0.1
    wq_s, wk_s, wv_s = r(ks[0], (d, d)), r(ks[1], (d, d)), r(ks[2], (d, d))
    wq_c, wk_c, wv_c = r(ks[3], (d, d)), r(ks[4], (d, d)), r(ks[5], (d, d))
    wo_s, bo_s = r(ks[6], (E, E)), r(ks[7], (E,))
    wo_c, bo_c = r(ks[8], (E, E)), r(ks[9], (E,))
    w1, bf1 = r(ks[10], (E, H)), r(ks[11], (H,))
    w2, bf2 = r(ks[12], (H, E)), r(ks[13], (E,))
    ones = jnp.ones((1, E), jnp.float32)
    zeros = jnp.zeros((1, E), jnp.float32)
    return {
        "wqkv_s": jnp.concatenate([_head_partition(wq_s, heads, scale),
                                   _head_partition(wk_s, heads),
                                   _head_partition(wv_s, heads)], axis=0),
        "wo_s": wo_s.reshape(heads, d, E), "bo_s": bo_s.reshape(1, E),
        "g0": ones, "be0": zeros,
        "wq_c": _head_partition(wq_c, heads, scale),
        "wkv_c": jnp.concatenate([_head_partition(wk_c, heads),
                                  _head_partition(wv_c, heads)], axis=0),
        "wo_c": wo_c.reshape(heads, d, E), "bo_c": bo_c.reshape(1, E),
        "g1": ones, "be1": zeros,
        "w1": w1, "bf1": bf1.reshape(1, H),
        "w2": w2, "bf2": bf2.reshape(1, E),
        "g2": ones, "be2": zeros,
    }


def init_decoder_params(key, trg_vocab_size, embed_size, num_layers, heads,
                        forward_expansion, max_length):
    ks = jax.random.split(key, num_layers + 4)
    V = trg_vocab_size
    Vp = ((V + 127) // 128) * 128                       # lane-dense fc_out
    fcw = jax.random.normal(ks[0], (embed_size, V), jnp.float32) * 0.1
    fcb = jax.random.normal(ks[1], (V,), jnp.float32) * 0.1
    layers = [_init_layer(ks[4 + i], embed_size, heads, forward_expansion)
              for i in range(num_layers)]
    stacked = {k: jnp.stack([lp[k] for lp in layers], axis=0)
               for k in layers[0]}
    params = {
        "word_emb": jax.random.normal(ks[2], (V, embed_size), jnp.float32) * 0.1,
        "pos_emb": jax.random.normal(ks[3], (max_length, embed_size),
                                     jnp.float32) * 0.1,
        "fcw": jnp.zeros((embed_size, Vp), jnp.float32).at[:, :V].set(fcw),
        "fcb": jnp.zeros((1, Vp), jnp.float32).at[0, :V].set(fcb),
        "vocab": V,
    }
    params.update(stacked)
    return params


# ----------------------------------------------------------------------------
# Decoder forward (dropout = identity, eval semantics)
# ----------------------------------------------------------------------------

def decoder_forward(tokens, enc_out, src_mask, trg_mask, params, *,
                    num_layers, heads, embed_size):
    N, L = tokens.shape
    d = embed_size // heads
    positions = jnp.arange(L, dtype=jnp.int32)[None, :]
    # embedding lookups are glue (XLA gather); all dense compute is in Pallas
    x = params["word_emb"][tokens] + params["pos_emb"][positions]
    # additive masks precomputed outside the kernel (0 keep / -1e20 masked)
    tmask_add = jnp.where(trg_mask == 0, -1e20, 0.0).astype(jnp.float32)
    smask_add = jnp.where(src_mask == 0, -1e20, 0.0).astype(jnp.float32)
    logits_p = decoder_pallas(x, enc_out, tmask_add, smask_add, params,
                              num_layers=num_layers, heads=heads, head_dim=d)
    return logits_p[:, :, :params["vocab"]]


# ----------------------------------------------------------------------------
# Main
# ----------------------------------------------------------------------------

if __name__ == "__main__":
    N = 2               # batch
    L_trg = 8           # target sequence length
    L_src = 8           # encoder (source) sequence length
    trg_vocab_size = 50
    embed_size = 32
    heads = 4
    num_layers = 2
    forward_expansion = 2
    max_length = 16

    key = jax.random.PRNGKey(0)
    k_tok, k_enc, k_par = jax.random.split(key, 3)

    tokens = jax.random.randint(k_tok, (N, L_trg), 0, trg_vocab_size,
                                dtype=jnp.int32)
    enc_out = jax.random.normal(k_enc, (N, L_src, embed_size), jnp.float32)

    # masks (N, Lq, Lk); 1 = keep, 0 = masked
    trg_mask = jnp.tril(jnp.ones((L_trg, L_trg), jnp.float32))[None].repeat(N, 0)
    src_mask = jnp.ones((N, L_trg, L_src), jnp.float32)

    params = init_decoder_params(k_par, trg_vocab_size, embed_size, num_layers,
                                 heads, forward_expansion, max_length)

    logits = decoder_forward(tokens, enc_out, src_mask, trg_mask, params,
                             num_layers=num_layers, heads=heads,
                             embed_size=embed_size)
    logits = jax.block_until_ready(logits)

    assert logits.shape == (N, L_trg, trg_vocab_size)
    assert bool(jnp.all(jnp.isfinite(logits)))
    print("KERNEL_OK")
</pallas_src>

<mosaic_0001>
module attributes {stable_mosaic.version = 11 : i64} {
  func.func @_decoder_kernel(%arg0: i32, %arg1: memref<1x8x32xf32, #tpu.memory_space<vmem>>, %arg2: memref<1x8x32xf32, #tpu.memory_space<vmem>>, %arg3: memref<1x8x8xf32, #tpu.memory_space<vmem>>, %arg4: memref<1x8x8xf32, #tpu.memory_space<vmem>>, %arg5: memref<2x12x32x8xf32, #tpu.memory_space<vmem>>, %arg6: memref<2x4x8x32xf32, #tpu.memory_space<vmem>>, %arg7: memref<2x1x32xf32, #tpu.memory_space<vmem>>, %arg8: memref<2x1x32xf32, #tpu.memory_space<vmem>>, %arg9: memref<2x1x32xf32, #tpu.memory_space<vmem>>, %arg10: memref<2x4x32x8xf32, #tpu.memory_space<vmem>>, %arg11: memref<2x8x32x8xf32, #tpu.memory_space<vmem>>, %arg12: memref<2x4x8x32xf32, #tpu.memory_space<vmem>>, %arg13: memref<2x1x32xf32, #tpu.memory_space<vmem>>, %arg14: memref<2x1x32xf32, #tpu.memory_space<vmem>>, %arg15: memref<2x1x32xf32, #tpu.memory_space<vmem>>, %arg16: memref<2x32x64xf32, #tpu.memory_space<vmem>>, %arg17: memref<2x1x64xf32, #tpu.memory_space<vmem>>, %arg18: memref<2x64x32xf32, #tpu.memory_space<vmem>>, %arg19: memref<2x1x32xf32, #tpu.memory_space<vmem>>, %arg20: memref<2x1x32xf32, #tpu.memory_space<vmem>>, %arg21: memref<2x1x32xf32, #tpu.memory_space<vmem>>, %arg22: memref<32x128xf32, #tpu.memory_space<vmem>>, %arg23: memref<1x128xf32, #tpu.memory_space<vmem>>, %arg24: memref<1x8x128xf32, #tpu.memory_space<vmem>>) attributes {dimension_semantics = [#tpu.dimension_semantics<parallel>], iteration_bounds = array<i64: 2>, scalar_prefetch = 0 : i64, scratch_operands = 0 : i64, tpu.core_type = #tpu.core_type<tc>, window_params = [{transform_indices = @transform_0, window_bounds = array<i64: 1, 8, 32>}, {transform_indices = @transform_1, window_bounds = array<i64: 1, 8, 32>}, {transform_indices = @transform_2, window_bounds = array<i64: 1, 8, 8>}, {transform_indices = @transform_3, window_bounds = array<i64: 1, 8, 8>}, {pipeline_mode = #tpu.pipeline_mode<synchronous>, transform_indices = @transform_4, window_bounds = array<i64: 2, 12, 32, 8>}, {pipeline_mode = #tpu.pipeline_mode<synchronous>, transform_indices = @transform_5, window_bounds = array<i64: 2, 4, 8, 32>}, {pipeline_mode = #tpu.pipeline_mode<synchronous>, transform_indices = @transform_6, window_bounds = array<i64: 2, 1, 32>}, {pipeline_mode = #tpu.pipeline_mode<synchronous>, transform_indices = @transform_7, window_bounds = array<i64: 2, 1, 32>}, {pipeline_mode = #tpu.pipeline_mode<synchronous>, transform_indices = @transform_8, window_bounds = array<i64: 2, 1, 32>}, {pipeline_mode = #tpu.pipeline_mode<synchronous>, transform_indices = @transform_9, window_bounds = array<i64: 2, 4, 32, 8>}, {pipeline_mode = #tpu.pipeline_mode<synchronous>, transform_indices = @transform_10, window_bounds = array<i64: 2, 8, 32, 8>}, {pipeline_mode = #tpu.pipeline_mode<synchronous>, transform_indices = @transform_11, window_bounds = array<i64: 2, 4, 8, 32>}, {pipeline_mode = #tpu.pipeline_mode<synchronous>, transform_indices = @transform_12, window_bounds = array<i64: 2, 1, 32>}, {pipeline_mode = #tpu.pipeline_mode<synchronous>, transform_indices = @transform_13, window_bounds = array<i64: 2, 1, 32>}, {pipeline_mode = #tpu.pipeline_mode<synchronous>, transform_indices = @transform_14, window_bounds = array<i64: 2, 1, 32>}, {pipeline_mode = #tpu.pipeline_mode<synchronous>, transform_indices = @transform_15, window_bounds = array<i64: 2, 32, 64>}, {pipeline_mode = #tpu.pipeline_mode<synchronous>, transform_indices = @transform_16, window_bounds = array<i64: 2, 1, 64>}, {pipeline_mode = #tpu.pipeline_mode<synchronous>, transform_indices = @transform_17, window_bounds = array<i64: 2, 64, 32>}, {pipeline_mode = #tpu.pipeline_mode<synchronous>, transform_indices = @transform_18, window_bounds = array<i64: 2, 1, 32>}, {pipeline_mode = #tpu.pipeline_mode<synchronous>, transform_indices = @transform_19, window_bounds = array<i64: 2, 1, 32>}, {pipeline_mode = #tpu.pipeline_mode<synchronous>, transform_indices = @transform_20, window_bounds = array<i64: 2, 1, 32>}, {pipeline_mode = #tpu.pipeline_mode<synchronous>, transform_indices = @transform_21, window_bounds = array<i64: 32, 128>}, {pipeline_mode = #tpu.pipeline_mode<synchronous>, transform_indices = @transform_22, window_bounds = array<i64: 1, 128>}, {transform_indices = @transform_23, window_bounds = array<i64: 1, 8, 128>}]} {
    %c0 = arith.constant 0 : index
    %c0_0 = arith.constant 0 : index
    %c0_1 = arith.constant 0 : index
    %0 = vector.load %arg1[%c0, %c0_0, %c0_1] : memref<1x8x32xf32, #tpu.memory_space<vmem>>, vector<1x8x32xf32>
    %1 = vector.shape_cast %0 : vector<1x8x32xf32> to vector<8x32xf32>
    %c0_2 = arith.constant 0 : index
    %c0_3 = arith.constant 0 : index
    %c0_4 = arith.constant 0 : index
    %2 = vector.load %arg2[%c0_2, %c0_3, %c0_4] : memref<1x8x32xf32, #tpu.memory_space<vmem>>, vector<1x8x32xf32>
    %3 = vector.shape_cast %2 : vector<1x8x32xf32> to vector<8x32xf32>
    %c0_5 = arith.constant 0 : index
    %c0_6 = arith.constant 0 : index
    %c0_7 = arith.constant 0 : index
    %4 = vector.load %arg3[%c0_5, %c0_6, %c0_7] : memref<1x8x8xf32, #tpu.memory_space<vmem>>, vector<1x8x8xf32>
    %5 = vector.shape_cast %4 : vector<1x8x8xf32> to vector<8x8xf32>
    %c0_8 = arith.constant 0 : index
    %c0_9 = arith.constant 0 : index
    %c0_10 = arith.constant 0 : index
    %6 = vector.load %arg4[%c0_8, %c0_9, %c0_10] : memref<1x8x8xf32, #tpu.memory_space<vmem>>, vector<1x8x8xf32>
    %7 = vector.shape_cast %6 : vector<1x8x8xf32> to vector<8x8xf32>
    %c0_11 = arith.constant 0 : index
    %c0_12 = arith.constant 0 : index
    %c0_13 = arith.constant 0 : index
    %c0_14 = arith.constant 0 : index
    %8 = vector.load %arg5[%c0_11, %c0_12, %c0_13, %c0_14] : memref<2x12x32x8xf32, #tpu.memory_space<vmem>>, vector<1x12x32x8xf32>
    %9 = vector.shape_cast %8 : vector<1x12x32x8xf32> to vector<12x32x8xf32>
    %10 = vector.shape_cast %1 : vector<8x32xf32> to vector<1x8x32xf32>
    %11 = vector.shape_cast %10 : vector<1x8x32xf32> to vector<1x8x32xf32>
    %12 = vector.broadcast %11 : vector<1x8x32xf32> to vector<12x8x32xf32>
    "tpu.trace_start"() <{level = 10 : i32, message = "hse,hed->hsd"}> : () -> ()
    %cst = arith.constant dense<0.000000e+00> : vector<12x8x8xf32>
    %13 = tpu.matmul %12, %9, %cst {dimension_numbers = #tpu.dot_dimension_numbers<[2], [1], [1], [2], [0, 0, 0, 1, 1, 2], [0], [0]>} : vector<12x8x32xf32>, vector<12x32x8xf32>, vector<12x8x8xf32> -> vector<12x8x8xf32>
    "tpu.trace_stop"() : () -> ()
    %14 = vector.extract_strided_slice %13 {offsets = [0, 0, 0], sizes = [4, 8, 8], strides = [1, 1, 1]} : vector<12x8x8xf32> to vector<4x8x8xf32>
    %15 = vector.extract_strided_slice %13 {offsets = [4, 0, 0], sizes = [4, 8, 8], strides = [1, 1, 1]} : vector<12x8x8xf32> to vector<4x8x8xf32>
    %16 = vector.extract_strided_slice %13 {offsets = [8, 0, 0], sizes = [4, 8, 8], strides = [1, 1, 1]} : vector<12x8x8xf32> to vector<4x8x8xf32>
    %c0_15 = arith.constant 0 : index
    %c0_16 = arith.constant 0 : index
    %c0_17 = arith.constant 0 : index
    %c0_18 = arith.constant 0 : index
    %17 = vector.load %arg6[%c0_15, %c0_16, %c0_17, %c0_18] : memref<2x4x8x32xf32, #tpu.memory_space<vmem>>, vector<1x4x8x32xf32>
    %18 = vector.shape_cast %17 : vector<1x4x8x32xf32> to vector<4x8x32xf32>
    %c0_19 = arith.constant 0 : index
    %c0_20 = arith.constant 0 : index
    %c0_21 = arith.constant 0 : index
    %19 = vector.load %arg7[%c0_19, %c0_20, %c0_21] : memref<2x1x32xf32, #tpu.memory_space<vmem>>, vector<1x1x32xf32>
    %20 = vector.shape_cast %19 : vector<1x1x32xf32> to vector<1x32xf32>
    "tpu.trace_start"() <{level = 10 : i32, message = "hqd,hkd->hqk"}> : () -> ()
    %cst_22 = arith.constant dense<0.000000e+00> : vector<4x8x8xf32>
    %21 = tpu.matmul %14, %15, %cst_22 {dimension_numbers = #tpu.dot_dimension_numbers<[2], [2], [1], [1], [0, 0, 0, 1, 1, 1], [0], [0]>} : vector<4x8x8xf32>, vector<4x8x8xf32>, vector<4x8x8xf32> -> vector<4x8x8xf32>
    "tpu.trace_stop"() : () -> ()
    %22 = vector.shape_cast %5 : vector<8x8xf32> to vector<1x8x8xf32>
    %23 = vector.broadcast %22 : vector<1x8x8xf32> to vector<4x8x8xf32>
    %24 = arith.addf %21, %23 : vector<4x8x8xf32>
    %cst_23 = arith.constant dense<0xFF800000> : vector<4x8xf32>
    %25 = vector.multi_reduction <maximumf>, %24, %cst_23 [2] : vector<4x8x8xf32> to vector<4x8xf32>
    %26 = vector.shape_cast %25 : vector<4x8xf32> to vector<4x8x1xf32>
    %27 = vector.broadcast %26 : vector<4x8x1xf32> to vector<4x8x8xf32>
    %28 = arith.subf %24, %27 : vector<4x8x8xf32>
    %29 = math.exp %28 : vector<4x8x8xf32>
    %cst_24 = arith.constant dense<0.000000e+00> : vector<4x8xf32>
    %30 = vector.multi_reduction <add>, %29, %cst_24 [2] : vector<4x8x8xf32> to vector<4x8xf32>
    %31 = vector.shape_cast %30 : vector<4x8xf32> to vector<4x8x1xf32>
    %32 = tpu.reciprocal %31 {approx = true} : vector<4x8x1xf32> -> vector<4x8x1xf32>
    %33 = vector.broadcast %32 : vector<4x8x1xf32> to vector<4x8x8xf32>
    %34 = arith.mulf %29, %33 : vector<4x8x8xf32>
    "tpu.trace_start"() <{level = 10 : i32, message = "hqk,hkd->hqd"}> : () -> ()
    %cst_25 = arith.constant dense<0.000000e+00> : vector<4x8x8xf32>
    %35 = tpu.matmul %34, %16, %cst_25 {dimension_numbers = #tpu.dot_dimension_numbers<[2], [1], [1], [2], [0, 0, 0, 1, 1, 2], [0], [0]>} : vector<4x8x8xf32>, vector<4x8x8xf32>, vector<4x8x8xf32> -> vector<4x8x8xf32>
    "tpu.trace_stop"() : () -> ()
    %36 = vector.extract_strided_slice %35 {offsets = [0, 0, 0], sizes = [1, 8, 8], strides = [1, 1, 1]} : vector<4x8x8xf32> to vector<1x8x8xf32>
    %37 = vector.shape_cast %36 : vector<1x8x8xf32> to vector<8x8xf32>
    %38 = vector.extract_strided_slice %18 {offsets = [0, 0, 0], sizes = [1, 8, 32], strides = [1, 1, 1]} : vector<4x8x32xf32> to vector<1x8x32xf32>
    %39 = vector.shape_cast %38 : vector<1x8x32xf32> to vector<8x32xf32>
    %cst_26 = arith.constant dense<0.000000e+00> : vector<8x32xf32>
    %40 = tpu.matmul %37, %39, %cst_26 {dimension_numbers = #tpu.dot_dimension_numbers<[1], [0], [0], [1], [0, 0, 1, 1], [], []>} : vector<8x8xf32>, vector<8x32xf32>, vector<8x32xf32> -> vector<8x32xf32>
    %41 = vector.extract_strided_slice %35 {offsets = [1, 0, 0], sizes = [1, 8, 8], strides = [1, 1, 1]} : vector<4x8x8xf32> to vector<1x8x8xf32>
    %42 = vector.shape_cast %41 : vector<1x8x8xf32> to vector<8x8xf32>
    %43 = vector.extract_strided_slice %18 {offsets = [1, 0, 0], sizes = [1, 8, 32], strides = [1, 1, 1]} : vector<4x8x32xf32> to vector<1x8x32xf32>
    %44 = vector.shape_cast %43 : vector<1x8x32xf32> to vector<8x32xf32>
    %cst_27 = arith.constant dense<0.000000e+00> : vector<8x32xf32>
    %45 = tpu.matmul %42, %44, %cst_27 {dimension_numbers = #tpu.dot_dimension_numbers<[1], [0], [0], [1], [0, 0, 1, 1], [], []>} : vector<8x8xf32>, vector<8x32xf32>, vector<8x32xf32> -> vector<8x32xf32>
    %46 = arith.addf %40, %45 : vector<8x32xf32>
    %47 = vector.extract_strided_slice %35 {offsets = [2, 0, 0], sizes = [1, 8, 8], strides = [1, 1, 1]} : vector<4x8x8xf32> to vector<1x8x8xf32>
    %48 = vector.shape_cast %47 : vector<1x8x8xf32> to vector<8x8xf32>
    %49 = vector.extract_strided_slice %18 {offsets = [2, 0, 0], sizes = [1, 8, 32], strides = [1, 1, 1]} : vector<4x8x32xf32> to vector<1x8x32xf32>
    %50 = vector.shape_cast %49 : vector<1x8x32xf32> to vector<8x32xf32>
    %cst_28 = arith.constant dense<0.000000e+00> : vector<8x32xf32>
    %51 = tpu.matmul %48, %50, %cst_28 {dimension_numbers = #tpu.dot_dimension_numbers<[1], [0], [0], [1], [0, 0, 1, 1], [], []>} : vector<8x8xf32>, vector<8x32xf32>, vector<8x32xf32> -> vector<8x32xf32>
    %52 = arith.addf %46, %51 : vector<8x32xf32>
    %53 = vector.extract_strided_slice %35 {offsets = [3, 0, 0], sizes = [1, 8, 8], strides = [1, 1, 1]} : vector<4x8x8xf32> to vector<1x8x8xf32>
    %54 = vector.shape_cast %53 : vector<1x8x8xf32> to vector<8x8xf32>
    %55 = vector.extract_strided_slice %18 {offsets = [3, 0, 0], sizes = [1, 8, 32], strides = [1, 1, 1]} : vector<4x8x32xf32> to vector<1x8x32xf32>
    %56 = vector.shape_cast %55 : vector<1x8x32xf32> to vector<8x32xf32>
    %cst_29 = arith.constant dense<0.000000e+00> : vector<8x32xf32>
    %57 = tpu.matmul %54, %56, %cst_29 {dimension_numbers = #tpu.dot_dimension_numbers<[1], [0], [0], [1], [0, 0, 1, 1], [], []>} : vector<8x8xf32>, vector<8x32xf32>, vector<8x32xf32> -> vector<8x32xf32>
    %58 = arith.addf %52, %57 : vector<8x32xf32>
    %59 = vector.broadcast %20 : vector<1x32xf32> to vector<8x32xf32>
    %60 = arith.addf %58, %59 : vector<8x32xf32>
    %61 = arith.addf %60, %1 : vector<8x32xf32>
    %c0_30 = arith.constant 0 : index
    %c0_31 = arith.constant 0 : index
    %c0_32 = arith.constant 0 : index
    %62 = vector.load %arg8[%c0_30, %c0_31, %c0_32] : memref<2x1x32xf32, #tpu.memory_space<vmem>>, vector<1x1x32xf32>
    %63 = vector.shape_cast %62 : vector<1x1x32xf32> to vector<1x32xf32>
    %c0_33 = arith.constant 0 : index
    %c0_34 = arith.constant 0 : index
    %c0_35 = arith.constant 0 : index
    %64 = vector.load %arg9[%c0_33, %c0_34, %c0_35] : memref<2x1x32xf32, #tpu.memory_space<vmem>>, vector<1x1x32xf32>
    %65 = vector.shape_cast %64 : vector<1x1x32xf32> to vector<1x32xf32>
    %cst_36 = arith.constant dense<0.000000e+00> : vector<8xf32>
    %66 = vector.multi_reduction <add>, %61, %cst_36 [1] : vector<8x32xf32> to vector<8xf32>
    %67 = vector.shape_cast %66 : vector<8xf32> to vector<8x1xf32>
    %cst_37 = arith.constant 3.200000e+01 : f32
    %68 = vector.broadcast %cst_37 : f32 to vector<8x1xf32>
    %69 = arith.divf %67, %68 : vector<8x1xf32>
    %70 = vector.broadcast %69 : vector<8x1xf32> to vector<8x32xf32>
    %71 = arith.subf %61, %70 : vector<8x32xf32>
    %72 = vector.broadcast %69 : vector<8x1xf32> to vector<8x32xf32>
    %73 = arith.subf %61, %72 : vector<8x32xf32>
    %74 = arith.mulf %71, %73 : vector<8x32xf32>
    %cst_38 = arith.constant dense<0.000000e+00> : vector<8xf32>
    %75 = vector.multi_reduction <add>, %74, %cst_38 [1] : vector<8x32xf32> to vector<8xf32>
    %76 = vector.shape_cast %75 : vector<8xf32> to vector<8x1xf32>
    %cst_39 = arith.constant 3.200000e+01 : f32
    %77 = vector.broadcast %cst_39 : f32 to vector<8x1xf32>
    %78 = arith.divf %76, %77 : vector<8x1xf32>
    %79 = vector.broadcast %69 : vector<8x1xf32> to vector<8x32xf32>
    %80 = arith.subf %61, %79 : vector<8x32xf32>
    %cst_40 = arith.constant 9.99999974E-6 : f32
    %81 = vector.broadcast %cst_40 : f32 to vector<8x1xf32>
    %82 = arith.addf %78, %81 : vector<8x1xf32>
    %83 = math.rsqrt %82 : vector<8x1xf32>
    %84 = vector.broadcast %83 : vector<8x1xf32> to vector<8x32xf32>
    %85 = arith.mulf %80, %84 : vector<8x32xf32>
    %86 = vector.broadcast %63 : vector<1x32xf32> to vector<8x32xf32>
    %87 = arith.mulf %85, %86 : vector<8x32xf32>
    %88 = vector.broadcast %65 : vector<1x32xf32> to vector<8x32xf32>
    %89 = arith.addf %87, %88 : vector<8x32xf32>
    %c0_41 = arith.constant 0 : index
    %c0_42 = arith.constant 0 : index
    %c0_43 = arith.constant 0 : index
    %c0_44 = arith.constant 0 : index
    %90 = vector.load %arg10[%c0_41, %c0_42, %c0_43, %c0_44] : memref<2x4x32x8xf32, #tpu.memory_space<vmem>>, vector<1x4x32x8xf32>
    %91 = vector.shape_cast %90 : vector<1x4x32x8xf32> to vector<4x32x8xf32>
    %92 = vector.shape_cast %89 : vector<8x32xf32> to vector<1x8x32xf32>
    %93 = vector.shape_cast %92 : vector<1x8x32xf32> to vector<1x8x32xf32>
    %94 = vector.broadcast %93 : vector<1x8x32xf32> to vector<4x8x32xf32>
    "tpu.trace_start"() <{level = 10 : i32, message = "hse,hed->hsd"}> : () -> ()
    %cst_45 = arith.constant dense<0.000000e+00> : vector<4x8x8xf32>
    %95 = tpu.matmul %94, %91, %cst_45 {dimension_numbers = #tpu.dot_dimension_numbers<[2], [1], [1], [2], [0, 0, 0, 1, 1, 2], [0], [0]>} : vector<4x8x32xf32>, vector<4x32x8xf32>, vector<4x8x8xf32> -> vector<4x8x8xf32>
    "tpu.trace_stop"() : () -> ()
    %c0_46 = arith.constant 0 : index
    %c0_47 = arith.constant 0 : index
    %c0_48 = arith.constant 0 : index
    %c0_49 = arith.constant 0 : index
    %96 = vector.load %arg11[%c0_46, %c0_47, %c0_48, %c0_49] : memref<2x8x32x8xf32, #tpu.memory_space<vmem>>, vector<1x8x32x8xf32>
    %97 = vector.shape_cast %96 : vector<1x8x32x8xf32> to vector<8x32x8xf32>
    %98 = vector.shape_cast %3 : vector<8x32xf32> to vector<1x8x32xf32>
    %99 = vector.shape_cast %98 : vector<1x8x32xf32> to vector<1x8x32xf32>
    %100 = vector.broadcast %99 : vector<1x8x32xf32> to vector<8x8x32xf32>
    "tpu.trace_start"() <{level = 10 : i32, message = "hse,hed->hsd"}> : () -> ()
    %cst_50 = arith.constant dense<0.000000e+00> : vector<8x8x8xf32>
    %101 = tpu.matmul %100, %97, %cst_50 {dimension_numbers = #tpu.dot_dimension_numbers<[2], [1], [1], [2], [0, 0, 0, 1, 1, 2], [0], [0]>} : vector<8x8x32xf32>, vector<8x32x8xf32>, vector<8x8x8xf32> -> vector<8x8x8xf32>
    "tpu.trace_stop"() : () -> ()
    %102 = vector.extract_strided_slice %101 {offsets = [0, 0, 0], sizes = [4, 8, 8], strides = [1, 1, 1]} : vector<8x8x8xf32> to vector<4x8x8xf32>
    %103 = vector.extract_strided_slice %101 {offsets = [4, 0, 0], sizes = [4, 8, 8], strides = [1, 1, 1]} : vector<8x8x8xf32> to vector<4x8x8xf32>
    %c0_51 = arith.constant 0 : index
    %c0_52 = arith.constant 0 : index
    %c0_53 = arith.constant 0 : index
    %c0_54 = arith.constant 0 : index
    %104 = vector.load %arg12[%c0_51, %c0_52, %c0_53, %c0_54] : memref<2x4x8x32xf32, #tpu.memory_space<vmem>>, vector<1x4x8x32xf32>
    %105 = vector.shape_cast %104 : vector<1x4x8x32xf32> to vector<4x8x32xf32>
    %c0_55 = arith.constant 0 : index
    %c0_56 = arith.constant 0 : index
    %c0_57 = arith.constant 0 : index
    %106 = vector.load %arg13[%c0_55, %c0_56, %c0_57] : memref<2x1x32xf32, #tpu.memory_space<vmem>>, vector<1x1x32xf32>
    %107 = vector.shape_cast %106 : vector<1x1x32xf32> to vector<1x32xf32>
    "tpu.trace_start"() <{level = 10 : i32, message = "hqd,hkd->hqk"}> : () -> ()
    %cst_58 = arith.constant dense<0.000000e+00> : vector<4x8x8xf32>
    %108 = tpu.matmul %95, %102, %cst_58 {dimension_numbers = #tpu.dot_dimension_numbers<[2], [2], [1], [1], [0, 0, 0, 1, 1, 1], [0], [0]>} : vector<4x8x8xf32>, vector<4x8x8xf32>, vector<4x8x8xf32> -> vector<4x8x8xf32>
    "tpu.trace_stop"() : () -> ()
    %109 = vector.shape_cast %7 : vector<8x8xf32> to vector<1x8x8xf32>
    %110 = vector.broadcast %109 : vector<1x8x8xf32> to vector<4x8x8xf32>
    %111 = arith.addf %108, %110 : vector<4x8x8xf32>
    %cst_59 = arith.constant dense<0xFF800000> : vector<4x8xf32>
    %112 = vector.multi_reduction <maximumf>, %111, %cst_59 [2] : vector<4x8x8xf32> to vector<4x8xf32>
    %113 = vector.shape_cast %112 : vector<4x8xf32> to vector<4x8x1xf32>
    %114 = vector.broadcast %113 : vector<4x8x1xf32> to vector<4x8x8xf32>
    %115 = arith.subf %111, %114 : vector<4x8x8xf32>
    %116 = math.exp %115 : vector<4x8x8xf32>
    %cst_60 = arith.constant dense<0.000000e+00> : vector<4x8xf32>
    %117 = vector.multi_reduction <add>, %116, %cst_60 [2] : vector<4x8x8xf32> to vector<4x8xf32>
    %118 = vector.shape_cast %117 : vector<4x8xf32> to vector<4x8x1xf32>
    %119 = tpu.reciprocal %118 {approx = true} : vector<4x8x1xf32> -> vector<4x8x1xf32>
    %120 = vector.broadcast %119 : vector<4x8x1xf32> to vector<4x8x8xf32>
    %121 = arith.mulf %116, %120 : vector<4x8x8xf32>
    "tpu.trace_start"() <{level = 10 : i32, message = "hqk,hkd->hqd"}> : () -> ()
    %cst_61 = arith.constant dense<0.000000e+00> : vector<4x8x8xf32>
    %122 = tpu.matmul %121, %103, %cst_61 {dimension_numbers = #tpu.dot_dimension_numbers<[2], [1], [1], [2], [0, 0, 0, 1, 1, 2], [0], [0]>} : vector<4x8x8xf32>, vector<4x8x8xf32>, vector<4x8x8xf32> -> vector<4x8x8xf32>
    "tpu.trace_stop"() : () -> ()
    %123 = vector.extract_strided_slice %122 {offsets = [0, 0, 0], sizes = [1, 8, 8], strides = [1, 1, 1]} : vector<4x8x8xf32> to vector<1x8x8xf32>
    %124 = vector.shape_cast %123 : vector<1x8x8xf32> to vector<8x8xf32>
    %125 = vector.extract_strided_slice %105 {offsets = [0, 0, 0], sizes = [1, 8, 32], strides = [1, 1, 1]} : vector<4x8x32xf32> to vector<1x8x32xf32>
    %126 = vector.shape_cast %125 : vector<1x8x32xf32> to vector<8x32xf32>
    %cst_62 = arith.constant dense<0.000000e+00> : vector<8x32xf32>
    %127 = tpu.matmul %124, %126, %cst_62 {dimension_numbers = #tpu.dot_dimension_numbers<[1], [0], [0], [1], [0, 0, 1, 1], [], []>} : vector<8x8xf32>, vector<8x32xf32>, vector<8x32xf32> -> vector<8x32xf32>
    %128 = vector.extract_strided_slice %122 {offsets = [1, 0, 0], sizes = [1, 8, 8], strides = [1, 1, 1]} : vector<4x8x8xf32> to vector<1x8x8xf32>
    %129 = vector.shape_cast %128 : vector<1x8x8xf32> to vector<8x8xf32>
    %130 = vector.extract_strided_slice %105 {offsets = [1, 0, 0], sizes = [1, 8, 32], strides = [1, 1, 1]} : vector<4x8x32xf32> to vector<1x8x32xf32>
    %131 = vector.shape_cast %130 : vector<1x8x32xf32> to vector<8x32xf32>
    %cst_63 = arith.constant dense<0.000000e+00> : vector<8x32xf32>
    %132 = tpu.matmul %129, %131, %cst_63 {dimension_numbers = #tpu.dot_dimension_numbers<[1], [0], [0], [1], [0, 0, 1, 1], [], []>} : vector<8x8xf32>, vector<8x32xf32>, vector<8x32xf32> -> vector<8x32xf32>
    %133 = arith.addf %127, %132 : vector<8x32xf32>
    %134 = vector.extract_strided_slice %122 {offsets = [2, 0, 0], sizes = [1, 8, 8], strides = [1, 1, 1]} : vector<4x8x8xf32> to vector<1x8x8xf32>
    %135 = vector.shape_cast %134 : vector<1x8x8xf32> to vector<8x8xf32>
    %136 = vector.extract_strided_slice %105 {offsets = [2, 0, 0], sizes = [1, 8, 32], strides = [1, 1, 1]} : vector<4x8x32xf32> to vector<1x8x32xf32>
    %137 = vector.shape_cast %136 : vector<1x8x32xf32> to vector<8x32xf32>
    %cst_64 = arith.constant dense<0.000000e+00> : vector<8x32xf32>
    %138 = tpu.matmul %135, %137, %cst_64 {dimension_numbers = #tpu.dot_dimension_numbers<[1], [0], [0], [1], [0, 0, 1, 1], [], []>} : vector<8x8xf32>, vector<8x32xf32>, vector<8x32xf32> -> vector<8x32xf32>
    %139 = arith.addf %133, %138 : vector<8x32xf32>
    %140 = vector.extract_strided_slice %122 {offsets = [3, 0, 0], sizes = [1, 8, 8], strides = [1, 1, 1]} : vector<4x8x8xf32> to vector<1x8x8xf32>
    %141 = vector.shape_cast %140 : vector<1x8x8xf32> to vector<8x8xf32>
    %142 = vector.extract_strided_slice %105 {offsets = [3, 0, 0], sizes = [1, 8, 32], strides = [1, 1, 1]} : vector<4x8x32xf32> to vector<1x8x32xf32>
    %143 = vector.shape_cast %142 : vector<1x8x32xf32> to vector<8x32xf32>
    %cst_65 = arith.constant dense<0.000000e+00> : vector<8x32xf32>
    %144 = tpu.matmul %141, %143, %cst_65 {dimension_numbers = #tpu.dot_dimension_numbers<[1], [0], [0], [1], [0, 0, 1, 1], [], []>} : vector<8x8xf32>, vector<8x32xf32>, vector<8x32xf32> -> vector<8x32xf32>
    %145 = arith.addf %139, %144 : vector<8x32xf32>
    %146 = vector.broadcast %107 : vector<1x32xf32> to vector<8x32xf32>
    %147 = arith.addf %145, %146 : vector<8x32xf32>
    %148 = arith.addf %147, %89 : vector<8x32xf32>
    %c0_66 = arith.constant 0 : index
    %c0_67 = arith.constant 0 : index
    %c0_68 = arith.constant 0 : index
    %149 = vector.load %arg14[%c0_66, %c0_67, %c0_68] : memref<2x1x32xf32, #tpu.memory_space<vmem>>, vector<1x1x32xf32>
    %150 = vector.shape_cast %149 : vector<1x1x32xf32> to vector<1x32xf32>
    %c0_69 = arith.constant 0 : index
    %c0_70 = arith.constant 0 : index
    %c0_71 = arith.constant 0 : index
    %151 = vector.load %arg15[%c0_69, %c0_70, %c0_71] : memref<2x1x32xf32, #tpu.memory_space<vmem>>, vector<1x1x32xf32>
    %152 = vector.shape_cast %151 : vector<1x1x32xf32> to vector<1x32xf32>
    %cst_72 = arith.constant dense<0.000000e+00> : vector<8xf32>
    %153 = vector.multi_reduction <add>, %148, %cst_72 [1] : vector<8x32xf32> to vector<8xf32>
    %154 = vector.shape_cast %153 : vector<8xf32> to vector<8x1xf32>
    %cst_73 = arith.constant 3.200000e+01 : f32
    %155 = vector.broadcast %cst_73 : f32 to vector<8x1xf32>
    %156 = arith.divf %154, %155 : vector<8x1xf32>
    %157 = vector.broadcast %156 : vector<8x1xf32> to vector<8x32xf32>
    %158 = arith.subf %148, %157 : vector<8x32xf32>
    %159 = vector.broadcast %156 : vector<8x1xf32> to vector<8x32xf32>
    %160 = arith.subf %148, %159 : vector<8x32xf32>
    %161 = arith.mulf %158, %160 : vector<8x32xf32>
    %cst_74 = arith.constant dense<0.000000e+00> : vector<8xf32>
    %162 = vector.multi_reduction <add>, %161, %cst_74 [1] : vector<8x32xf32> to vector<8xf32>
    %163 = vector.shape_cast %162 : vector<8xf32> to vector<8x1xf32>
    %cst_75 = arith.constant 3.200000e+01 : f32
    %164 = vector.broadcast %cst_75 : f32 to vector<8x1xf32>
    %165 = arith.divf %163, %164 : vector<8x1xf32>
    %166 = vector.broadcast %156 : vector<8x1xf32> to vector<8x32xf32>
    %167 = arith.subf %148, %166 : vector<8x32xf32>
    %cst_76 = arith.constant 9.99999974E-6 : f32
    %168 = vector.broadcast %cst_76 : f32 to vector<8x1xf32>
    %169 = arith.addf %165, %168 : vector<8x1xf32>
    %170 = math.rsqrt %169 : vector<8x1xf32>
    %171 = vector.broadcast %170 : vector<8x1xf32> to vector<8x32xf32>
    %172 = arith.mulf %167, %171 : vector<8x32xf32>
    %173 = vector.broadcast %150 : vector<1x32xf32> to vector<8x32xf32>
    %174 = arith.mulf %172, %173 : vector<8x32xf32>
    %175 = vector.broadcast %152 : vector<1x32xf32> to vector<8x32xf32>
    %176 = arith.addf %174, %175 : vector<8x32xf32>
    %c0_77 = arith.constant 0 : index
    %c0_78 = arith.constant 0 : index
    %c0_79 = arith.constant 0 : index
    %177 = vector.load %arg16[%c0_77, %c0_78, %c0_79] : memref<2x32x64xf32, #tpu.memory_space<vmem>>, vector<1x32x64xf32>
    %178 = vector.shape_cast %177 : vector<1x32x64xf32> to vector<32x64xf32>
    %cst_80 = arith.constant dense<0.000000e+00> : vector<8x64xf32>
    %179 = tpu.matmul %176, %178, %cst_80 {dimension_numbers = #tpu.dot_dimension_numbers<[1], [0], [0], [1], [0, 0, 1, 1], [], []>} : vector<8x32xf32>, vector<32x64xf32>, vector<8x64xf32> -> vector<8x64xf32>
    %c0_81 = arith.constant 0 : index
    %c0_82 = arith.constant 0 : index
    %c0_83 = arith.constant 0 : index
    %180 = vector.load %arg17[%c0_81, %c0_82, %c0_83] : memref<2x1x64xf32, #tpu.memory_space<vmem>>, vector<1x1x64xf32>
    %181 = vector.shape_cast %180 : vector<1x1x64xf32> to vector<1x64xf32>
    %182 = vector.broadcast %181 : vector<1x64xf32> to vector<8x64xf32>
    %183 = arith.addf %179, %182 : vector<8x64xf32>
    %cst_84 = arith.constant 0.000000e+00 : f32
    %184 = vector.broadcast %cst_84 : f32 to vector<8x64xf32>
    %185 = arith.maximumf %183, %184 : vector<8x64xf32>
    %c0_85 = arith.constant 0 : index
    %c0_86 = arith.constant 0 : index
    %c0_87 = arith.constant 0 : index
    %186 = vector.load %arg18[%c0_85, %c0_86, %c0_87] : memref<2x64x32xf32, #tpu.memory_space<vmem>>, vector<1x64x32xf32>
    %187 = vector.shape_cast %186 : vector<1x64x32xf32> to vector<64x32xf32>
    %cst_88 = arith.constant dense<0.000000e+00> : vector<8x32xf32>
    %188 = tpu.matmul %185, %187, %cst_88 {dimension_numbers = #tpu.dot_dimension_numbers<[1], [0], [0], [1], [0, 0, 1, 1], [], []>} : vector<8x64xf32>, vector<64x32xf32>, vector<8x32xf32> -> vector<8x32xf32>
    %c0_89 = arith.constant 0 : index
    %c0_90 = arith.constant 0 : index
    %c0_91 = arith.constant 0 : index
    %189 = vector.load %arg19[%c0_89, %c0_90, %c0_91] : memref<2x1x32xf32, #tpu.memory_space<vmem>>, vector<1x1x32xf32>
    %190 = vector.shape_cast %189 : vector<1x1x32xf32> to vector<1x32xf32>
    %191 = vector.broadcast %190 : vector<1x32xf32> to vector<8x32xf32>
    %192 = arith.addf %188, %191 : vector<8x32xf32>
    %193 = arith.addf %192, %176 : vector<8x32xf32>
    %c0_92 = arith.constant 0 : index
    %c0_93 = arith.constant 0 : index
    %c0_94 = arith.constant 0 : index
    %194 = vector.load %arg20[%c0_92, %c0_93, %c0_94] : memref<2x1x32xf32, #tpu.memory_space<vmem>>, vector<1x1x32xf32>
    %195 = vector.shape_cast %194 : vector<1x1x32xf32> to vector<1x32xf32>
    %c0_95 = arith.constant 0 : index
    %c0_96 = arith.constant 0 : index
    %c0_97 = arith.constant 0 : index
    %196 = vector.load %arg21[%c0_95, %c0_96, %c0_97] : memref<2x1x32xf32, #tpu.memory_space<vmem>>, vector<1x1x32xf32>
    %197 = vector.shape_cast %196 : vector<1x1x32xf32> to vector<1x32xf32>
    %cst_98 = arith.constant dense<0.000000e+00> : vector<8xf32>
    %198 = vector.multi_reduction <add>, %193, %cst_98 [1] : vector<8x32xf32> to vector<8xf32>
    %199 = vector.shape_cast %198 : vector<8xf32> to vector<8x1xf32>
    %cst_99 = arith.constant 3.200000e+01 : f32
    %200 = vector.broadcast %cst_99 : f32 to vector<8x1xf32>
    %201 = arith.divf %199, %200 : vector<8x1xf32>
    %202 = vector.broadcast %201 : vector<8x1xf32> to vector<8x32xf32>
    %203 = arith.subf %193, %202 : vector<8x32xf32>
    %204 = vector.broadcast %201 : vector<8x1xf32> to vector<8x32xf32>
    %205 = arith.subf %193, %204 : vector<8x32xf32>
    %206 = arith.mulf %203, %205 : vector<8x32xf32>
    %cst_100 = arith.constant dense<0.000000e+00> : vector<8xf32>
    %207 = vector.multi_reduction <add>, %206, %cst_100 [1] : vector<8x32xf32> to vector<8xf32>
    %208 = vector.shape_cast %207 : vector<8xf32> to vector<8x1xf32>
    %cst_101 = arith.constant 3.200000e+01 : f32
    %209 = vector.broadcast %cst_101 : f32 to vector<8x1xf32>
    %210 = arith.divf %208, %209 : vector<8x1xf32>
    %211 = vector.broadcast %201 : vector<8x1xf32> to vector<8x32xf32>
    %212 = arith.subf %193, %211 : vector<8x32xf32>
    %cst_102 = arith.constant 9.99999974E-6 : f32
    %213 = vector.broadcast %cst_102 : f32 to vector<8x1xf32>
    %214 = arith.addf %210, %213 : vector<8x1xf32>
    %215 = math.rsqrt %214 : vector<8x1xf32>
    %216 = vector.broadcast %215 : vector<8x1xf32> to vector<8x32xf32>
    %217 = arith.mulf %212, %216 : vector<8x32xf32>
    %218 = vector.broadcast %195 : vector<1x32xf32> to vector<8x32xf32>
    %219 = arith.mulf %217, %218 : vector<8x32xf32>
    %220 = vector.broadcast %197 : vector<1x32xf32> to vector<8x32xf32>
    %221 = arith.addf %219, %220 : vector<8x32xf32>
    %c1 = arith.constant 1 : index
    %c0_103 = arith.constant 0 : index
    %c0_104 = arith.constant 0 : index
    %c0_105 = arith.constant 0 : index
    %222 = vector.load %arg5[%c1, %c0_103, %c0_104, %c0_105] : memref<2x12x32x8xf32, #tpu.memory_space<vmem>>, vector<1x12x32x8xf32>
    %223 = vector.shape_cast %222 : vector<1x12x32x8xf32> to vector<12x32x8xf32>
    %224 = vector.shape_cast %221 : vector<8x32xf32> to vector<1x8x32xf32>
    %225 = vector.shape_cast %224 : vector<1x8x32xf32> to vector<1x8x32xf32>
    %226 = vector.broadcast %225 : vector<1x8x32xf32> to vector<12x8x32xf32>
    "tpu.trace_start"() <{level = 10 : i32, message = "hse,hed->hsd"}> : () -> ()
    %cst_106 = arith.constant dense<0.000000e+00> : vector<12x8x8xf32>
    %227 = tpu.matmul %226, %223, %cst_106 {dimension_numbers = #tpu.dot_dimension_numbers<[2], [1], [1], [2], [0, 0, 0, 1, 1, 2], [0], [0]>} : vector<12x8x32xf32>, vector<12x32x8xf32>, vector<12x8x8xf32> -> vector<12x8x8xf32>
    "tpu.trace_stop"() : () -> ()
    %228 = vector.extract_strided_slice %227 {offsets = [0, 0, 0], sizes = [4, 8, 8], strides = [1, 1, 1]} : vector<12x8x8xf32> to vector<4x8x8xf32>
    %229 = vector.extract_strided_slice %227 {offsets = [4, 0, 0], sizes = [4, 8, 8], strides = [1, 1, 1]} : vector<12x8x8xf32> to vector<4x8x8xf32>
    %230 = vector.extract_strided_slice %227 {offsets = [8, 0, 0], sizes = [4, 8, 8], strides = [1, 1, 1]} : vector<12x8x8xf32> to vector<4x8x8xf32>
    %c1_107 = arith.constant 1 : index
    %c0_108 = arith.constant 0 : index
    %c0_109 = arith.constant 0 : index
    %c0_110 = arith.constant 0 : index
    %231 = vector.load %arg6[%c1_107, %c0_108, %c0_109, %c0_110] : memref<2x4x8x32xf32, #tpu.memory_space<vmem>>, vector<1x4x8x32xf32>
    %232 = vector.shape_cast %231 : vector<1x4x8x32xf32> to vector<4x8x32xf32>
    %c1_111 = arith.constant 1 : index
    %c0_112 = arith.constant 0 : index
    %c0_113 = arith.constant 0 : index
    %233 = vector.load %arg7[%c1_111, %c0_112, %c0_113] : memref<2x1x32xf32, #tpu.memory_space<vmem>>, vector<1x1x32xf32>
    %234 = vector.shape_cast %233 : vector<1x1x32xf32> to vector<1x32xf32>
    "tpu.trace_start"() <{level = 10 : i32, message = "hqd,hkd->hqk"}> : () -> ()
    %cst_114 = arith.constant dense<0.000000e+00> : vector<4x8x8xf32>
    %235 = tpu.matmul %228, %229, %cst_114 {dimension_numbers = #tpu.dot_dimension_numbers<[2], [2], [1], [1], [0, 0, 0, 1, 1, 1], [0], [0]>} : vector<4x8x8xf32>, vector<4x8x8xf32>, vector<4x8x8xf32> -> vector<4x8x8xf32>
    "tpu.trace_stop"() : () -> ()
    %236 = vector.shape_cast %5 : vector<8x8xf32> to vector<1x8x8xf32>
    %237 = vector.broadcast %236 : vector<1x8x8xf32> to vector<4x8x8xf32>
    %238 = arith.addf %235, %237 : vector<4x8x8xf32>
    %cst_115 = arith.constant dense<0xFF800000> : vector<4x8xf32>
    %239 = vector.multi_reduction <maximumf>, %238, %cst_115 [2] : vector<4x8x8xf32> to vector<4x8xf32>
    %240 = vector.shape_cast %239 : vector<4x8xf32> to vector<4x8x1xf32>
    %241 = vector.broadcast %240 : vector<4x8x1xf32> to vector<4x8x8xf32>
    %242 = arith.subf %238, %241 : vector<4x8x8xf32>
    %243 = math.exp %242 : vector<4x8x8xf32>
    %cst_116 = arith.constant dense<0.000000e+00> : vector<4x8xf32>
    %244 = vector.multi_reduction <add>, %243, %cst_116 [2] : vector<4x8x8xf32> to vector<4x8xf32>
    %245 = vector.shape_cast %244 : vector<4x8xf32> to vector<4x8x1xf32>
    %246 = tpu.reciprocal %245 {approx = true} : vector<4x8x1xf32> -> vector<4x8x1xf32>
    %247 = vector.broadcast %246 : vector<4x8x1xf32> to vector<4x8x8xf32>
    %248 = arith.mulf %243, %247 : vector<4x8x8xf32>
    "tpu.trace_start"() <{level = 10 : i32, message = "hqk,hkd->hqd"}> : () -> ()
    %cst_117 = arith.constant dense<0.000000e+00> : vector<4x8x8xf32>
    %249 = tpu.matmul %248, %230, %cst_117 {dimension_numbers = #tpu.dot_dimension_numbers<[2], [1], [1], [2], [0, 0, 0, 1, 1, 2], [0], [0]>} : vector<4x8x8xf32>, vector<4x8x8xf32>, vector<4x8x8xf32> -> vector<4x8x8xf32>
    "tpu.trace_stop"() : () -> ()
    %250 = vector.extract_strided_slice %249 {offsets = [0, 0, 0], sizes = [1, 8, 8], strides = [1, 1, 1]} : vector<4x8x8xf32> to vector<1x8x8xf32>
    %251 = vector.shape_cast %250 : vector<1x8x8xf32> to vector<8x8xf32>
    %252 = vector.extract_strided_slice %232 {offsets = [0, 0, 0], sizes = [1, 8, 32], strides = [1, 1, 1]} : vector<4x8x32xf32> to vector<1x8x32xf32>
    %253 = vector.shape_cast %252 : vector<1x8x32xf32> to vector<8x32xf32>
    %cst_118 = arith.constant dense<0.000000e+00> : vector<8x32xf32>
    %254 = tpu.matmul %251, %253, %cst_118 {dimension_numbers = #tpu.dot_dimension_numbers<[1], [0], [0], [1], [0, 0, 1, 1], [], []>} : vector<8x8xf32>, vector<8x32xf32>, vector<8x32xf32> -> vector<8x32xf32>
    %255 = vector.extract_strided_slice %249 {offsets = [1, 0, 0], sizes = [1, 8, 8], strides = [1, 1, 1]} : vector<4x8x8xf32> to vector<1x8x8xf32>
    %256 = vector.shape_cast %255 : vector<1x8x8xf32> to vector<8x8xf32>
    %257 = vector.extract_strided_slice %232 {offsets = [1, 0, 0], sizes = [1, 8, 32], strides = [1, 1, 1]} : vector<4x8x32xf32> to vector<1x8x32xf32>
    %258 = vector.shape_cast %257 : vector<1x8x32xf32> to vector<8x32xf32>
    %cst_119 = arith.constant dense<0.000000e+00> : vector<8x32xf32>
    %259 = tpu.matmul %256, %258, %cst_119 {dimension_numbers = #tpu.dot_dimension_numbers<[1], [0], [0], [1], [0, 0, 1, 1], [], []>} : vector<8x8xf32>, vector<8x32xf32>, vector<8x32xf32> -> vector<8x32xf32>
    %260 = arith.addf %254, %259 : vector<8x32xf32>
    %261 = vector.extract_strided_slice %249 {offsets = [2, 0, 0], sizes = [1, 8, 8], strides = [1, 1, 1]} : vector<4x8x8xf32> to vector<1x8x8xf32>
    %262 = vector.shape_cast %261 : vector<1x8x8xf32> to vector<8x8xf32>
    %263 = vector.extract_strided_slice %232 {offsets = [2, 0, 0], sizes = [1, 8, 32], strides = [1, 1, 1]} : vector<4x8x32xf32> to vector<1x8x32xf32>
    %264 = vector.shape_cast %263 : vector<1x8x32xf32> to vector<8x32xf32>
    %cst_120 = arith.constant dense<0.000000e+00> : vector<8x32xf32>
    %265 = tpu.matmul %262, %264, %cst_120 {dimension_numbers = #tpu.dot_dimension_numbers<[1], [0], [0], [1], [0, 0, 1, 1], [], []>} : vector<8x8xf32>, vector<8x32xf32>, vector<8x32xf32> -> vector<8x32xf32>
    %266 = arith.addf %260, %265 : vector<8x32xf32>
    %267 = vector.extract_strided_slice %249 {offsets = [3, 0, 0], sizes = [1, 8, 8], strides = [1, 1, 1]} : vector<4x8x8xf32> to vector<1x8x8xf32>
    %268 = vector.shape_cast %267 : vector<1x8x8xf32> to vector<8x8xf32>
    %269 = vector.extract_strided_slice %232 {offsets = [3, 0, 0], sizes = [1, 8, 32], strides = [1, 1, 1]} : vector<4x8x32xf32> to vector<1x8x32xf32>
    %270 = vector.shape_cast %269 : vector<1x8x32xf32> to vector<8x32xf32>
    %cst_121 = arith.constant dense<0.000000e+00> : vector<8x32xf32>
    %271 = tpu.matmul %268, %270, %cst_121 {dimension_numbers = #tpu.dot_dimension_numbers<[1], [0], [0], [1], [0, 0, 1, 1], [], []>} : vector<8x8xf32>, vector<8x32xf32>, vector<8x32xf32> -> vector<8x32xf32>
    %272 = arith.addf %266, %271 : vector<8x32xf32>
    %273 = vector.broadcast %234 : vector<1x32xf32> to vector<8x32xf32>
    %274 = arith.addf %272, %273 : vector<8x32xf32>
    %275 = arith.addf %274, %221 : vector<8x32xf32>
    %c1_122 = arith.constant 1 : index
    %c0_123 = arith.constant 0 : index
    %c0_124 = arith.constant 0 : index
    %276 = vector.load %arg8[%c1_122, %c0_123, %c0_124] : memref<2x1x32xf32, #tpu.memory_space<vmem>>, vector<1x1x32xf32>
    %277 = vector.shape_cast %276 : vector<1x1x32xf32> to vector<1x32xf32>
    %c1_125 = arith.constant 1 : index
    %c0_126 = arith.constant 0 : index
    %c0_127 = arith.constant 0 : index
    %278 = vector.load %arg9[%c1_125, %c0_126, %c0_127] : memref<2x1x32xf32, #tpu.memory_space<vmem>>, vector<1x1x32xf32>
    %279 = vector.shape_cast %278 : vector<1x1x32xf32> to vector<1x32xf32>
    %cst_128 = arith.constant dense<0.000000e+00> : vector<8xf32>
    %280 = vector.multi_reduction <add>, %275, %cst_128 [1] : vector<8x32xf32> to vector<8xf32>
    %281 = vector.shape_cast %280 : vector<8xf32> to vector<8x1xf32>
    %cst_129 = arith.constant 3.200000e+01 : f32
    %282 = vector.broadcast %cst_129 : f32 to vector<8x1xf32>
    %283 = arith.divf %281, %282 : vector<8x1xf32>
    %284 = vector.broadcast %283 : vector<8x1xf32> to vector<8x32xf32>
    %285 = arith.subf %275, %284 : vector<8x32xf32>
    %286 = vector.broadcast %283 : vector<8x1xf32> to vector<8x32xf32>
    %287 = arith.subf %275, %286 : vector<8x32xf32>
    %288 = arith.mulf %285, %287 : vector<8x32xf32>
    %cst_130 = arith.constant dense<0.000000e+00> : vector<8xf32>
    %289 = vector.multi_reduction <add>, %288, %cst_130 [1] : vector<8x32xf32> to vector<8xf32>
    %290 = vector.shape_cast %289 : vector<8xf32> to vector<8x1xf32>
    %cst_131 = arith.constant 3.200000e+01 : f32
    %291 = vector.broadcast %cst_131 : f32 to vector<8x1xf32>
    %292 = arith.divf %290, %291 : vector<8x1xf32>
    %293 = vector.broadcast %283 : vector<8x1xf32> to vector<8x32xf32>
    %294 = arith.subf %275, %293 : vector<8x32xf32>
    %cst_132 = arith.constant 9.99999974E-6 : f32
    %295 = vector.broadcast %cst_132 : f32 to vector<8x1xf32>
    %296 = arith.addf %292, %295 : vector<8x1xf32>
    %297 = math.rsqrt %296 : vector<8x1xf32>
    %298 = vector.broadcast %297 : vector<8x1xf32> to vector<8x32xf32>
    %299 = arith.mulf %294, %298 : vector<8x32xf32>
    %300 = vector.broadcast %277 : vector<1x32xf32> to vector<8x32xf32>
    %301 = arith.mulf %299, %300 : vector<8x32xf32>
    %302 = vector.broadcast %279 : vector<1x32xf32> to vector<8x32xf32>
    %303 = arith.addf %301, %302 : vector<8x32xf32>
    %c1_133 = arith.constant 1 : index
    %c0_134 = arith.constant 0 : index
    %c0_135 = arith.constant 0 : index
    %c0_136 = arith.constant 0 : index
    %304 = vector.load %arg10[%c1_133, %c0_134, %c0_135, %c0_136] : memref<2x4x32x8xf32, #tpu.memory_space<vmem>>, vector<1x4x32x8xf32>
    %305 = vector.shape_cast %304 : vector<1x4x32x8xf32> to vector<4x32x8xf32>
    %306 = vector.shape_cast %303 : vector<8x32xf32> to vector<1x8x32xf32>
    %307 = vector.shape_cast %306 : vector<1x8x32xf32> to vector<1x8x32xf32>
    %308 = vector.broadcast %307 : vector<1x8x32xf32> to vector<4x8x32xf32>
    "tpu.trace_start"() <{level = 10 : i32, message = "hse,hed->hsd"}> : () -> ()
    %cst_137 = arith.constant dense<0.000000e+00> : vector<4x8x8xf32>
    %309 = tpu.matmul %308, %305, %cst_137 {dimension_numbers = #tpu.dot_dimension_numbers<[2], [1], [1], [2], [0, 0, 0, 1, 1, 2], [0], [0]>} : vector<4x8x32xf32>, vector<4x32x8xf32>, vector<4x8x8xf32> -> vector<4x8x8xf32>
    "tpu.trace_stop"() : () -> ()
    %c1_138 = arith.constant 1 : index
    %c0_139 = arith.constant 0 : index
    %c0_140 = arith.constant 0 : index
    %c0_141 = arith.constant 0 : index
    %310 = vector.load %arg11[%c1_138, %c0_139, %c0_140, %c0_141] : memref<2x8x32x8xf32, #tpu.memory_space<vmem>>, vector<1x8x32x8xf32>
    %311 = vector.shape_cast %310 : vector<1x8x32x8xf32> to vector<8x32x8xf32>
    %312 = vector.shape_cast %3 : vector<8x32xf32> to vector<1x8x32xf32>
    %313 = vector.shape_cast %312 : vector<1x8x32xf32> to vector<1x8x32xf32>
    %314 = vector.broadcast %313 : vector<1x8x32xf32> to vector<8x8x32xf32>
    "tpu.trace_start"() <{level = 10 : i32, message = "hse,hed->hsd"}> : () -> ()
    %cst_142 = arith.constant dense<0.000000e+00> : vector<8x8x8xf32>
    %315 = tpu.matmul %314, %311, %cst_142 {dimension_numbers = #tpu.dot_dimension_numbers<[2], [1], [1], [2], [0, 0, 0, 1, 1, 2], [0], [0]>} : vector<8x8x32xf32>, vector<8x32x8xf32>, vector<8x8x8xf32> -> vector<8x8x8xf32>
    "tpu.trace_stop"() : () -> ()
    %316 = vector.extract_strided_slice %315 {offsets = [0, 0, 0], sizes = [4, 8, 8], strides = [1, 1, 1]} : vector<8x8x8xf32> to vector<4x8x8xf32>
    %317 = vector.extract_strided_slice %315 {offsets = [4, 0, 0], sizes = [4, 8, 8], strides = [1, 1, 1]} : vector<8x8x8xf32> to vector<4x8x8xf32>
    %c1_143 = arith.constant 1 : index
    %c0_144 = arith.constant 0 : index
    %c0_145 = arith.constant 0 : index
    %c0_146 = arith.constant 0 : index
    %318 = vector.load %arg12[%c1_143, %c0_144, %c0_145, %c0_146] : memref<2x4x8x32xf32, #tpu.memory_space<vmem>>, vector<1x4x8x32xf32>
    %319 = vector.shape_cast %318 : vector<1x4x8x32xf32> to vector<4x8x32xf32>
    %c1_147 = arith.constant 1 : index
    %c0_148 = arith.constant 0 : index
    %c0_149 = arith.constant 0 : index
    %320 = vector.load %arg13[%c1_147, %c0_148, %c0_149] : memref<2x1x32xf32, #tpu.memory_space<vmem>>, vector<1x1x32xf32>
    %321 = vector.shape_cast %320 : vector<1x1x32xf32> to vector<1x32xf32>
    "tpu.trace_start"() <{level = 10 : i32, message = "hqd,hkd->hqk"}> : () -> ()
    %cst_150 = arith.constant dense<0.000000e+00> : vector<4x8x8xf32>
    %322 = tpu.matmul %309, %316, %cst_150 {dimension_numbers = #tpu.dot_dimension_numbers<[2], [2], [1], [1], [0, 0, 0, 1, 1, 1], [0], [0]>} : vector<4x8x8xf32>, vector<4x8x8xf32>, vector<4x8x8xf32> -> vector<4x8x8xf32>
    "tpu.trace_stop"() : () -> ()
    %323 = vector.shape_cast %7 : vector<8x8xf32> to vector<1x8x8xf32>
    %324 = vector.broadcast %323 : vector<1x8x8xf32> to vector<4x8x8xf32>
    %325 = arith.addf %322, %324 : vector<4x8x8xf32>
    %cst_151 = arith.constant dense<0xFF800000> : vector<4x8xf32>
    %326 = vector.multi_reduction <maximumf>, %325, %cst_151 [2] : vector<4x8x8xf32> to vector<4x8xf32>
    %327 = vector.shape_cast %326 : vector<4x8xf32> to vector<4x8x1xf32>
    %328 = vector.broadcast %327 : vector<4x8x1xf32> to vector<4x8x8xf32>
    %329 = arith.subf %325, %328 : vector<4x8x8xf32>
    %330 = math.exp %329 : vector<4x8x8xf32>
    %cst_152 = arith.constant dense<0.000000e+00> : vector<4x8xf32>
    %331 = vector.multi_reduction <add>, %330, %cst_152 [2] : vector<4x8x8xf32> to vector<4x8xf32>
    %332 = vector.shape_cast %331 : vector<4x8xf32> to vector<4x8x1xf32>
    %333 = tpu.reciprocal %332 {approx = true} : vector<4x8x1xf32> -> vector<4x8x1xf32>
    %334 = vector.broadcast %333 : vector<4x8x1xf32> to vector<4x8x8xf32>
    %335 = arith.mulf %330, %334 : vector<4x8x8xf32>
    "tpu.trace_start"() <{level = 10 : i32, message = "hqk,hkd->hqd"}> : () -> ()
    %cst_153 = arith.constant dense<0.000000e+00> : vector<4x8x8xf32>
    %336 = tpu.matmul %335, %317, %cst_153 {dimension_numbers = #tpu.dot_dimension_numbers<[2], [1], [1], [2], [0, 0, 0, 1, 1, 2], [0], [0]>} : vector<4x8x8xf32>, vector<4x8x8xf32>, vector<4x8x8xf32> -> vector<4x8x8xf32>
    "tpu.trace_stop"() : () -> ()
    %337 = vector.extract_strided_slice %336 {offsets = [0, 0, 0], sizes = [1, 8, 8], strides = [1, 1, 1]} : vector<4x8x8xf32> to vector<1x8x8xf32>
    %338 = vector.shape_cast %337 : vector<1x8x8xf32> to vector<8x8xf32>
    %339 = vector.extract_strided_slice %319 {offsets = [0, 0, 0], sizes = [1, 8, 32], strides = [1, 1, 1]} : vector<4x8x32xf32> to vector<1x8x32xf32>
    %340 = vector.shape_cast %339 : vector<1x8x32xf32> to vector<8x32xf32>
    %cst_154 = arith.constant dense<0.000000e+00> : vector<8x32xf32>
    %341 = tpu.matmul %338, %340, %cst_154 {dimension_numbers = #tpu.dot_dimension_numbers<[1], [0], [0], [1], [0, 0, 1, 1], [], []>} : vector<8x8xf32>, vector<8x32xf32>, vector<8x32xf32> -> vector<8x32xf32>
    %342 = vector.extract_strided_slice %336 {offsets = [1, 0, 0], sizes = [1, 8, 8], strides = [1, 1, 1]} : vector<4x8x8xf32> to vector<1x8x8xf32>
    %343 = vector.shape_cast %342 : vector<1x8x8xf32> to vector<8x8xf32>
    %344 = vector.extract_strided_slice %319 {offsets = [1, 0, 0], sizes = [1, 8, 32], strides = [1, 1, 1]} : vector<4x8x32xf32> to vector<1x8x32xf32>
    %345 = vector.shape_cast %344 : vector<1x8x32xf32> to vector<8x32xf32>
    %cst_155 = arith.constant dense<0.000000e+00> : vector<8x32xf32>
    %346 = tpu.matmul %343, %345, %cst_155 {dimension_numbers = #tpu.dot_dimension_numbers<[1], [0], [0], [1], [0, 0, 1, 1], [], []>} : vector<8x8xf32>, vector<8x32xf32>, vector<8x32xf32> -> vector<8x32xf32>
    %347 = arith.addf %341, %346 : vector<8x32xf32>
    %348 = vector.extract_strided_slice %336 {offsets = [2, 0, 0], sizes = [1, 8, 8], strides = [1, 1, 1]} : vector<4x8x8xf32> to vector<1x8x8xf32>
    %349 = vector.shape_cast %348 : vector<1x8x8xf32> to vector<8x8xf32>
    %350 = vector.extract_strided_slice %319 {offsets = [2, 0, 0], sizes = [1, 8, 32], strides = [1, 1, 1]} : vector<4x8x32xf32> to vector<1x8x32xf32>
    %351 = vector.shape_cast %350 : vector<1x8x32xf32> to vector<8x32xf32>
    %cst_156 = arith.constant dense<0.000000e+00> : vector<8x32xf32>
    %352 = tpu.matmul %349, %351, %cst_156 {dimension_numbers = #tpu.dot_dimension_numbers<[1], [0], [0], [1], [0, 0, 1, 1], [], []>} : vector<8x8xf32>, vector<8x32xf32>, vector<8x32xf32> -> vector<8x32xf32>
    %353 = arith.addf %347, %352 : vector<8x32xf32>
    %354 = vector.extract_strided_slice %336 {offsets = [3, 0, 0], sizes = [1, 8, 8], strides = [1, 1, 1]} : vector<4x8x8xf32> to vector<1x8x8xf32>
    %355 = vector.shape_cast %354 : vector<1x8x8xf32> to vector<8x8xf32>
    %356 = vector.extract_strided_slice %319 {offsets = [3, 0, 0], sizes = [1, 8, 32], strides = [1, 1, 1]} : vector<4x8x32xf32> to vector<1x8x32xf32>
    %357 = vector.shape_cast %356 : vector<1x8x32xf32> to vector<8x32xf32>
    %cst_157 = arith.constant dense<0.000000e+00> : vector<8x32xf32>
    %358 = tpu.matmul %355, %357, %cst_157 {dimension_numbers = #tpu.dot_dimension_numbers<[1], [0], [0], [1], [0, 0, 1, 1], [], []>} : vector<8x8xf32>, vector<8x32xf32>, vector<8x32xf32> -> vector<8x32xf32>
    %359 = arith.addf %353, %358 : vector<8x32xf32>
    %360 = vector.broadcast %321 : vector<1x32xf32> to vector<8x32xf32>
    %361 = arith.addf %359, %360 : vector<8x32xf32>
    %362 = arith.addf %361, %303 : vector<8x32xf32>
    %c1_158 = arith.constant 1 : index
    %c0_159 = arith.constant 0 : index
    %c0_160 = arith.constant 0 : index
    %363 = vector.load %arg14[%c1_158, %c0_159, %c0_160] : memref<2x1x32xf32, #tpu.memory_space<vmem>>, vector<1x1x32xf32>
    %364 = vector.shape_cast %363 : vector<1x1x32xf32> to vector<1x32xf32>
    %c1_161 = arith.constant 1 : index
    %c0_162 = arith.constant 0 : index
    %c0_163 = arith.constant 0 : index
    %365 = vector.load %arg15[%c1_161, %c0_162, %c0_163] : memref<2x1x32xf32, #tpu.memory_space<vmem>>, vector<1x1x32xf32>
    %366 = vector.shape_cast %365 : vector<1x1x32xf32> to vector<1x32xf32>
    %cst_164 = arith.constant dense<0.000000e+00> : vector<8xf32>
    %367 = vector.multi_reduction <add>, %362, %cst_164 [1] : vector<8x32xf32> to vector<8xf32>
    %368 = vector.shape_cast %367 : vector<8xf32> to vector<8x1xf32>
    %cst_165 = arith.constant 3.200000e+01 : f32
    %369 = vector.broadcast %cst_165 : f32 to vector<8x1xf32>
    %370 = arith.divf %368, %369 : vector<8x1xf32>
    %371 = vector.broadcast %370 : vector<8x1xf32> to vector<8x32xf32>
    %372 = arith.subf %362, %371 : vector<8x32xf32>
    %373 = vector.broadcast %370 : vector<8x1xf32> to vector<8x32xf32>
    %374 = arith.subf %362, %373 : vector<8x32xf32>
    %375 = arith.mulf %372, %374 : vector<8x32xf32>
    %cst_166 = arith.constant dense<0.000000e+00> : vector<8xf32>
    %376 = vector.multi_reduction <add>, %375, %cst_166 [1] : vector<8x32xf32> to vector<8xf32>
    %377 = vector.shape_cast %376 : vector<8xf32> to vector<8x1xf32>
    %cst_167 = arith.constant 3.200000e+01 : f32
    %378 = vector.broadcast %cst_167 : f32 to vector<8x1xf32>
    %379 = arith.divf %377, %378 : vector<8x1xf32>
    %380 = vector.broadcast %370 : vector<8x1xf32> to vector<8x32xf32>
    %381 = arith.subf %362, %380 : vector<8x32xf32>
    %cst_168 = arith.constant 9.99999974E-6 : f32
    %382 = vector.broadcast %cst_168 : f32 to vector<8x1xf32>
    %383 = arith.addf %379, %382 : vector<8x1xf32>
    %384 = math.rsqrt %383 : vector<8x1xf32>
    %385 = vector.broadcast %384 : vector<8x1xf32> to vector<8x32xf32>
    %386 = arith.mulf %381, %385 : vector<8x32xf32>
    %387 = vector.broadcast %364 : vector<1x32xf32> to vector<8x32xf32>
    %388 = arith.mulf %386, %387 : vector<8x32xf32>
    %389 = vector.broadcast %366 : vector<1x32xf32> to vector<8x32xf32>
    %390 = arith.addf %388, %389 : vector<8x32xf32>
    %c1_169 = arith.constant 1 : index
    %c0_170 = arith.constant 0 : index
    %c0_171 = arith.constant 0 : index
    %391 = vector.load %arg16[%c1_169, %c0_170, %c0_171] : memref<2x32x64xf32, #tpu.memory_space<vmem>>, vector<1x32x64xf32>
    %392 = vector.shape_cast %391 : vector<1x32x64xf32> to vector<32x64xf32>
    %cst_172 = arith.constant dense<0.000000e+00> : vector<8x64xf32>
    %393 = tpu.matmul %390, %392, %cst_172 {dimension_numbers = #tpu.dot_dimension_numbers<[1], [0], [0], [1], [0, 0, 1, 1], [], []>} : vector<8x32xf32>, vector<32x64xf32>, vector<8x64xf32> -> vector<8x64xf32>
    %c1_173 = arith.constant 1 : index
    %c0_174 = arith.constant 0 : index
    %c0_175 = arith.constant 0 : index
    %394 = vector.load %arg17[%c1_173, %c0_174, %c0_175] : memref<2x1x64xf32, #tpu.memory_space<vmem>>, vector<1x1x64xf32>
    %395 = vector.shape_cast %394 : vector<1x1x64xf32> to vector<1x64xf32>
    %396 = vector.broadcast %395 : vector<1x64xf32> to vector<8x64xf32>
    %397 = arith.addf %393, %396 : vector<8x64xf32>
    %cst_176 = arith.constant 0.000000e+00 : f32
    %398 = vector.broadcast %cst_176 : f32 to vector<8x64xf32>
    %399 = arith.maximumf %397, %398 : vector<8x64xf32>
    %c1_177 = arith.constant 1 : index
    %c0_178 = arith.constant 0 : index
    %c0_179 = arith.constant 0 : index
    %400 = vector.load %arg18[%c1_177, %c0_178, %c0_179] : memref<2x64x32xf32, #tpu.memory_space<vmem>>, vector<1x64x32xf32>
    %401 = vector.shape_cast %400 : vector<1x64x32xf32> to vector<64x32xf32>
    %cst_180 = arith.constant dense<0.000000e+00> : vector<8x32xf32>
    %402 = tpu.matmul %399, %401, %cst_180 {dimension_numbers = #tpu.dot_dimension_numbers<[1], [0], [0], [1], [0, 0, 1, 1], [], []>} : vector<8x64xf32>, vector<64x32xf32>, vector<8x32xf32> -> vector<8x32xf32>
    %c1_181 = arith.constant 1 : index
    %c0_182 = arith.constant 0 : index
    %c0_183 = arith.constant 0 : index
    %403 = vector.load %arg19[%c1_181, %c0_182, %c0_183] : memref<2x1x32xf32, #tpu.memory_space<vmem>>, vector<1x1x32xf32>
    %404 = vector.shape_cast %403 : vector<1x1x32xf32> to vector<1x32xf32>
    %405 = vector.broadcast %404 : vector<1x32xf32> to vector<8x32xf32>
    %406 = arith.addf %402, %405 : vector<8x32xf32>
    %407 = arith.addf %406, %390 : vector<8x32xf32>
    %c1_184 = arith.constant 1 : index
    %c0_185 = arith.constant 0 : index
    %c0_186 = arith.constant 0 : index
    %408 = vector.load %arg20[%c1_184, %c0_185, %c0_186] : memref<2x1x32xf32, #tpu.memory_space<vmem>>, vector<1x1x32xf32>
    %409 = vector.shape_cast %408 : vector<1x1x32xf32> to vector<1x32xf32>
    %c1_187 = arith.constant 1 : index
    %c0_188 = arith.constant 0 : index
    %c0_189 = arith.constant 0 : index
    %410 = vector.load %arg21[%c1_187, %c0_188, %c0_189] : memref<2x1x32xf32, #tpu.memory_space<vmem>>, vector<1x1x32xf32>
    %411 = vector.shape_cast %410 : vector<1x1x32xf32> to vector<1x32xf32>
    %cst_190 = arith.constant dense<0.000000e+00> : vector<8xf32>
    %412 = vector.multi_reduction <add>, %407, %cst_190 [1] : vector<8x32xf32> to vector<8xf32>
    %413 = vector.shape_cast %412 : vector<8xf32> to vector<8x1xf32>
    %cst_191 = arith.constant 3.200000e+01 : f32
    %414 = vector.broadcast %cst_191 : f32 to vector<8x1xf32>
    %415 = arith.divf %413, %414 : vector<8x1xf32>
    %416 = vector.broadcast %415 : vector<8x1xf32> to vector<8x32xf32>
    %417 = arith.subf %407, %416 : vector<8x32xf32>
    %418 = vector.broadcast %415 : vector<8x1xf32> to vector<8x32xf32>
    %419 = arith.subf %407, %418 : vector<8x32xf32>
    %420 = arith.mulf %417, %419 : vector<8x32xf32>
    %cst_192 = arith.constant dense<0.000000e+00> : vector<8xf32>
    %421 = vector.multi_reduction <add>, %420, %cst_192 [1] : vector<8x32xf32> to vector<8xf32>
    %422 = vector.shape_cast %421 : vector<8xf32> to vector<8x1xf32>
    %cst_193 = arith.constant 3.200000e+01 : f32
    %423 = vector.broadcast %cst_193 : f32 to vector<8x1xf32>
    %424 = arith.divf %422, %423 : vector<8x1xf32>
    %425 = vector.broadcast %415 : vector<8x1xf32> to vector<8x32xf32>
    %426 = arith.subf %407, %425 : vector<8x32xf32>
    %cst_194 = arith.constant 9.99999974E-6 : f32
    %427 = vector.broadcast %cst_194 : f32 to vector<8x1xf32>
    %428 = arith.addf %424, %427 : vector<8x1xf32>
    %429 = math.rsqrt %428 : vector<8x1xf32>
    %430 = vector.broadcast %429 : vector<8x1xf32> to vector<8x32xf32>
    %431 = arith.mulf %426, %430 : vector<8x32xf32>
    %432 = vector.broadcast %409 : vector<1x32xf32> to vector<8x32xf32>
    %433 = arith.mulf %431, %432 : vector<8x32xf32>
    %434 = vector.broadcast %411 : vector<1x32xf32> to vector<8x32xf32>
    %435 = arith.addf %433, %434 : vector<8x32xf32>
    %c0_195 = arith.constant 0 : index
    %c0_196 = arith.constant 0 : index
    %436 = vector.load %arg22[%c0_195, %c0_196] : memref<32x128xf32, #tpu.memory_space<vmem>>, vector<32x128xf32>
    %cst_197 = arith.constant dense<0.000000e+00> : vector<8x128xf32>
    %437 = tpu.matmul %435, %436, %cst_197 {dimension_numbers = #tpu.dot_dimension_numbers<[1], [0], [0], [1], [0, 0, 1, 1], [], []>} : vector<8x32xf32>, vector<32x128xf32>, vector<8x128xf32> -> vector<8x128xf32>
    %c0_198 = arith.constant 0 : index
    %c0_199 = arith.constant 0 : index
    %438 = vector.load %arg23[%c0_198, %c0_199] : memref<1x128xf32, #tpu.memory_space<vmem>>, vector<1x128xf32>
    %439 = vector.broadcast %438 : vector<1x128xf32> to vector<8x128xf32>
    %440 = arith.addf %437, %439 : vector<8x128xf32>
    %c0_200 = arith.constant 0 : index
    %c0_201 = arith.constant 0 : index
    %c0_202 = arith.constant 0 : index
    %441 = vector.load %arg24[%c0_200, %c0_201, %c0_202] : memref<1x8x128xf32, #tpu.memory_space<vmem>>, vector<1x8x128xf32>
    %442 = vector.shape_cast %441 : vector<1x8x128xf32> to vector<8x128xf32>
    %443 = vector.shape_cast %440 : vector<8x128xf32> to vector<1x8x128xf32>
    tpu.vector_store %arg24[%c0_200, %c0_201, %c0_202], %443 {strides = array<i32>} : memref<1x8x128xf32, #tpu.memory_space<vmem>>, vector<1x8x128xf32>,
    return
  }
  func.func @transform_0(%arg0: i32) -> (i32, i32, i32) {
    %c0_i32 = arith.constant 0 : i32
    %c0_i32_0 = arith.constant 0 : i32
    %c0_i32_1 = arith.constant 0 : i32
    return %arg0, %c0_i32, %c0_i32_0 : i32, i32, i32
  }
  func.func @transform_1(%arg0: i32) -> (i32, i32, i32) {
    %c0_i32 = arith.constant 0 : i32
    %c0_i32_0 = arith.constant 0 : i32
    %c0_i32_1 = arith.constant 0 : i32
    return %arg0, %c0_i32, %c0_i32_0 : i32, i32, i32
  }
  func.func @transform_2(%arg0: i32) -> (i32, i32, i32) {
    %c0_i32 = arith.constant 0 : i32
    %c0_i32_0 = arith.constant 0 : i32
    %c0_i32_1 = arith.constant 0 : i32
    return %arg0, %c0_i32, %c0_i32_0 : i32, i32, i32
  }
  func.func @transform_3(%arg0: i32) -> (i32, i32, i32) {
    %c0_i32 = arith.constant 0 : i32
    %c0_i32_0 = arith.constant 0 : i32
    %c0_i32_1 = arith.constant 0 : i32
    return %arg0, %c0_i32, %c0_i32_0 : i32, i32, i32
  }
  func.func @transform_4(%arg0: i32) -> (i32, i32, i32, i32) {
    %c0_i32 = arith.constant 0 : i32
    %c0_i32_0 = arith.constant 0 : i32
    %c0_i32_1 = arith.constant 0 : i32
    %c0_i32_2 = arith.constant 0 : i32
    %c0_i32_3 = arith.constant 0 : i32
    return %c0_i32, %c0_i32_0, %c0_i32_1, %c0_i32_2 : i32, i32, i32, i32
  }
  func.func @transform_5(%arg0: i32) -> (i32, i32, i32, i32) {
    %c0_i32 = arith.constant 0 : i32
    %c0_i32_0 = arith.constant 0 : i32
    %c0_i32_1 = arith.constant 0 : i32
    %c0_i32_2 = arith.constant 0 : i32
    %c0_i32_3 = arith.constant 0 : i32
    return %c0_i32, %c0_i32_0, %c0_i32_1, %c0_i32_2 : i32, i32, i32, i32
  }
  func.func @transform_6(%arg0: i32) -> (i32, i32, i32) {
    %c0_i32 = arith.constant 0 : i32
    %c0_i32_0 = arith.constant 0 : i32
    %c0_i32_1 = arith.constant 0 : i32
    %c0_i32_2 = arith.constant 0 : i32
    return %c0_i32, %c0_i32_0, %c0_i32_1 : i32, i32, i32
  }
  func.func @transform_7(%arg0: i32) -> (i32, i32, i32) {
    %c0_i32 = arith.constant 0 : i32
    %c0_i32_0 = arith.constant 0 : i32
    %c0_i32_1 = arith.constant 0 : i32
    %c0_i32_2 = arith.constant 0 : i32
    return %c0_i32, %c0_i32_0, %c0_i32_1 : i32, i32, i32
  }
  func.func @transform_8(%arg0: i32) -> (i32, i32, i32) {
    %c0_i32 = arith.constant 0 : i32
    %c0_i32_0 = arith.constant 0 : i32
    %c0_i32_1 = arith.constant 0 : i32
    %c0_i32_2 = arith.constant 0 : i32
    return %c0_i32, %c0_i32_0, %c0_i32_1 : i32, i32, i32
  }
  func.func @transform_9(%arg0: i32) -> (i32, i32, i32, i32) {
    %c0_i32 = arith.constant 0 : i32
    %c0_i32_0 = arith.constant 0 : i32
    %c0_i32_1 = arith.constant 0 : i32
    %c0_i32_2 = arith.constant 0 : i32
    %c0_i32_3 = arith.constant 0 : i32
    return %c0_i32, %c0_i32_0, %c0_i32_1, %c0_i32_2 : i32, i32, i32, i32
  }
  func.func @transform_10(%arg0: i32) -> (i32, i32, i32, i32) {
    %c0_i32 = arith.constant 0 : i32
    %c0_i32_0 = arith.constant 0 : i32
    %c0_i32_1 = arith.constant 0 : i32
    %c0_i32_2 = arith.constant 0 : i32
    %c0_i32_3 = arith.constant 0 : i32
    return %c0_i32, %c0_i32_0, %c0_i32_1, %c0_i32_2 : i32, i32, i32, i32
  }
  func.func @transform_11(%arg0: i32) -> (i32, i32, i32, i32) {
    %c0_i32 = arith.constant 0 : i32
    %c0_i32_0 = arith.constant 0 : i32
    %c0_i32_1 = arith.constant 0 : i32
    %c0_i32_2 = arith.constant 0 : i32
    %c0_i32_3 = arith.constant 0 : i32
    return %c0_i32, %c0_i32_0, %c0_i32_1, %c0_i32_2 : i32, i32, i32, i32
  }
  func.func @transform_12(%arg0: i32) -> (i32, i32, i32) {
    %c0_i32 = arith.constant 0 : i32
    %c0_i32_0 = arith.constant 0 : i32
    %c0_i32_1 = arith.constant 0 : i32
    %c0_i32_2 = arith.constant 0 : i32
    return %c0_i32, %c0_i32_0, %c0_i32_1 : i32, i32, i32
  }
  func.func @transform_13(%arg0: i32) -> (i32, i32, i32) {
    %c0_i32 = arith.constant 0 : i32
    %c0_i32_0 = arith.constant 0 : i32
    %c0_i32_1 = arith.constant 0 : i32
    %c0_i32_2 = arith.constant 0 : i32
    return %c0_i32, %c0_i32_0, %c0_i32_1 : i32, i32, i32
  }
  func.func @transform_14(%arg0: i32) -> (i32, i32, i32) {
    %c0_i32 = arith.constant 0 : i32
    %c0_i32_0 = arith.constant 0 : i32
    %c0_i32_1 = arith.constant 0 : i32
    %c0_i32_2 = arith.constant 0 : i32
    return %c0_i32, %c0_i32_0, %c0_i32_1 : i32, i32, i32
  }
  func.func @transform_15(%arg0: i32) -> (i32, i32, i32) {
    %c0_i32 = arith.constant 0 : i32
    %c0_i32_0 = arith.constant 0 : i32
    %c0_i32_1 = arith.constant 0 : i32
    %c0_i32_2 = arith.constant 0 : i32
    return %c0_i32, %c0_i32_0, %c0_i32_1 : i32, i32, i32
  }
  func.func @transform_16(%arg0: i32) -> (i32, i32, i32) {
    %c0_i32 = arith.constant 0 : i32
    %c0_i32_0 = arith.constant 0 : i32
    %c0_i32_1 = arith.constant 0 : i32
    %c0_i32_2 = arith.constant 0 : i32
    return %c0_i32, %c0_i32_0, %c0_i32_1 : i32, i32, i32
  }
  func.func @transform_17(%arg0: i32) -> (i32, i32, i32) {
    %c0_i32 = arith.constant 0 : i32
    %c0_i32_0 = arith.constant 0 : i32
    %c0_i32_1 = arith.constant 0 : i32
    %c0_i32_2 = arith.constant 0 : i32
    return %c0_i32, %c0_i32_0, %c0_i32_1 : i32, i32, i32
  }
  func.func @transform_18(%arg0: i32) -> (i32, i32, i32) {
    %c0_i32 = arith.constant 0 : i32
    %c0_i32_0 = arith.constant 0 : i32
    %c0_i32_1 = arith.constant 0 : i32
    %c0_i32_2 = arith.constant 0 : i32
    return %c0_i32, %c0_i32_0, %c0_i32_1 : i32, i32, i32
  }
  func.func @transform_19(%arg0: i32) -> (i32, i32, i32) {
    %c0_i32 = arith.constant 0 : i32
    %c0_i32_0 = arith.constant 0 : i32
    %c0_i32_1 = arith.constant 0 : i32
    %c0_i32_2 = arith.constant 0 : i32
    return %c0_i32, %c0_i32_0, %c0_i32_1 : i32, i32, i32
  }
  func.func @transform_20(%arg0: i32) -> (i32, i32, i32) {
    %c0_i32 = arith.constant 0 : i32
    %c0_i32_0 = arith.constant 0 : i32
    %c0_i32_1 = arith.constant 0 : i32
    %c0_i32_2 = arith.constant 0 : i32
    return %c0_i32, %c0_i32_0, %c0_i32_1 : i32, i32, i32
  }
  func.func @transform_21(%arg0: i32) -> (i32, i32) {
    %c0_i32 = arith.constant 0 : i32
    %c0_i32_0 = arith.constant 0 : i32
    %c0_i32_1 = arith.constant 0 : i32
    return %c0_i32, %c0_i32_0 : i32, i32
  }
  func.func @transform_22(%arg0: i32) -> (i32, i32) {
    %c0_i32 = arith.constant 0 : i32
    %c0_i32_0 = arith.constant 0 : i32
    %c0_i32_1 = arith.constant 0 : i32
    return %c0_i32, %c0_i32_0 : i32, i32
  }
  func.func @transform_23(%arg0: i32) -> (i32, i32, i32) {
    %c0_i32 = arith.constant 0 : i32
    %c0_i32_0 = arith.constant 0 : i32
    %c0_i32_1 = arith.constant 0 : i32
    return %arg0, %c0_i32, %c0_i32_0 : i32, i32, i32
  }
}

</mosaic_0001>

<bundles_post_ra>
// kernel: tpu_custom_call.1
= control target key start
LH: loop header
LB: loop body
LE: loop exit
PB: predicated region body
PF: predicated region fallthrough
CT: control target
= control target key end

     0   :  { %s12484_s0 = inlined_call_operand.vmem [shape: f32[2,8,32], index: 0, kind: input, shape index: {}]   ;;  %s12485_s1 = inlined_call_operand.vmem [shape: f32[2,8,32], index: 1, kind: input, shape index: {}]   ;;  %s12486_s2 = inlined_call_operand.vmem [shape: f32[2,8,8], index: 2, kind: input, shape index: {}]   ;;  %s12487_s3 = inlined_call_operand.vmem [shape: f32[2,8,8], index: 3, kind: input, shape index: {}]   ;;  %s12488_s4 = inlined_call_operand.vmem [shape: f32[2,12,32,8], index: 4, kind: input, shape index: {}]   ;;  %s12489_s5 = inlined_call_operand.vmem [shape: f32[2,4,8,32], index: 5, kind: input, shape index: {}]   ;;  %s12490_s6 = inlined_call_operand.vmem [shape: f32[2,1,32], index: 6, kind: input, shape index: {}]   ;;  %s12491_s7 = inlined_call_operand.vmem [shape: f32[2,1,32], index: 7, kind: input, shape index: {}]   ;;  %s12492_s8 = inlined_call_operand.vmem [shape: f32[2,1,32], index: 8, kind: input, shape index: {}]   ;;  %s12493_s9 = inlined_call_operand.vmem [shape: f32[2,4,32,8], index: 9, kind: input, shape index: {}]   ;;  %s12494_s10 = inlined_call_operand.vmem [shape: f32[2,8,32,8], index: 10, kind: input, shape index: {}]   ;;  %s12495_s11 = inlined_call_operand.vmem [shape: f32[2,4,8,32], index: 11, kind: input, shape index: {}]   ;;  %s12496_s12 = inlined_call_operand.vmem [shape: f32[2,1,32], index: 12, kind: input, shape index: {}]   ;;  %s12497_s13 = inlined_call_operand.vmem [shape: f32[2,1,32], index: 13, kind: input, shape index: {}]   ;;  %s12498_s14 = inlined_call_operand.vmem [shape: f32[2,1,32], index: 14, kind: input, shape index: {}]   ;;  %s12499_s15 = inlined_call_operand.vmem [shape: f32[2,32,64], index: 15, kind: input, shape index: {}]   ;;  %s12500_s16 = inlined_call_operand.vmem [shape: f32[2,1,64], index: 16, kind: input, shape index: {}]   ;;  %s12501_s17 = inlined_call_operand.vmem [shape: f32[2,64,32], index: 17, kind: input, shape index: {}]   ;;  %s12502_s18 = inlined_call_operand.vmem [shape: f32[2,1,32], index: 18, kind: input, shape index: {}]   ;;  %s12503_s19 = inlined_call_operand.vmem [shape: f32[2,1,32], index: 19, kind: input, shape index: {}]   ;;  %s12504_s20 = inlined_call_operand.vmem [shape: f32[2,1,32], index: 20, kind: input, shape index: {}]   ;;  %s12505_s21 = inlined_call_operand.vmem [shape: f32[32,128], index: 21, kind: input, shape index: {}]   ;;  %s12506_s22 = inlined_call_operand.vmem [shape: f32[1,128], index: 22, kind: input, shape index: {}]   ;;  %s12507_s23 = inlined_call_operand.hbm [shape: f32[2,8,128], index: 23, kind: output, shape index: {}]  }
   0x1   :  { %12526 = sst [smem:[#allocation14_spill]] %s12484_s0 }
   0x2   :  { %12527 = sst [smem:[#allocation15_spill]] %s12485_s1 }
   0x3   :  { %12528 = sst [smem:[#allocation16_spill]] %s12486_s2 }
   0x4   :  { %12529 = sst [smem:[#allocation17_spill]] %s12487_s3 }
   0x5   :  { %12530 = sst [smem:[#allocation18_spill]] %s12488_s4 }
   0x6   :  { %12531 = sst [smem:[#allocation19_spill]] %s12489_s5 }
   0x7   :  { %12532 = sst [smem:[#allocation20_spill]] %s12490_s6 }
   0x8   :  { %12533 = sst [smem:[#allocation21_spill]] %s12491_s7 }
   0x9   :  { %12534 = sst [smem:[#allocation22_spill]] %s12505_s21 }
   0xa   :  { %12535 = sst [smem:[#allocation23_spill]] %s12506_s22 }
   0xb   :  { %12536 = sst [smem:[#allocation24_spill]] %s12507_s23 }
   0xc   :  { %28 = vsyncpa [#allocation3], 0 }
   0xd   :  { %30 = vsyncpa [#allocation3 + $0x1], 0  ;;  %s10977_s4 = smov 0   ;;  %s10979_s30 = smov 0  }
   0xe   :  { %s10981_s24 = smov 0   ;;  %s10983_s25 = smov 0  }
   0xf LB: > { %12537 = sst [smem:[#allocation5_spill]] %s10839_s4  ;;  %s10998_s5 = sadd.s32 4294967295, %s10851_s25   ;;  %s10851_s25 = sphi %s10983_s25, %s12567_s25   ;;  %s10847_s24 = sphi %s10981_s24, %s12570_s24   ;;  %s10843_s30 = sphi %s10979_s30, %s12569_s30   ;;  %s10839_s4 = sphi %s10977_s4, %s12568_s4  }
  0x10   : > { %12538 = sst [smem:[#allocation6_spill]] %s10843_s30  ;;  %s8853_s1 = sadd.s32 4294967294, %s10851_s25  }
  0x11   : > { %12539 = sst [smem:[#allocation7_spill]] %s10847_s24  ;;  %s11002_s26 = sadd.s32 1, %s10851_s25  }
  0x12   : > { %12540 = sst [smem:[#allocation8_spill]] %s10851_s25  ;;  %s546_s2 = sadd.s32 1, %s10847_s24 }
  0x13   : > { %12541 = sst [smem:[#allocation9_spill]] %s10998_s5  ;;  %s543_s6 = ssub.s32 %s10851_s25, %s11002_s26 }
  0x14   : > { %12542 = sst [smem:[#allocation10_spill]] %s11002_s26  ;;  %p556_p0 = scmp.ne.s32.totalorder %s10847_s24, %s10843_s30 }
  0x15   : > { %p544_p1 = scmp.eq.s32.totalorder %s543_s6, 0  ;;  %p557_p2 = scmp.eq.s32.totalorder %s10998_s5, 1 }
  0x16   : > { %p562_p3 = scmp.ne.s32.totalorder %s10843_s30, %s10839_s4  ;;  %p563_p4 = scmp.eq.s32.totalorder %s8853_s1, 1 }
  0x17   : > { %s11013_s27 = scalar_select %p544_p1, %s10847_s24, %s546_s2  }
  0x18   : > { %p11015_p5 = por %p557_p2, %p556_p0  ;;  %p11019_p6 = por %p563_p4, %p562_p3 }
  0x19   : > { %12543 = sst [smem:[#allocation11_spill]] %s11013_s27  ;;  %p8856_p7 = scmp.ge.s32.totalorder %s10851_s25, 1 }
  0x1a   : > { %s12544_s7 = scalar_select %p11015_p5, 1, 0 }
  0x1b   : > { %s12546_s28 = scalar_select %p11019_p6, 1, 0 }
  0x1c   : > { %12545 = sst [smem:[#allocation12_spill]] %s12544_s7  ;;  %p666_p8 = scmp.lt.s32.totalorder %s10851_s25, 3 }
  0x1d   : > { %12547 = sst [smem:[#allocation13_spill]] %s12546_s28 }
  0x1e   : > { %p667_p9 = pnand %p8856_p7, %p666_p8 }
  0x1f   : > { %s12548_s0 = sld [smem:[#allocation18_spill]] (!%p667_p9)  ;;  %v10853_v3 = vmov (!%p667_p9), 0.0|0.0   ;;  %p741_p10 = scmp.lt.s32.totalorder (!%p667_p9), %s10998_s5, 1  ;;  %vm10854_vm0 = vmmov (!%p667_p9), 0   ;;  %v10855_v11 = vmov (!%p667_p9), 0.0   ;;  %vm809_vm1 = vcmask (!%p667_p9), 261120  }
  0x20   : > { %670 = sbr.rel (%p667_p9) target bundleno = 7823 (0x1e8f), region = 112  ;;  %10338 = vmatprep.subr.bf16.mxu0 (!%p667_p9), %v10853_v3  ;;  %10344 = vmatprep.subr.bf16.mxu1 (!%p667_p9), %v10853_v3  ;;  %s12549_s29 = sld [smem:[#allocation14_spill]] (!%p667_p9)  ;;  %vm1658_vm2 = vcmask (!%p667_p9), 64512   ;;  %vm4601_vm3 = vcmask (!%p667_p9), 523264  }
  0x21   : > { %9507 = vmatprep.mubr.msk.f32.mxu0 (!%p667_p9), %vm10854_vm0, %v10855_v11  ;;  %9518 = vmatprep.mubr.msk.f32.mxu1 (!%p667_p9), %vm10854_vm0, %v10855_v11  ;;  %s12550_s6 = sld [smem:[#allocation16_spill]] (!%p667_p9)  ;;  %s12551_s4 = sld [smem:[#allocation19_spill]] (!%p667_p9) }
  0x22   : > { %s12556_s7 = sld [smem:[#allocation15_spill]] (!%p667_p9) }
  0x25   : > { %v761_v0 = vld [vmem:[%s12548_s0] sm:$0xff] (!%p667_p9)  ;;  %v762_v1 = vld [vmem:[%s12548_s0 + $0x8] sm:$0xff] (!%p667_p9)  ;;  %v763_v6 = vld [vmem:[%s12548_s0 + $0x10] sm:$0xff] (!%p667_p9) }
  0x26   : > { %v765_v2 = vld [vmem:[%s12548_s0 + $0x20] sm:$0xff] (!%p667_p9)  ;;  %v10339_v4 = vpack.c.bf16 (!%p667_p9), %v762_v1, %v761_v0  ;;  %v766_v5 = vld [vmem:[%s12548_s0 + $0x28] sm:$0xff] (!%p667_p9)  ;;  %v764_v7 = vld [vmem:[%s12548_s0 + $0x18] sm:$0xff] (!%p667_p9) }
  0x27   : > { %v10345_v8 = vpack.c.bf16 %v766_v5, %v765_v2  ;;  %v767_v9 = vld [vmem:[%s12548_s0 + $0x30] sm:$0xff]  ;;  %v768_v10 = vld [vmem:[%s12548_s0 + $0x38] sm:$0xff]  ;;  %v10342_v12 = vpack.c.bf16 %v764_v7, %v763_v6  ;;  %s742_s24 = scalar_select %p741_p10, %s10998_s5, 1  ;;  %v769_v14 = vld [vmem:[%s12548_s0 + $0x40] sm:$0xff] }
  0x28   : > { %10340 = vmatpush3.bf16.msra.mxu0 %v10339_v4  ;;  %v10348_v13 = vpack.c.bf16 %v768_v10, %v767_v9  ;;  %v770_v15 = vld [vmem:[%s12548_s0 + $0x48] sm:$0xff]  ;;  %v773_v16 = vld [vmem:[%s12548_s0 + $0x60] sm:$0xff]  ;;  %v771_v21 = vld [vmem:[%s12548_s0 + $0x50] sm:$0xff]  ;;  %s12552_s28 = smov %s12551_s4  ;;  %s12557_s5 = sld [smem:[#allocation17_spill]] }
  0x29   : > { %10346 = vmatpush3.bf16.msra.mxu1 %v10345_v8  ;;  %10341 = vmatprep.subr.bf16.mxu0 %v10853_v3  ;;  %s11065_s3 = sshll.u32 %s742_s24, 3  ;;  %v774_v17 = vld [vmem:[%s12548_s0 + $0x68] sm:$0xff]  ;;  %v10351_v19 = vpack.c.bf16 %v770_v15, %v769_v14  ;;  %v772_v22 = vld [vmem:[%s12548_s0 + $0x58] sm:$0xff]  ;;  %v775_v23 = vld [vmem:[%s12548_s0 + $0x70] sm:$0xff] }
  0x2a   : > { %10347 = vmatprep.subr.bf16.mxu1 %v10853_v3  ;;  %s744_s23 = scalar_lea.vmem %s12549_s29, %s11065_s3  ;;  %v10357_v20 = vpack.c.bf16 %v774_v17, %v773_v16  ;;  %v776_v24 = vld [vmem:[%s12548_s0 + $0x78] sm:$0xff]  ;;  %v10354_v25 = vpack.c.bf16 %v772_v22, %v771_v21  ;;  %v777_v27 = vld [vmem:[%s12548_s0 + $0x80] sm:$0xff]  ;;  %v778_v28 = vld [vmem:[%s12548_s0 + $0x88] sm:$0xff]  ;;  %s11287_s26 = scalar_lea.vmem %s12550_s6, %s11065_s3 }
  0x2b   : > { %v11077_v18 = vld [vmem:[%s744_s23] sm:$0xff]  ;;  %v10360_v26 = vpack.c.bf16 %v776_v24, %v775_v23  ;;  %v782_v30 = vld [vmem:[%s12548_s0 + $0xa8] sm:$0xff]  ;;  %v10363_v31 = vpack.c.bf16 %v778_v28, %v777_v27  ;;  %v779_v33 = vld [vmem:[%s12548_s0 + $0x90] sm:$0xff]  ;;  %s12555_s23 = sld [smem:[#allocation21_spill]]  ;;  %s11455_s30 = scalar_lea.vmem %s12556_s7, %s11065_s3 }
  0x2c   : > { %10343 = vmatpush3.bf16.msra.mxu0 %v10342_v12  ;;  %v781_v29 = vld [vmem:[%s12548_s0 + $0xa0] sm:$0xff]  ;;  %v780_v34 = vld [vmem:[%s12548_s0 + $0x98] sm:$0xff]  ;;  %v783_v35 = vld [vmem:[%s12548_s0 + $0xb0] sm:$0xff]  ;;  %s12559_s29 = sld [smem:[#allocation6_spill]] }
  0x2d   : > { %10349 = vmatpush3.bf16.msra.mxu1 %v10348_v13  ;;  %10350 = vmatprep.subr.bf16.mxu0 %v10853_v3  ;;  %v10369_v32 = vpack.c.bf16 %v782_v30, %v781_v29  ;;  %v784_v36 = vld [vmem:[%s12548_s0 + $0xb8] sm:$0xff]  ;;  %v10366_v37 = vpack.c.bf16 %v780_v34, %v779_v33  ;;  %v785_v39 = vld [vmem:[%s12548_s0 + $0xc0] sm:$0xff]  ;;  %v786_v40 = vld [vmem:[%s12548_s0 + $0xc8] sm:$0xff] }
  0x2e   : > { %10356 = vmatprep.subr.bf16.mxu1 %v10853_v3  ;;  %v10372_v38 = vpack.c.bf16 %v784_v36, %v783_v35  ;;  %v789_v41 = vld [vmem:[%s12548_s0 + $0xe0] sm:$0xff]  ;;  %v790_v42 = vld [vmem:[%s12548_s0 + $0xe8] sm:$0xff]  ;;  %v10375_v43 = vpack.c.bf16 %v786_v40, %v785_v39  ;;  %v787_v45 = vld [vmem:[%s12548_s0 + $0xd0] sm:$0xff]  ;;  %s11611_s7 = scalar_lea.vmem %s12557_s5, %s11065_s3  ;;  %s12562_s5 = sld [smem:[#allocation23_spill]] }
  0x2f   : > { %9508 = vmatmul.mubr.msk.f32.vlgmr.msra.gmra.mrb[0].mxu0 %vm809_vm1, %v11077_v18  ;;  %v10381_v44 = vpack.c.bf16 %v790_v42, %v789_v41  ;;  %v788_v46 = vld [vmem:[%s12548_s0 + $0xd8] sm:$0xff]  ;;  %v791_v47 = vld [vmem:[%s12548_s0 + $0xf0] sm:$0xff]  ;;  %v793_v51 = vld [vmem:[%s12548_s0 + $0x100] sm:$0xff] }
  0x30   : > { %9519 = vmatmul.mubr.msk.f32.vlgmr.msra.gmra.mrb[0].mxu1 %vm809_vm1, %v11077_v18  ;;  %10352 = vmatpush3.bf16.msra.mxu0 %v10351_v19  ;;  %v792_v48 = vld [vmem:[%s12548_s0 + $0xf8] sm:$0xff]  ;;  %v10378_v49 = vpack.c.bf16 %v788_v46, %v787_v45  ;;  %v794_v52 = vld [vmem:[%s12548_s0 + $0x108] sm:$0xff]  ;;  %v797_v53 = vld [vmem:[%s12548_s0 + $0x120] sm:$0xff] }
  0x31   : > { %10358 = vmatpush3.bf16.msra.mxu1 %v10357_v20  ;;  %10353 = vmatprep.subr.bf16.mxu0 %v10853_v3  ;;  %v10384_v50 = vpack.c.bf16 %v792_v48, %v791_v47  ;;  %v798_v54 = vld [vmem:[%s12548_s0 + $0x128] sm:$0xff]  ;;  %v10387_v55 = vpack.c.bf16 %v794_v52, %v793_v51  ;;  %v795_v57 = vld [vmem:[%s12548_s0 + $0x110] sm:$0xff]  ;;  %v796_v58 = vld [vmem:[%s12548_s0 + $0x118] sm:$0xff] }
  0x32   : > { %10359 = vmatprep.subr.bf16.mxu1 %v10853_v3  ;;  %9529 = vmatprep.mubr.msk.f32.mxu0 %vm10854_vm0, %v10855_v11  ;;  %v10393_v56 = vpack.c.bf16 %v798_v54, %v797_v53  ;;  %v799_v59 = vld [vmem:[%s12548_s0 + $0x130] sm:$0xff]  ;;  %v10390_v60 = vpack.c.bf16 %v796_v58, %v795_v57  ;;  %v800_v61 = vld [vmem:[%s12548_s0 + $0x138] sm:$0xff]  ;;  %v801_v63 = vld [vmem:[%s12548_s0 + $0x140] sm:$0xff]  ;;  %s738_s27 = sand.u32 1, %s12559_s29  }
  0x33   : > { %9540 = vmatprep.mubr.msk.f32.mxu1 %vm10854_vm0, %v10855_v11  ;;  %v10396_v62 = vpack.c.bf16 %v800_v61, %v799_v59  ;;  %v802_v0 = vld [vmem:[%s12548_s0 + $0x148] sm:$0xff]  ;;  %v805_v1 = vld [vmem:[%s12548_s0 + $0x160] sm:$0xff]  ;;  %v803_v6 = vld [vmem:[%s12548_s0 + $0x150] sm:$0xff]  ;;  %s8857_s21 = sshll.u32 %s738_s27, 3  ;;  %s8745_s29 = scalar_lea.sflag [#allocation3], %s738_s27 }
  0x34   : > { %10355 = vmatpush3.bf16.msra.mxu0 %v10354_v25  ;;  %v10399_v2 = vpack.c.bf16 %v802_v0, %v801_v63  ;;  %v806_v4 = vld [vmem:[%s12548_s0 + $0x168] sm:$0xff]  ;;  %v804_v7 = vld [vmem:[%s12548_s0 + $0x158] sm:$0xff]  ;;  %v807_v8 = vld [vmem:[%s12548_s0 + $0x170] sm:$0xff] }
  0x35   : > { %10361 = vmatpush3.bf16.msra.mxu1 %v10360_v26  ;;  %10362 = vmatprep.subr.bf16.mxu0 %v10853_v3  ;;  %v10405_v5 = vpack.c.bf16 %v806_v4, %v805_v1  ;;  %v10402_v9 = vpack.c.bf16 %v804_v7, %v803_v6  ;;  %v808_v10 = vld [vmem:[%s12548_s0 + $0x178] sm:$0xff] }
  0x36   : > { %10368 = vmatprep.subr.bf16.mxu1 %v10853_v3  ;;  %v10408_v12 = vpack.c.bf16 %v808_v10, %v807_v8 }
  0x37   : > { %9530 = vmatmul.mubr.msk.f32.vlgmr.msra.gmra.mrb[2].mxu0 %vm809_vm1, %v11077_v18 }
  0x38   : > { %9541 = vmatmul.mubr.msk.f32.vlgmr.msra.gmra.mrb[2].mxu1 %vm809_vm1, %v11077_v18  ;;  %10364 = vmatpush3.bf16.msra.mxu0 %v10363_v31 }
  0x39   : > { %10370 = vmatpush3.bf16.msra.mxu1 %v10369_v32  ;;  %10365 = vmatprep.subr.bf16.mxu0 %v10853_v3 }
  0x3a   : > { %10371 = vmatprep.subr.bf16.mxu1 %v10853_v3  ;;  %9551 = vmatprep.mubr.msk.f32.mxu0 %vm10854_vm0, %v10855_v11 }
  0x3b   : > { %9562 = vmatprep.mubr.msk.f32.mxu1 %vm10854_vm0, %v10855_v11 }
  0x3c   : > { %10367 = vmatpush3.bf16.msra.mxu0 %v10366_v37 }
  0x3d   : > { %10373 = vmatpush3.bf16.msra.mxu1 %v10372_v38  ;;  %10374 = vmatprep.subr.bf16.mxu0 %v10853_v3  ;;  %v759_v38 = vld [vmem:[%s11287_s26] sm:$0xff] }
  0x3e   : > { %10380 = vmatprep.subr.bf16.mxu1 %v10853_v3 }
  0x3f   : > { %9552 = vmatmul.mubr.msk.f32.vlgmr.msra.gmra.mrb[4].mxu0 %vm809_vm1, %v11077_v18 }
  0x40   : > { %9563 = vmatmul.mubr.msk.f32.vlgmr.msra.gmra.mrb[4].mxu1 %vm809_vm1, %v11077_v18  ;;  %10376 = vmatpush3.bf16.msra.mxu0 %v10375_v43 }
  0x41   : > { %10382 = vmatpush3.bf16.msra.mxu1 %v10381_v44  ;;  %10377 = vmatprep.subr.bf16.mxu0 %v10853_v3 }
  0x42   : > { %10383 = vmatprep.subr.bf16.mxu1 %v10853_v3  ;;  %9573 = vmatprep.mubr.msk.f32.mxu0 %vm10854_vm0, %v10855_v11 }
  0x43   : > { %9584 = vmatprep.mubr.msk.f32.mxu1 %vm10854_vm0, %v10855_v11 }
  0x44   : > { %10379 = vmatpush3.bf16.msra.mxu0 %v10378_v49 }
  0x45   : > { %10385 = vmatpush3.bf16.msra.mxu1 %v10384_v50  ;;  %10386 = vmatprep.subr.bf16.mxu0 %v10853_v3 }
  0x46   : > { %10392 = vmatprep.subr.bf16.mxu1 %v10853_v3 }
  0x47   : > { %9574 = vmatmul.mubr.msk.f32.vlgmr.msra.gmra.mrb[6].mxu0 %vm809_vm1, %v11077_v18 }
  0x48   : > { %9585 = vmatmul.mubr.msk.f32.vlgmr.msra.gmra.mrb[6].mxu1 %vm809_vm1, %v11077_v18  ;;  %10388 = vmatpush3.bf16.msra.mxu0 %v10387_v55 }
  0x49   : > { %10394 = vmatpush3.bf16.msra.mxu1 %v10393_v56  ;;  %10389 = vmatprep.subr.bf16.mxu0 %v10853_v3 }
  0x4a   : > { %10395 = vmatprep.subr.bf16.mxu1 %v10853_v3  ;;  %9595 = vmatprep.mubr.msk.f32.mxu0 %vm10854_vm0, %v10855_v11 }
  0x4b   : > { %9606 = vmatprep.mubr.msk.f32.mxu1 %vm10854_vm0, %v10855_v11 }
  0x4c   : > { %10391 = vmatpush3.bf16.msra.mxu0 %v10390_v60 }
  0x4d   : > { %10397 = vmatpush3.bf16.msra.mxu1 %v10396_v62  ;;  %10398 = vmatprep.subr.bf16.mxu0 %v10853_v3 }
  0x4e   : > { %10404 = vmatprep.subr.bf16.mxu1 %v10853_v3 }
  0x4f   : > { %9596 = vmatmul.mubr.msk.f32.vlgmr.msra.gmra.mrb[8].mxu0 %vm809_vm1, %v11077_v18 }
  0x50   : > { %9607 = vmatmul.mubr.msk.f32.vlgmr.msra.gmra.mrb[8].mxu1 %vm809_vm1, %v11077_v18  ;;  %10400 = vmatpush3.bf16.msra.mxu0 %v10399_v2 }
  0x51   : > { %10406 = vmatpush3.bf16.msra.mxu1 %v10405_v5  ;;  %10401 = vmatprep.subr.bf16.mxu0 %v10853_v3 }
  0x52   : > { %10407 = vmatprep.subr.bf16.mxu1 %v10853_v3  ;;  %9617 = vmatprep.mubr.msk.f32.mxu0 %vm10854_vm0, %v10855_v11 }
  0x53   : > { %9628 = vmatprep.mubr.msk.f32.mxu1 %vm10854_vm0, %v10855_v11 }
  0x54   : > { %10403 = vmatpush3.bf16.msra.mxu0 %v10402_v9 }
  0x55   : > { %10409 = vmatpush3.bf16.msra.mxu1 %v10408_v12  ;;  %9631 = vmatprep.subr.mxu0 %v10855_v11 }
  0x56   : > { %9636 = vmatprep.subr.mxu1 %v10855_v11 }
  0x57   : > { %9618 = vmatmul.mubr.msk.f32.vlgmr.msra.gmra.mrb[10].mxu0 %vm809_vm1, %v11077_v18 }
  0x58   : > { %9629 = vmatmul.mubr.msk.f32.vlgmr.msra.gmra.mrb[10].mxu1 %vm809_vm1, %v11077_v18  ;;  %9633 = vmatprep.mubr.msk.f32.mxu0 %vm10854_vm0, %v10855_v11 }
  0x59   : > { %9638 = vmatprep.mubr.msk.f32.mxu1 %vm10854_vm0, %v10855_v11 }
 0x102   : > { %v879_v13 = vpop.f32.mrb[0].mxu0 }
 0x103   : > { %v9509_v14 = vpop.f32.mrb[1].mxu0  ;;  %v949_v15 = vpop.f32.mrb[0].mxu1 }
 0x104   : > { %v9520_v16 = vpop.f32.mrb[1].mxu1 }
 0x10a   : > { %v1019_v17 = vpop.f32.mrb[2].mxu0 }
 0x10b   : > { %v9531_v19 = vpop.f32.mrb[3].mxu0  ;;  %v1089_v20 = vpop.f32.mrb[2].mxu1 }
 0x10c   : > { %v9542_v21 = vpop.f32.mrb[3].mxu1 }
 0x112   : > { %v1159_v22 = vpop.f32.mrb[4].mxu0 }
 0x113   : > { %v1229_v23 = vpop.f32.mrb[4].mxu1  ;;  %v9553_v24 = vpop.f32.mrb[5].mxu0  ;;  %9632 = vmatpush3.xpose.msk.msra.mxu0 %vm1658_vm2, %v1159_v22 }
 0x114   : > { %9637 = vmatpush3.xpose.msk.msra.mxu1 %vm1658_vm2, %v1229_v23  ;;  %v9564_v25 = vpop.f32.mrb[5].mxu1  ;;  %9641 = vmatprep.subr.mxu0 %v10855_v11 }
 0x115   : > { %9646 = vmatprep.subr.mxu1 %v10855_v11 }
 0x116   : > { %9634 = vmatmul.mubr.msk.f32.vlgmr.msra.gmra.mrb[12].mxu0 %vm1658_vm2, %v879_v13 }
 0x117   : > { %9639 = vmatmul.mubr.msk.f32.vlgmr.msra.gmra.mrb[12].mxu1 %vm1658_vm2, %v949_v15  ;;  %9643 = vmatprep.mubr.msk.f32.mxu0 %vm10854_vm0, %v10855_v11 }
 0x118   : > { %9648 = vmatprep.mubr.msk.f32.mxu1 %vm10854_vm0, %v10855_v11 }
 0x11a   : > { %v1299_v26 = vpop.f32.mrb[6].mxu0 }
 0x11b   : > { %v1369_v27 = vpop.f32.mrb[6].mxu1  ;;  %v9575_v28 = vpop.f32.mrb[7].mxu0  ;;  %9642 = vmatpush3.xpose.msk.msra.mxu0 %vm1658_vm2, %v1299_v26  ;;  %v1653_v26 = vld [vmem:[%s12551_s4] sm:$0xff]  ;;  %s12553_s4 = sld [smem:[#allocation20_spill]] }
 0x11c   : > { %9647 = vmatpush3.xpose.msk.msra.mxu1 %vm1658_vm2, %v1369_v27  ;;  %v9586_v29 = vpop.f32.mrb[7].mxu1  ;;  %9651 = vmatprep.subr.mxu0 %v10855_v11  ;;  %v1654_v27 = vld [vmem:[%s12552_s28 + $0x8] sm:$0xff]  ;;  %v1656_v28 = vld [vmem:[%s12552_s28 + $0x18] sm:$0xff] }
 0x11d   : > { %9656 = vmatprep.subr.mxu1 %v10855_v11 }
 0x11e   : > { %9644 = vmatmul.mubr.msk.f32.vlgmr.msra.gmra.mrb[14].mxu0 %vm1658_vm2, %v1019_v17 }
 0x11f   : > { %9649 = vmatmul.mubr.msk.f32.vlgmr.msra.gmra.mrb[14].mxu1 %vm1658_vm2, %v1089_v20  ;;  %9653 = vmatprep.mubr.msk.f32.mxu0 %vm10854_vm0, %v10855_v11 }
 0x120   : > { %9658 = vmatprep.mubr.msk.f32.mxu1 %vm10854_vm0, %v10855_v11 }
 0x121   : > { %s12554_s1 = smov %s12553_s4 }
 0x122   : > { %v1439_v30 = vpop.f32.mrb[8].mxu0 }
 0x123   : > { %v9597_v31 = vpop.f32.mrb[9].mxu0  ;;  %9652 = vmatpush3.msra.mxu0 %v1439_v30  ;;  %v1509_v32 = vpop.f32.mrb[8].mxu1 }
 0x124   : > { %v9608_v33 = vpop.f32.mrb[9].mxu1  ;;  %9657 = vmatpush3.msra.mxu1 %v1509_v32  ;;  %9661 = vmatprep.subr.mxu0 %v10855_v11  ;;  %v1655_v31 = vld [vmem:[%s12552_s28 + $0x10] sm:$0xff] }
 0x125   : > { %9666 = vmatprep.subr.mxu1 %v10855_v11 }
 0x12a   : > { %v11279_v34 = vpop.f32.mrb[10].mxu0 }
 0x12b   : > { %v9619_v35 = vpop.f32.mrb[11].mxu0  ;;  %v11281_v36 = vpop.f32.mrb[10].mxu1 }
 0x12c   : > { %v9630_v37 = vpop.f32.mrb[11].mxu1 }
 0x1e9   : > { %v1731_v39 = vpop.f32.mrb[12].mxu0 }
 0x1ea   : > { %v1732_v40 = vadd.f32 %v1731_v39, %v759_v38  ;;  %v1807_v41 = vpop.f32.mrb[12].mxu1  ;;  %v9635_v42 = vpop.f32.mrb[13].mxu0 }
 0x1eb   : > { %v9640_v43 = vpop.f32.mrb[13].mxu1  ;;  %v1808_v44 = vadd.f32 %v1807_v41, %v759_v38 }
 0x1ec   : > { %v1963_v45 = vsel %vm1658_vm2, %v1732_v40, -inf }
 0x1ed   : > { %1964 = vmax.xlane.f32.xlu0 %v1963_v45  ;;  %v1966_v46 = vsel %vm1658_vm2, %v1808_v44, -inf }
 0x1f1   : > { %1967 = vmax.xlane.f32.xlu0 %v1966_v46  ;;  %v1883_v47 = vpop.f32.mrb[14].mxu0  ;;  %v8890_v46 = vld [vmem:[%s12553_s4] ss:$0 sm:$0xff] }
 0x1f2   : > { %v1959_v48 = vpop.f32.mrb[14].mxu1  ;;  %v1884_v49 = vadd.f32 %v1883_v47, %v759_v38  ;;  %v9645_v50 = vpop.f32.mrb[15].mxu0 }
 0x1f3   : > { %v9650_v51 = vpop.f32.mrb[15].mxu1  ;;  %v1960_v52 = vadd.f32 %v1959_v48, %v759_v38 }
 0x1f4   : > { %v1969_v53 = vsel %vm1658_vm2, %v1884_v49, -inf }
 0x1f5   : > { %1970 = vmax.xlane.f32.xlu1 %v1969_v53  ;;  %v1972_v54 = vsel %vm1658_vm2, %v1960_v52, -inf }
 0x1f9   : > { %1973 = vmax.xlane.f32.xlu1 %v1972_v54 }
 0x27a   : > { %v1965_v55 = vpop.xlane.xlu0 %1964 }
 0x27b   : > { %v1975_v56 = vsub.f32 %v1732_v40, %v1965_v55 }
 0x27d   : > { %v1979_v57 = vmul.f32 1.442695, %v1975_v56 }
 0x27e   : > { %v1968_v58 = vpop.xlane.xlu0 %1967 }
 0x27f   : > { %10710 = vpow2.f32 %v1979_v57  ;;  %v1976_v59 = vsub.f32 %v1808_v44, %v1968_v58  ;;  %v2631_v58 = vld [vmem:[%s12493_s9] sm:$0xff] }
 0x281   : > { %v1981_v60 = vmul.f32 1.442695, %v1976_v59  ;;  %v2632_v59 = vld [vmem:[%s12493_s9 + $0x8] sm:$0xff] }
 0x282   : > { %v1971_v61 = vpop.xlane.xlu1 %1970 }
 0x283   : > { %10712 = vpow2.f32 %v1981_v60  ;;  %v1977_v62 = vsub.f32 %v1884_v49, %v1971_v61  ;;  %v10411_v60 = vpack.c.bf16 %v2632_v59, %v2631_v58  ;;  %v2636_v61 = vld [vmem:[%s12493_s9 + $0x28] sm:$0xff] }
 0x285   : > { %v1983_v63 = vmul.f32 1.442695, %v1977_v62 }
 0x286   : > { %v1974_v0 = vpop.xlane.xlu1 %1973 }
 0x287   : > { %10714 = vpow2.f32 %v1983_v63  ;;  %v1978_v1 = vsub.f32 %v1960_v52, %v1974_v0  ;;  %v2633_v63 = vld [vmem:[%s12493_s9 + $0x10] sm:$0xff]  ;;  %v2634_v0 = vld [vmem:[%s12493_s9 + $0x18] sm:$0xff] }
 0x289   : > { %v10711_v2 = vpop.eup %10710  ;;  %v1985_v4 = vmul.f32 1.442695, %v1978_v1  ;;  %v2637_v1 = vld [vmem:[%s12493_s9 + $0x30] sm:$0xff] }
 0x28a   : > { %v1987_v5 = vsel %vm1658_vm2, %v10711_v2, 0.0 }
 0x28b   : > { %10716 = vpow2.f32 %v1985_v4  ;;  %1988 = vadd.xlane.f32.xlu0 %v1987_v5  ;;  %v2638_v4 = vld [vmem:[%s12493_s9 + $0x38] sm:$0xff] }
 0x28c   : > { %v10420_v5 = vpack.c.bf16 %v2638_v4, %v2637_v1  ;;  %v2954_v1 = vld [vmem:[%s12494_s10 + $0xc0] sm:$0xff] }
 0x28d   : > { %v10713_v6 = vpop.eup %10712  ;;  %v2958_v4 = vld [vmem:[%s12494_s10 + $0xe0] sm:$0xff] }
 0x28e   : > { %v1990_v7 = vsel %vm1658_vm2, %v10713_v6, 0.0 }
 0x28f   : > { %1991 = vadd.xlane.f32.xlu1 %v1990_v7 }
 0x291   : > { %v10715_v8 = vpop.eup %10714 }
 0x292   : > { %v1993_v9 = vsel %vm1658_vm2, %v10715_v8, 0.0 }
 0x293   : > { %1994 = vadd.xlane.f32.xlu0 %v1993_v9 }
 0x295   : > { %v10717_v10 = vpop.eup %10716 }
 0x296   : > { %v1996_v12 = vsel %vm1658_vm2, %v10717_v10, 0.0 }
 0x297   : > { %1997 = vadd.xlane.f32.xlu1 %v1996_v12  ;;  %v2639_v12 = vld [vmem:[%s12493_s9 + $0x40] sm:$0xff] }
 0x318   : > { %v1989_v13 = vpop.xlane.xlu0 %1988 }
 0x319   : > { %10718 = vrcp.f32 %v1989_v13 }
 0x31c   : > { %v1992_v14 = vpop.xlane.xlu1 %1991 }
 0x31d   : > { %10720 = vrcp.f32 %v1992_v14  ;;  %v2640_v14 = vld [vmem:[%s12493_s9 + $0x48] sm:$0xff] }
 0x320   : > { %v1995_v15 = vpop.xlane.xlu0 %1994 }
 0x321   : > { %10722 = vrcp.f32 %v1995_v15  ;;  %v2643_v15 = vld [vmem:[%s12493_s9 + $0x60] sm:$0xff] }
 0x323   : > { %v10719_v16 = vpop.eup %10718 }
 0x324   : > { %v2003_v17 = vmul.f32 %v10719_v16, %v10711_v2  ;;  %v1998_v19 = vpop.xlane.xlu1 %1997  ;;  %v10414_v2 = vpack.c.bf16 %v2634_v0, %v2633_v63  ;;  %v2644_v16 = vld [vmem:[%s12493_s9 + $0x68] sm:$0xff] }
 0x325   : > { %10724 = vrcp.f32 %v1998_v19 }
 0x326   : > { %9654 = vmatmul.mubr.msk.f32.vlgmr.msra.gmra.mrb[16].mxu0 %vm1658_vm2, %v2003_v17  ;;  %v8892_v17 = vld [vmem:[%s12492_s8] ss:$0 sm:$0xff] }
 0x327   : > { %v10721_v20 = vpop.eup %10720  ;;  %9662 = vmatpush3.msra.mxu0 %v11279_v34  ;;  %9663 = vmatprep.mubr.msk.f32.mxu0 %vm10854_vm0, %v10855_v11 }
 0x328   : > { %v2004_v21 = vmul.f32 %v10721_v20, %v10713_v6  ;;  %9671 = vmatprep.subr.mxu0 %v10855_v11  ;;  %v10423_v20 = vpack.c.bf16 %v2640_v14, %v2639_v12 }
 0x32a   : > { %9659 = vmatmul.mubr.msk.f32.vlgmr.msra.gmra.mrb[16].mxu1 %vm1658_vm2, %v2004_v21  ;;  %v10429_v21 = vpack.c.bf16 %v2644_v16, %v2643_v15 }
 0x32b   : > { %v10723_v22 = vpop.eup %10722  ;;  %9667 = vmatpush3.msra.mxu1 %v11281_v36  ;;  %9668 = vmatprep.mubr.msk.f32.mxu1 %vm10854_vm0, %v10855_v11 }
 0x32c   : > { %v2005_v23 = vmul.f32 %v10723_v22, %v10715_v8  ;;  %9676 = vmatprep.subr.mxu1 %v10855_v11  ;;  %v2641_v22 = vld [vmem:[%s12493_s9 + $0x50] sm:$0xff] }
 0x32e   : > { %9664 = vmatmul.mubr.msk.f32.vlgmr.msra.gmra.mrb[18].mxu0 %vm1658_vm2, %v2005_v23 }
 0x32f   : > { %v10725_v24 = vpop.eup %10724  ;;  %9673 = vmatprep.mubr.msk.f32.mxu0 %vm10854_vm0, %v10855_v11  ;;  %9672 = vmatpush3.msra.mxu0 %v1654_v27 }
 0x330   : > { %v2006_v25 = vmul.f32 %v10725_v24, %v10717_v10  ;;  %9681 = vmatprep.subr.mxu0 %v10855_v11  ;;  %v8891_v10 = vld [vmem:[%s12555_s23] ss:$0 sm:$0xff]  ;;  %v2642_v24 = vld [vmem:[%s12493_s9 + $0x58] sm:$0xff] }
 0x331   : > { %v10426_v27 = vpack.c.bf16 %v2642_v24, %v2641_v22 }
 0x332   : > { %9669 = vmatmul.mubr.msk.f32.vlgmr.msra.gmra.mrb[18].mxu1 %vm1658_vm2, %v2006_v25  ;;  %v2645_v25 = vld [vmem:[%s12493_s9 + $0x70] sm:$0xff] }
 0x333   : > { %9678 = vmatprep.mubr.msk.f32.mxu1 %vm10854_vm0, %v10855_v11  ;;  %9677 = vmatpush3.msra.mxu1 %v1653_v26  ;;  %v2646_v26 = vld [vmem:[%s12493_s9 + $0x78] sm:$0xff] }
 0x334   : > { %9686 = vmatprep.subr.mxu1 %v10855_v11 }
 0x3f9   : > { %v2076_v29 = vpop.f32.mrb[16].mxu0 }
 0x3fa   : > { %v9655_v30 = vpop.f32.mrb[17].mxu0  ;;  %9679 = vmatmul.mubr.msk.f32.vlgmr.msra.gmra.mrb[20].mxu1 %vm1658_vm2, %v2076_v29  ;;  %v2930_v29 = vld [vmem:[%s12494_s10] sm:$0xff] }
 0x3fb   : > { %9687 = vmatpush3.msra.mxu1 %v1656_v28  ;;  %9688 = vmatprep.mubr.msk.f32.mxu1 %vm10854_vm0, %v10855_v11  ;;  %v10432_v28 = vpack.c.bf16 %v2646_v26, %v2645_v25  ;;  %v2931_v30 = vld [vmem:[%s12494_s10 + $0x8] sm:$0xff] }
 0x3fc   : > { %10416 = vmatprep.subr.bf16.mxu1 %v10853_v3 }
 0x3fd   : > { %v2149_v32 = vpop.f32.mrb[16].mxu1 }
 0x3fe   : > { %v9660_v33 = vpop.f32.mrb[17].mxu1  ;;  %9674 = vmatmul.mubr.msk.f32.vlgmr.msra.gmra.mrb[20].mxu0 %vm1658_vm2, %v2149_v32  ;;  %v2935_v32 = vld [vmem:[%s12494_s10 + $0x28] sm:$0xff] }
 0x3ff   : > { %9682 = vmatpush3.msra.mxu0 %v1655_v31  ;;  %9683 = vmatprep.mubr.msk.f32.mxu0 %vm10854_vm0, %v10855_v11  ;;  %v2934_v31 = vld [vmem:[%s12494_s10 + $0x20] sm:$0xff]  ;;  %v10435_v33 = vpack.c.bf16 %v2931_v30, %v2930_v29 }
 0x400   : > { %10410 = vmatprep.subr.bf16.mxu0 %v10853_v3 }
 0x401   : > { %v2222_v34 = vpop.f32.mrb[18].mxu0 }
 0x402   : > { %v9665_v35 = vpop.f32.mrb[19].mxu0  ;;  %9684 = vmatmul.mubr.msk.f32.vlgmr.msra.gmra.mrb[22].mxu0 %vm1658_vm2, %v2222_v34  ;;  %v10441_v34 = vpack.c.bf16 %v2935_v32, %v2934_v31 }
 0x403   : > { %9699 = vmatprep.mubr.msk.f32.mxu0 %vm10854_vm0, %v10855_v11  ;;  %10412 = vmatpush3.bf16.msra.mxu0 %v10411_v60  ;;  %v2932_v35 = vld [vmem:[%s12494_s10 + $0x10] sm:$0xff]  ;;  %v2949_v60 = vld [vmem:[%s12494_s10 + $0x98] sm:$0xff] }
 0x404   : > { %10413 = vmatprep.subr.bf16.mxu0 %v10853_v3 }
 0x405   : > { %v2295_v36 = vpop.f32.mrb[18].mxu1 }
 0x406   : > { %v9670_v37 = vpop.f32.mrb[19].mxu1  ;;  %9689 = vmatmul.mubr.msk.f32.vlgmr.msra.gmra.mrb[22].mxu1 %vm1658_vm2, %v2295_v36  ;;  %v2933_v36 = vld [vmem:[%s12494_s10 + $0x18] sm:$0xff] }
 0x407   : > { %9710 = vmatprep.mubr.msk.f32.mxu1 %vm10854_vm0, %v10855_v11  ;;  %10415 = vmatpush3.bf16.msra.mxu0 %v10414_v2  ;;  %v2936_v37 = vld [vmem:[%s12494_s10 + $0x30] sm:$0xff]  ;;  %v2955_v2 = vld [vmem:[%s12494_s10 + $0xc8] sm:$0xff] }
 0x408   : > { %10422 = vmatprep.subr.bf16.mxu0 %v10853_v3 }
 0x4cd   : > { %v2441_v38 = vpop.f32.mrb[20].mxu1 }
 0x4ce   : > { %v9680_v39 = vpop.f32.mrb[21].mxu1 }
 0x4cf   : > { %v10438_v39 = vpack.c.bf16 %v2933_v36, %v2932_v35 }
 0x4d1   : > { %v2368_v40 = vpop.f32.mrb[20].mxu0 }
 0x4d2   : > { %v2442_v41 = vadd.f32 %v2441_v38, %v2368_v40  ;;  %v9675_v42 = vpop.f32.mrb[21].mxu0  ;;  %v2937_v38 = vld [vmem:[%s12494_s10 + $0x38] sm:$0xff] }
 0x4d3   : > { %v10444_v40 = vpack.c.bf16 %v2937_v38, %v2936_v37  ;;  %v2939_v42 = vld [vmem:[%s12494_s10 + $0x48] sm:$0xff] }
 0x4d5   : > { %v2514_v43 = vpop.f32.mrb[22].mxu0 }
 0x4d6   : > { %v2518_v44 = vadd.f32 %v2514_v43, %v2442_v41  ;;  %v9685_v45 = vpop.f32.mrb[23].mxu0  ;;  %v2938_v41 = vld [vmem:[%s12494_s10 + $0x40] sm:$0xff] }
 0x4d7   : > { %v2942_v43 = vld [vmem:[%s12494_s10 + $0x60] sm:$0xff] }
 0x4d8   : > { %v11473_v45 = vld [vmem:[%s11455_s30] sm:$0xff] }
 0x4d9   : > { %v2588_v47 = vpop.f32.mrb[22].mxu1 }
 0x4da   : > { %v2592_v48 = vadd.f32 %v2588_v47, %v2518_v44  ;;  %v9690_v49 = vpop.f32.mrb[23].mxu1  ;;  %v2943_v44 = vld [vmem:[%s12494_s10 + $0x68] sm:$0xff] }
 0x4db   : > { %v10453_v47 = vpack.c.bf16 %v2943_v44, %v2942_v43  ;;  %v2941_v49 = vld [vmem:[%s12494_s10 + $0x58] sm:$0xff] }
 0x4dc   : > { %v2599_v50 = vadd.f32 %v8890_v46, %v2592_v48  ;;  %v10447_v46 = vpack.c.bf16 %v2939_v42, %v2938_v41  ;;  %v2940_v48 = vld [vmem:[%s12494_s10 + $0x50] sm:$0xff]  ;;  %v760_v41 = vld [vmem:[%s11611_s7] sm:$0xff] }
 0x4de   : > { %v2600_v51 = vadd.f32 %v2599_v50, %v11077_v18  ;;  %v2635_v18 = vld [vmem:[%s12493_s9 + $0x20] sm:$0xff]  ;;  %v2944_v50 = vld [vmem:[%s12494_s10 + $0x70] sm:$0xff] }
 0x4df   : > { %v10417_v62 = vpack.c.bf16 %v2636_v61, %v2635_v18  ;;  %v2948_v18 = vld [vmem:[%s12494_s10 + $0x90] sm:$0xff] }
 0x4e0   : > { %v2603_v52 = vsel %vm809_vm1, %v2600_v51, 0.0  ;;  %v2952_v61 = vld [vmem:[%s12494_s10 + $0xb0] sm:$0xff]  ;;  %v10462_v63 = vpack.c.bf16 %v2949_v60, %v2948_v18 }
 0x4e1   : > { %2604 = vadd.xlane.f32.xlu0 %v2603_v52  ;;  %10418 = vmatpush3.bf16.msra.mxu1 %v10417_v62  ;;  %v10450_v52 = vpack.c.bf16 %v2941_v49, %v2940_v48  ;;  %v2953_v62 = vld [vmem:[%s12494_s10 + $0xb8] sm:$0xff] }
 0x4e2   : > { %10419 = vmatprep.subr.bf16.mxu1 %v10853_v3  ;;  %v10468_v0 = vpack.c.bf16 %v2953_v62, %v2952_v61 }
 0x4e5   : > { %10421 = vmatpush3.bf16.msra.mxu1 %v10420_v5  ;;  %v10471_v5 = vpack.c.bf16 %v2955_v2, %v2954_v1 }
 0x4e6   : > { %10428 = vmatprep.subr.bf16.mxu1 %v10853_v3 }
 0x56e   : > { %v2605_v53 = vpop.xlane.xlu0 %2604 }
 0x56f   : > { %v2607_v54 = vmul.f32 0.03125, %v2605_v53 }
 0x571   : > { %v2608_v55 = vsub.f32 %v2600_v51, %v2607_v54  ;;  %v2945_v51 = vld [vmem:[%s12494_s10 + $0x78] sm:$0xff]  ;;  %v2946_v54 = vld [vmem:[%s12494_s10 + $0x80] sm:$0xff] }
 0x572   : > { %v10456_v53 = vpack.c.bf16 %v2945_v51, %v2944_v50 }
 0x573   : > { %v2609_v56 = vmul.f32 %v2608_v55, %v2608_v55 }
 0x575   : > { %v2610_v57 = vsel %vm809_vm1, %v2609_v56, 0.0  ;;  %v2950_v56 = vld [vmem:[%s12494_s10 + $0xa0] sm:$0xff] }
 0x576   : > { %2611 = vadd.xlane.f32.xlu1 %v2610_v57  ;;  %v2951_v57 = vld [vmem:[%s12494_s10 + $0xa8] sm:$0xff] }
 0x577   : > { %v10465_v59 = vpack.c.bf16 %v2951_v57, %v2950_v56 }
 0x603   : > { %v2612_v6 = vpop.xlane.xlu1 %2611 }
 0x604   : > { %v2613_v7 = vmul.f32 0.03125, %v2612_v6  ;;  %v2959_v6 = vld [vmem:[%s12494_s10 + $0xe8] sm:$0xff] }
 0x606   : > { %v2614_v8 = vadd.f32 1e-05, %v2613_v7  ;;  %v10477_v7 = vpack.c.bf16 %v2959_v6, %v2958_v4 }
 0x608   : > { %10726 = vrsqrt.f32 %v2614_v8  ;;  %v2956_v8 = vld [vmem:[%s12494_s10 + $0xd0] sm:$0xff] }
 0x612   : > { %v10727_v9 = vpop.eup %10726 }
 0x613   : > { %v2616_v13 = vmul.f32 %v10727_v9, %v2608_v55  ;;  %v2947_v55 = vld [vmem:[%s12494_s10 + $0x88] sm:$0xff]  ;;  %v2957_v9 = vld [vmem:[%s12494_s10 + $0xd8] sm:$0xff] }
 0x614   : > { %v10459_v58 = vpack.c.bf16 %v2947_v55, %v2946_v54  ;;  %v10474_v12 = vpack.c.bf16 %v2957_v9, %v2956_v8 }
 0x615   : > { %v2623_v19 = vmul.f32 %v8891_v10, %v2616_v13  ;;  %v2960_v10 = vld [vmem:[%s12494_s10 + $0xf0] sm:$0xff]  ;;  %v2961_v13 = vld [vmem:[%s12494_s10 + $0xf8] sm:$0xff] }
 0x616   : > { %v10480_v14 = vpack.c.bf16 %v2961_v13, %v2960_v10 }
 0x617   : > { %v11397_v23 = vadd.f32 %v8892_v17, %v2623_v19 }
 0x619   : > { %9700 = vmatmul.mubr.msk.f32.vlgmr.msra.gmra.mrb[24].mxu0 %vm809_vm1, %v11397_v23  ;;  %9711 = vmatmul.mubr.msk.f32.vlgmr.msra.gmra.mrb[24].mxu1 %vm809_vm1, %v11397_v23 }
 0x61a   : > { %10424 = vmatpush3.bf16.msra.mxu0 %v10423_v20  ;;  %10430 = vmatpush3.bf16.msra.mxu1 %v10429_v21 }
 0x61b   : > { %10425 = vmatprep.subr.bf16.mxu0 %v10853_v3  ;;  %10431 = vmatprep.subr.bf16.mxu1 %v10853_v3 }
 0x61c   : > { %9721 = vmatprep.mubr.msk.f32.mxu0 %vm10854_vm0, %v10855_v11  ;;  %9732 = vmatprep.mubr.msk.f32.mxu1 %vm10854_vm0, %v10855_v11 }
 0x61e   : > { %10427 = vmatpush3.bf16.msra.mxu0 %v10426_v27  ;;  %10433 = vmatpush3.bf16.msra.mxu1 %v10432_v28 }
 0x61f   : > { %10434 = vmatprep.subr.bf16.mxu0 %v10853_v3  ;;  %10440 = vmatprep.subr.bf16.mxu1 %v10853_v3 }
 0x621   : > { %9722 = vmatmul.mubr.msk.f32.vlgmr.msra.gmra.mrb[26].mxu0 %vm809_vm1, %v11397_v23  ;;  %9733 = vmatmul.mubr.msk.f32.vlgmr.msra.gmra.mrb[26].mxu1 %vm809_vm1, %v11397_v23 }
 0x622   : > { %10436 = vmatpush3.bf16.msra.mxu0 %v10435_v33  ;;  %10442 = vmatpush3.bf16.msra.mxu1 %v10441_v34 }
 0x623   : > { %10437 = vmatprep.subr.bf16.mxu0 %v10853_v3  ;;  %10443 = vmatprep.subr.bf16.mxu1 %v10853_v3 }
 0x624   : > { %9743 = vmatprep.mubr.msk.f32.mxu0 %vm10854_vm0, %v10855_v11  ;;  %9754 = vmatprep.mubr.msk.f32.mxu1 %vm10854_vm0, %v10855_v11 }
 0x626   : > { %10439 = vmatpush3.bf16.msra.mxu0 %v10438_v39  ;;  %10445 = vmatpush3.bf16.msra.mxu1 %v10444_v40 }
 0x627   : > { %10446 = vmatprep.subr.bf16.mxu0 %v10853_v3  ;;  %10452 = vmatprep.subr.bf16.mxu1 %v10853_v3 }
 0x629   : > { %9744 = vmatmul.mubr.msk.f32.vlgmr.msra.gmra.mrb[28].mxu0 %vm809_vm1, %v11473_v45  ;;  %9755 = vmatmul.mubr.msk.f32.vlgmr.msra.gmra.mrb[28].mxu1 %vm809_vm1, %v11473_v45 }
 0x62a   : > { %10448 = vmatpush3.bf16.msra.mxu0 %v10447_v46  ;;  %10454 = vmatpush3.bf16.msra.mxu1 %v10453_v47 }
 0x62b   : > { %10449 = vmatprep.subr.bf16.mxu0 %v10853_v3  ;;  %10455 = vmatprep.subr.bf16.mxu1 %v10853_v3 }
 0x62c   : > { %9765 = vmatprep.mubr.msk.f32.mxu0 %vm10854_vm0, %v10855_v11  ;;  %9776 = vmatprep.mubr.msk.f32.mxu1 %vm10854_vm0, %v10855_v11 }
 0x62e   : > { %10451 = vmatpush3.bf16.msra.mxu0 %v10450_v52  ;;  %10457 = vmatpush3.bf16.msra.mxu1 %v10456_v53 }
 0x62f   : > { %10458 = vmatprep.subr.bf16.mxu0 %v10853_v3  ;;  %10464 = vmatprep.subr.bf16.mxu1 %v10853_v3 }
 0x631   : > { %9766 = vmatmul.mubr.msk.f32.vlgmr.msra.gmra.mrb[30].mxu0 %vm809_vm1, %v11473_v45  ;;  %9777 = vmatmul.mubr.msk.f32.vlgmr.msra.gmra.mrb[30].mxu1 %vm809_vm1, %v11473_v45 }
 0x632   : > { %10460 = vmatpush3.bf16.msra.mxu0 %v10459_v58  ;;  %10466 = vmatpush3.bf16.msra.mxu1 %v10465_v59 }
 0x633   : > { %10461 = vmatprep.subr.bf16.mxu0 %v10853_v3  ;;  %10467 = vmatprep.subr.bf16.mxu1 %v10853_v3 }
 0x634   : > { %9787 = vmatprep.mubr.msk.f32.mxu0 %vm10854_vm0, %v10855_v11  ;;  %9798 = vmatprep.mubr.msk.f32.mxu1 %vm10854_vm0, %v10855_v11 }
 0x636   : > { %10463 = vmatpush3.bf16.msra.mxu0 %v10462_v63  ;;  %10469 = vmatpush3.bf16.msra.mxu1 %v10468_v0 }
 0x637   : > { %10470 = vmatprep.subr.bf16.mxu0 %v10853_v3  ;;  %10476 = vmatprep.subr.bf16.mxu1 %v10853_v3 }
 0x639   : > { %9788 = vmatmul.mubr.msk.f32.vlgmr.msra.gmra.mrb[32].mxu0 %vm809_vm1, %v11473_v45  ;;  %9799 = vmatmul.mubr.msk.f32.vlgmr.msra.gmra.mrb[32].mxu1 %vm809_vm1, %v11473_v45 }
 0x63a   : > { %9809 = vmatprep.mubr.msk.f32.mxu0 %vm10854_vm0, %v10855_v11  ;;  %9820 = vmatprep.mubr.msk.f32.mxu1 %vm10854_vm0, %v10855_v11 }
 0x63b   : > { %10472 = vmatpush3.bf16.msra.mxu0 %v10471_v5  ;;  %10478 = vmatpush3.bf16.msra.mxu1 %v10477_v7 }
 0x63c   : > { %10473 = vmatprep.subr.bf16.mxu0 %v10853_v3  ;;  %10479 = vmatprep.subr.bf16.mxu1 %v10853_v3 }
 0x63f   : > { %10475 = vmatpush3.bf16.msra.mxu0 %v10474_v12  ;;  %10481 = vmatpush3.bf16.msra.mxu1 %v10480_v14 }
 0x640   : > { %9823 = vmatprep.subr.mxu0 %v10855_v11  ;;  %9828 = vmatprep.subr.mxu1 %v10855_v11 }
 0x642   : > { %9810 = vmatmul.mubr.msk.f32.vlgmr.msra.gmra.mrb[34].mxu0 %vm809_vm1, %v11473_v45  ;;  %9821 = vmatmul.mubr.msk.f32.vlgmr.msra.gmra.mrb[34].mxu1 %vm809_vm1, %v11473_v45 }
 0x643   : > { %9825 = vmatprep.mubr.msk.f32.mxu0 %vm10854_vm0, %v10855_v11  ;;  %9830 = vmatprep.mubr.msk.f32.mxu1 %vm10854_vm0, %v10855_v11 }
 0x6ec   : > { %v2716_v15 = vpop.f32.mrb[24].mxu0  ;;  %v2786_v16 = vpop.f32.mrb[24].mxu1 }
 0x6ed   : > { %v9701_v17 = vpop.f32.mrb[25].mxu0  ;;  %v9712_v19 = vpop.f32.mrb[25].mxu1 }
 0x6f4   : > { %v2856_v20 = vpop.f32.mrb[26].mxu0  ;;  %v2926_v21 = vpop.f32.mrb[26].mxu1 }
 0x6f5   : > { %v9723_v22 = vpop.f32.mrb[27].mxu0  ;;  %v9734_v24 = vpop.f32.mrb[27].mxu1 }
 0x6fc   : > { %v3031_v25 = vpop.f32.mrb[28].mxu0  ;;  %v3101_v26 = vpop.f32.mrb[28].mxu1 }
 0x6fd   : > { %v9745_v27 = vpop.f32.mrb[29].mxu0  ;;  %9824 = vmatpush3.xpose.msk.msra.mxu0 %vm1658_vm2, %v3031_v25  ;;  %9829 = vmatpush3.xpose.msk.msra.mxu1 %vm1658_vm2, %v3101_v26  ;;  %v9756_v28 = vpop.f32.mrb[29].mxu1 }
 0x6fe   : > { %9833 = vmatprep.subr.mxu0 %v10855_v11  ;;  %9838 = vmatprep.subr.mxu1 %v10855_v11 }
 0x700   : > { %9826 = vmatmul.mubr.msk.f32.vlgmr.msra.gmra.mrb[36].mxu0 %vm1658_vm2, %v2716_v15  ;;  %9831 = vmatmul.mubr.msk.f32.vlgmr.msra.gmra.mrb[36].mxu1 %vm1658_vm2, %v2786_v16 }
 0x701   : > { %9835 = vmatprep.mubr.msk.f32.mxu0 %vm10854_vm0, %v10855_v11  ;;  %9840 = vmatprep.mubr.msk.f32.mxu1 %vm10854_vm0, %v10855_v11 }
 0x704   : > { %v3171_v29 = vpop.f32.mrb[30].mxu0  ;;  %v3241_v30 = vpop.f32.mrb[30].mxu1 }
 0x705   : > { %v9767_v31 = vpop.f32.mrb[31].mxu0  ;;  %9834 = vmatpush3.xpose.msk.msra.mxu0 %vm1658_vm2, %v3171_v29  ;;  %9839 = vmatpush3.xpose.msk.msra.mxu1 %vm1658_vm2, %v3241_v30  ;;  %v9778_v32 = vpop.f32.mrb[31].mxu1  ;;  %v3526_v29 = vld [vmem:[%s12495_s11 + $0x8] sm:$0xff]  ;;  %v3525_v30 = vld [vmem:[%s12495_s11] sm:$0xff] }
 0x706   : > { %9843 = vmatprep.subr.mxu0 %v10855_v11  ;;  %9848 = vmatprep.subr.mxu1 %v10855_v11  ;;  %v3527_v31 = vld [vmem:[%s12495_s11 + $0x10] sm:$0xff] }
 0x708   : > { %9836 = vmatmul.mubr.msk.f32.vlgmr.msra.gmra.mrb[38].mxu0 %vm1658_vm2, %v2856_v20  ;;  %9841 = vmatmul.mubr.msk.f32.vlgmr.msra.gmra.mrb[38].mxu1 %vm1658_vm2, %v2926_v21 }
 0x709   : > { %9845 = vmatprep.mubr.msk.f32.mxu0 %vm10854_vm0, %v10855_v11  ;;  %9850 = vmatprep.mubr.msk.f32.mxu1 %vm10854_vm0, %v10855_v11 }
 0x70c   : > { %v3311_v33 = vpop.f32.mrb[32].mxu0  ;;  %v3381_v34 = vpop.f32.mrb[32].mxu1 }
 0x70d   : > { %v9789_v35 = vpop.f32.mrb[33].mxu0  ;;  %v9800_v36 = vpop.f32.mrb[33].mxu1  ;;  %9844 = vmatpush3.msra.mxu0 %v3311_v33  ;;  %9849 = vmatpush3.msra.mxu1 %v3381_v34  ;;  %v3528_v33 = vld [vmem:[%s12495_s11 + $0x18] sm:$0xff] }
 0x70e   : > { %9853 = vmatprep.subr.mxu0 %v10855_v11  ;;  %9858 = vmatprep.subr.mxu1 %v10855_v11 }
 0x715   : > { %v11603_v37 = vpop.f32.mrb[34].mxu0  ;;  %v11605_v38 = vpop.f32.mrb[34].mxu1 }
 0x716   : > { %v9811_v39 = vpop.f32.mrb[35].mxu0  ;;  %v9822_v40 = vpop.f32.mrb[35].mxu1 }
 0x7d3   : > { %v3602_v42 = vpop.f32.mrb[36].mxu0  ;;  %v3678_v43 = vpop.f32.mrb[36].mxu1 }
 0x7d4   : > { %v3603_v44 = vadd.f32 %v3602_v42, %v760_v41  ;;  %v3679_v45 = vadd.f32 %v3678_v43, %v760_v41  ;;  %v9827_v46 = vpop.f32.mrb[37].mxu0  ;;  %v9832_v47 = vpop.f32.mrb[37].mxu1 }
 0x7d6   : > { %v3837_v48 = vsel %vm1658_vm2, %v3679_v45, -inf  ;;  %v3834_v49 = vsel %vm1658_vm2, %v3603_v44, -inf }
 0x7d7   : > { %3838 = vmax.xlane.f32.xlu1 %v3837_v48  ;;  %3835 = vmax.xlane.f32.xlu0 %v3834_v49 }
 0x7db   : > { %v3754_v50 = vpop.f32.mrb[38].mxu0  ;;  %v3830_v51 = vpop.f32.mrb[38].mxu1 }
 0x7dc   : > { %v3755_v52 = vadd.f32 %v3754_v50, %v760_v41  ;;  %v3831_v53 = vadd.f32 %v3830_v51, %v760_v41  ;;  %v9837_v54 = vpop.f32.mrb[39].mxu0  ;;  %v9842_v55 = vpop.f32.mrb[39].mxu1  ;;  %v8921_v51 = vld [vmem:[%s12496_s12] ss:$0 sm:$0xff] }
 0x7de   : > { %v3843_v56 = vsel %vm1658_vm2, %v3831_v53, -inf  ;;  %v3840_v57 = vsel %vm1658_vm2, %v3755_v52, -inf }
 0x7df   : > { %3844 = vmax.xlane.f32.xlu1 %v3843_v56  ;;  %3841 = vmax.xlane.f32.xlu0 %v3840_v57 }
 0x864   : > { %v3839_v58 = vpop.xlane.xlu1 %3838  ;;  %v3836_v59 = vpop.xlane.xlu0 %3835 }
 0x865   : > { %v3847_v18 = vsub.f32 %v3679_v45, %v3839_v58  ;;  %v3846_v60 = vsub.f32 %v3603_v44, %v3836_v59 }
 0x867   : > { %v3852_v61 = vmul.f32 1.442695, %v3847_v18  ;;  %v3850_v62 = vmul.f32 1.442695, %v3846_v60  ;;  %v4501_v60 = vld [vmem:[%s12499_s15] sm:$0xff] }
 0x869   : > { %10728 = vpow2.f32 %v3852_v61  ;;  %v4502_v61 = vld [vmem:[%s12499_s15 + $0x8] sm:$0xff] }
 0x86a   : > { %10730 = vpow2.f32 %v3850_v62  ;;  %v10483_v62 = vpack.c.bf16 %v4502_v61, %v4501_v60  ;;  %v8935_v60 = vld [vmem:[%s12548_s0 + $0x1a8] sm:$0xff]  ;;  %v8946_v61 = vld [vmem:[%s12548_s0 + $0x200] sm:$0xff] }
 0x86c   : > { %v3845_v63 = vpop.xlane.xlu1 %3844  ;;  %v3842_v0 = vpop.xlane.xlu0 %3841 }
 0x86d   : > { %v3849_v1 = vsub.f32 %v3831_v53, %v3845_v63  ;;  %v3848_v2 = vsub.f32 %v3755_v52, %v3842_v0  ;;  %v4504_v63 = vld [vmem:[%s12499_s15 + $0x18] sm:$0xff] }
 0x86f   : > { %v3856_v4 = vmul.f32 1.442695, %v3849_v1  ;;  %v3854_v5 = vmul.f32 1.442695, %v3848_v2  ;;  %v4586_v1 = vld [vmem:[%s12501_s17] sm:$0xff]  ;;  %v4587_v2 = vld [vmem:[%s12501_s17 + $0x8] sm:$0xff] }
 0x871   : > { %10732 = vpow2.f32 %v3856_v4  ;;  %v4588_v4 = vld [vmem:[%s12501_s17 + $0x10] sm:$0xff] }
 0x872   : > { %10734 = vpow2.f32 %v3854_v5  ;;  %v10489_v5 = vpack.c.bf16 %v4587_v2, %v4586_v1  ;;  %v8936_v2 = vld [vmem:[%s12548_s0 + $0x1b0] sm:$0xff] }
 0x873   : > { %v10729_v6 = vpop.eup %10728 }
 0x874   : > { %v10731_v7 = vpop.eup %10730  ;;  %v3861_v8 = vsel %vm1658_vm2, %v10729_v6, 0.0 }
 0x875   : > { %3862 = vadd.xlane.f32.xlu1 %v3861_v8  ;;  %v3858_v9 = vsel %vm1658_vm2, %v10731_v7, 0.0  ;;  %v4590_v8 = vld [vmem:[%s12501_s17 + $0x20] sm:$0xff] }
 0x876   : > { %3859 = vadd.xlane.f32.xlu0 %v3858_v9  ;;  %v4591_v9 = vld [vmem:[%s12501_s17 + $0x28] sm:$0xff] }
 0x87b   : > { %v10733_v10 = vpop.eup %10732 }
 0x87c   : > { %v10735_v12 = vpop.eup %10734  ;;  %v3867_v13 = vsel %vm1658_vm2, %v10733_v10, 0.0 }
 0x87d   : > { %3868 = vadd.xlane.f32.xlu1 %v3867_v13  ;;  %v3864_v14 = vsel %vm1658_vm2, %v10735_v12, 0.0 }
 0x87e   : > { %3865 = vadd.xlane.f32.xlu0 %v3864_v14 }
 0x902   : > { %v3863_v15 = vpop.xlane.xlu1 %3862 }
 0x903   : > { %10736 = vrcp.f32 %v3863_v15  ;;  %v3860_v16 = vpop.xlane.xlu0 %3859 }
 0x904   : > { %10738 = vrcp.f32 %v3860_v16  ;;  %v8922_v16 = vld [vmem:[%s12497_s13] ss:$0 sm:$0xff] }
 0x90a   : > { %v3869_v17 = vpop.xlane.xlu1 %3868 }
 0x90b   : > { %10740 = vrcp.f32 %v3869_v17  ;;  %v3866_v19 = vpop.xlane.xlu0 %3865 }
 0x90c   : > { %10742 = vrcp.f32 %v3866_v19  ;;  %v8923_v19 = vld [vmem:[%s12498_s14] ss:$0 sm:$0xff] }
 0x90d   : > { %v10737_v20 = vpop.eup %10736 }
 0x90e   : > { %v10739_v21 = vpop.eup %10738  ;;  %v3875_v22 = vmul.f32 %v10737_v20, %v10729_v6  ;;  %v4589_v6 = vld [vmem:[%s12501_s17 + $0x18] sm:$0xff] }
 0x90f   : > { %v3874_v24 = vmul.f32 %v10739_v21, %v10731_v7  ;;  %v10492_v7 = vpack.c.bf16 %v4589_v6, %v4588_v4  ;;  %v8948_v6 = vld [vmem:[%s12548_s0 + $0x210] sm:$0xff] }
 0x910   : > { %9851 = vmatmul.mubr.msk.f32.vlgmr.msra.gmra.mrb[40].mxu1 %vm1658_vm2, %v3875_v22  ;;  %v4592_v22 = vld [vmem:[%s12501_s17 + $0x30] sm:$0xff] }
 0x911   : > { %9846 = vmatmul.mubr.msk.f32.vlgmr.msra.gmra.mrb[40].mxu0 %vm1658_vm2, %v3874_v24  ;;  %9859 = vmatpush3.msra.mxu1 %v11605_v38  ;;  %v4593_v24 = vld [vmem:[%s12501_s17 + $0x38] sm:$0xff] }
 0x912   : > { %9854 = vmatpush3.msra.mxu0 %v11603_v37  ;;  %9855 = vmatprep.mubr.msk.f32.mxu0 %vm10854_vm0, %v10855_v11 }
 0x913   : > { %9860 = vmatprep.mubr.msk.f32.mxu1 %vm10854_vm0, %v10855_v11  ;;  %9863 = vmatprep.subr.mxu0 %v10855_v11 }
 0x914   : > { %9868 = vmatprep.subr.mxu1 %v10855_v11 }
 0x915   : > { %v10741_v25 = vpop.eup %10740 }
 0x916   : > { %v10743_v26 = vpop.eup %10742  ;;  %v3877_v27 = vmul.f32 %v10741_v25, %v10733_v10  ;;  %v10495_v10 = vpack.c.bf16 %v4591_v9, %v4590_v8  ;;  %v10498_v25 = vpack.c.bf16 %v4593_v24, %v4592_v22 }
 0x917   : > { %v3876_v28 = vmul.f32 %v10743_v26, %v10735_v12  ;;  %v8924_v26 = vld [vmem:[%s12500_s16] ss:$0 sm:$0xff] }
 0x918   : > { %9861 = vmatmul.mubr.msk.f32.vlgmr.msra.gmra.mrb[42].mxu1 %vm1658_vm2, %v3877_v27 }
 0x919   : > { %9856 = vmatmul.mubr.msk.f32.vlgmr.msra.gmra.mrb[42].mxu0 %vm1658_vm2, %v3876_v28  ;;  %9870 = vmatprep.mubr.msk.f32.mxu1 %vm10854_vm0, %v10855_v11 }
 0x91a   : > { %9865 = vmatprep.mubr.msk.f32.mxu0 %vm10854_vm0, %v10855_v11  ;;  %9864 = vmatpush3.msra.mxu0 %v3526_v29 }
 0x91b   : > { %9869 = vmatpush3.msra.mxu1 %v3525_v30  ;;  %9873 = vmatprep.subr.mxu0 %v10855_v11 }
 0x91c   : > { %9878 = vmatprep.subr.mxu1 %v10855_v11 }
 0x9e3   : > { %v4020_v32 = vpop.f32.mrb[40].mxu1 }
 0x9e4   : > { %v3947_v34 = vpop.f32.mrb[40].mxu0  ;;  %v9852_v35 = vpop.f32.mrb[41].mxu1  ;;  %9866 = vmatmul.mubr.msk.f32.vlgmr.msra.gmra.mrb[44].mxu0 %vm1658_vm2, %v4020_v32 }
 0x9e5   : > { %v9847_v36 = vpop.f32.mrb[41].mxu0  ;;  %9871 = vmatmul.mubr.msk.f32.vlgmr.msra.gmra.mrb[44].mxu1 %vm1658_vm2, %v3947_v34  ;;  %9874 = vmatpush3.msra.mxu0 %v3527_v31  ;;  %v8926_v31 = vld [vmem:[%s12502_s18] ss:$0 sm:$0xff] }
 0x9e6   : > { %9875 = vmatprep.mubr.msk.f32.mxu0 %vm10854_vm0, %v10855_v11  ;;  %9879 = vmatpush3.msra.mxu1 %v3528_v33 }
 0x9e7   : > { %9880 = vmatprep.mubr.msk.f32.mxu1 %vm10854_vm0, %v10855_v11  ;;  %10482 = vmatprep.subr.bf16.mxu0 %v10853_v3 }
 0x9e8   : > { %10488 = vmatprep.subr.bf16.mxu1 %v10853_v3 }
 0x9eb   : > { %v4166_v37 = vpop.f32.mrb[42].mxu1 }
 0x9ec   : > { %v4093_v38 = vpop.f32.mrb[42].mxu0  ;;  %v9862_v39 = vpop.f32.mrb[43].mxu1  ;;  %9881 = vmatmul.mubr.msk.f32.vlgmr.msra.gmra.mrb[46].mxu1 %vm1658_vm2, %v4166_v37 }
 0x9ed   : > { %v9857_v40 = vpop.f32.mrb[43].mxu0  ;;  %9876 = vmatmul.mubr.msk.f32.vlgmr.msra.gmra.mrb[46].mxu0 %vm1658_vm2, %v4093_v38  ;;  %9910 = vmatprep.mubr.msk.f32.mxu1 %vm10854_vm0, %v10855_v11 }
 0x9ee   : > { %9891 = vmatprep.mubr.msk.f32.mxu0 %vm10854_vm0, %v10855_v11  ;;  %10484 = vmatpush3.bf16.msra.mxu0 %v10483_v62  ;;  %v8947_v62 = vld [vmem:[%s12548_s0 + $0x208] sm:$0xff] }
 0x9ef   : > { %10485 = vmatprep.subr.bf16.mxu0 %v10853_v3  ;;  %10490 = vmatpush3.bf16.msra.mxu1 %v10489_v5  ;;  %v10525_v1 = vpack.c.bf16 %v8947_v62, %v8946_v61  ;;  %v8937_v5 = vld [vmem:[%s12548_s0 + $0x1b8] sm:$0xff] }
 0x9f0   : > { %10491 = vmatprep.subr.bf16.mxu1 %v10853_v3  ;;  %v10510_v8 = vpack.c.bf16 %v8937_v5, %v8936_v2 }
 0x9f3   : > { %10493 = vmatpush3.bf16.msra.mxu1 %v10492_v7  ;;  %v8949_v7 = vld [vmem:[%s12548_s0 + $0x218] sm:$0xff] }
 0x9f4   : > { %10494 = vmatprep.subr.bf16.mxu1 %v10853_v3  ;;  %v10528_v9 = vpack.c.bf16 %v8949_v7, %v8948_v6 }
 0x9f7   : > { %10496 = vmatpush3.bf16.msra.mxu1 %v10495_v10  ;;  %v8942_v10 = vld [vmem:[%s12548_s0 + $0x1e0] sm:$0xff] }
 0x9f8   : > { %10497 = vmatprep.subr.bf16.mxu1 %v10853_v3 }
 0x9fb   : > { %10499 = vmatpush3.bf16.msra.mxu1 %v10498_v25  ;;  %v8950_v25 = vld [vmem:[%s12548_s0 + $0x220] sm:$0xff] }
 0x9fc   : > { %10512 = vmatprep.subr.bf16.mxu1 %v10853_v3 }
 0xab7   : > { %v4239_v41 = vpop.f32.mrb[44].mxu0 }
 0xab8   : > { %v4312_v42 = vpop.f32.mrb[44].mxu1  ;;  %v9867_v43 = vpop.f32.mrb[45].mxu0 }
 0xab9   : > { %v4313_v44 = vadd.f32 %v4312_v42, %v4239_v41  ;;  %v9872_v45 = vpop.f32.mrb[45].mxu1  ;;  %v8930_v42 = vld [vmem:[%s12548_s0 + $0x180] sm:$0xff]  ;;  %v8931_v43 = vld [vmem:[%s12548_s0 + $0x188] sm:$0xff] }
 0xaba   : > { %v10501_v45 = vpack.c.bf16 %v8931_v43, %v8930_v42  ;;  %v8960_v43 = vld [vmem:[%s12548_s0 + $0x270] sm:$0xff] }
 0xabf   : > { %v4459_v46 = vpop.f32.mrb[46].mxu1 }
 0xac0   : > { %v4385_v47 = vpop.f32.mrb[46].mxu0  ;;  %v9882_v48 = vpop.f32.mrb[47].mxu1 }
 0xac1   : > { %v4389_v49 = vadd.f32 %v4385_v47, %v4313_v44  ;;  %v9877_v50 = vpop.f32.mrb[47].mxu0  ;;  %v8938_v44 = vld [vmem:[%s12548_s0 + $0x1c0] sm:$0xff]  ;;  %v8932_v48 = vld [vmem:[%s12548_s0 + $0x190] sm:$0xff] }
 0xac2   : > { %v8940_v50 = vld [vmem:[%s12548_s0 + $0x1d0] sm:$0xff] }
 0xac3   : > { %v4463_v52 = vadd.f32 %v4459_v46, %v4389_v49  ;;  %v8939_v46 = vld [vmem:[%s12548_s0 + $0x1c8] sm:$0xff]  ;;  %v8933_v49 = vld [vmem:[%s12548_s0 + $0x198] sm:$0xff] }
 0xac4   : > { %v10513_v47 = vpack.c.bf16 %v8939_v46, %v8938_v44  ;;  %v8961_v44 = vld [vmem:[%s12548_s0 + $0x278] sm:$0xff] }
 0xac5   : > { %v4470_v53 = vadd.f32 %v8921_v51, %v4463_v52  ;;  %v10504_v51 = vpack.c.bf16 %v8933_v49, %v8932_v48  ;;  %v8941_v52 = vld [vmem:[%s12548_s0 + $0x1d8] sm:$0xff]  ;;  %v8966_v49 = vld [vmem:[%s12548_s0 + $0x2a0] sm:$0xff] }
 0xac6   : > { %v8973_v46 = vld [vmem:[%s12548_s0 + $0x2d8] sm:$0xff] }
 0xac7   : > { %v4471_v54 = vadd.f32 %v4470_v53, %v11397_v23  ;;  %v4503_v23 = vld [vmem:[%s12499_s15 + $0x10] sm:$0xff]  ;;  %v10516_v53 = vpack.c.bf16 %v8941_v52, %v8940_v50  ;;  %v8967_v50 = vld [vmem:[%s12548_s0 + $0x2a8] sm:$0xff] }
 0xac8   : > { %v10486_v0 = vpack.c.bf16 %v4504_v63, %v4503_v23  ;;  %v8929_v23 = vld [vmem:[%s12504_s20] ss:$0 sm:$0xff]  ;;  %v8968_v52 = vld [vmem:[%s12548_s0 + $0x2b0] sm:$0xff] }
 0xac9   : > { %v4474_v55 = vsel %vm809_vm1, %v4471_v54, 0.0 }
 0xaca   : > { %4475 = vadd.xlane.f32.xlu0 %v4474_v55  ;;  %10487 = vmatpush3.bf16.msra.mxu0 %v10486_v0 }
 0xacb   : > { %10500 = vmatprep.subr.bf16.mxu0 %v10853_v3 }
 0xb57   : > { %v4476_v56 = vpop.xlane.xlu0 %4475 }
 0xb58   : > { %v4477_v57 = vmul.f32 0.03125, %v4476_v56 }
 0xb5a   : > { %v4478_v58 = vsub.f32 %v4471_v54, %v4477_v57 }
 0xb5c   : > { %v4479_v59 = vmul.f32 %v4478_v58, %v4478_v58 }
 0xb5e   : > { %v4480_v18 = vsel %vm809_vm1, %v4479_v59, 0.0  ;;  %v8934_v59 = vld [vmem:[%s12548_s0 + $0x1a0] sm:$0xff] }
 0xb5f   : > { %4481 = vadd.xlane.f32.xlu1 %v4480_v18  ;;  %v10507_v0 = vpack.c.bf16 %v8935_v60, %v8934_v59  ;;  %v8977_v59 = vld [vmem:[%s12548_s0 + $0x2f8] sm:$0xff] }
 0xbec   : > { %v4482_v12 = vpop.xlane.xlu1 %4481 }
 0xbed   : > { %v4483_v13 = vmul.f32 0.03125, %v4482_v12  ;;  %v8943_v12 = vld [vmem:[%s12548_s0 + $0x1e8] sm:$0xff] }
 0xbef   : > { %v4484_v14 = vadd.f32 1e-05, %v4483_v13  ;;  %v8954_v13 = vld [vmem:[%s12548_s0 + $0x240] sm:$0xff] }
 0xbf1   : > { %10744 = vrsqrt.f32 %v4484_v14  ;;  %v8955_v14 = vld [vmem:[%s12548_s0 + $0x248] sm:$0xff] }
 0xbfb   : > { %v10745_v15 = vpop.eup %10744 }
 0xbfc   : > { %v4486_v17 = vmul.f32 %v10745_v15, %v4478_v58  ;;  %v8928_v58 = vld [vmem:[%s12503_s19] ss:$0 sm:$0xff]  ;;  %v10519_v15 = vpack.c.bf16 %v8943_v12, %v8942_v10 }
 0xbfe   : > { %v4493_v20 = vmul.f32 %v8922_v16, %v4486_v17  ;;  %v10537_v16 = vpack.c.bf16 %v8955_v14, %v8954_v13  ;;  %v8944_v17 = vld [vmem:[%s12548_s0 + $0x1f0] sm:$0xff] }
 0xc00   : > { %v4500_v21 = vadd.f32 %v8923_v19, %v4493_v20  ;;  %v8945_v19 = vld [vmem:[%s12548_s0 + $0x1f8] sm:$0xff]  ;;  %v8956_v20 = vld [vmem:[%s12548_s0 + $0x250] sm:$0xff] }
 0xc01   : > { %v10522_v22 = vpack.c.bf16 %v8945_v19, %v8944_v17 }
 0xc02   : > { %9892 = vmatmul.mubr.msk.f32.vlgmr.msra.gmra.mrb[48].mxu0 %vm809_vm1, %v4500_v21 }
 0xc03   : > { %9921 = vmatprep.mubr.msk.f32.mxu0 %vm10854_vm0, %v10855_v11  ;;  %10502 = vmatpush3.bf16.msra.mxu0 %v10501_v45  ;;  %v8972_v45 = vld [vmem:[%s12548_s0 + $0x2d0] sm:$0xff] }
 0xc04   : > { %10503 = vmatprep.subr.bf16.mxu0 %v10853_v3  ;;  %v10564_v48 = vpack.c.bf16 %v8973_v46, %v8972_v45 }
 0xc07   : > { %10505 = vmatpush3.bf16.msra.mxu0 %v10504_v51  ;;  %v10555_v51 = vpack.c.bf16 %v8967_v50, %v8966_v49 }
 0xc08   : > { %10506 = vmatprep.subr.bf16.mxu0 %v10853_v3 }
 0xcd5   : > { %v4581_v27 = vpop.f32.mrb[48].mxu0 }
 0xcd6   : > { %v4582_v28 = vadd.f32 %v8924_v26, %v4581_v27  ;;  %v9893_v29 = vpop.f32.mrb[49].mxu0  ;;  %v8951_v26 = vld [vmem:[%s12548_s0 + $0x228] sm:$0xff]  ;;  %v8962_v27 = vld [vmem:[%s12548_s0 + $0x280] sm:$0xff] }
 0xcd7   : > { %v10531_v29 = vpack.c.bf16 %v8951_v26, %v8950_v25  ;;  %v10786_v25 = vld [vmem:[%s11287_s26] sm:$0xff]  ;;  %s12558_s26 = sld [smem:[#allocation22_spill]] }
 0xcd8   : > { %v4585_v30 = vmax.f32 %v4582_v28, 0.0  ;;  %v8963_v28 = vld [vmem:[%s12548_s0 + $0x288] sm:$0xff] }
 0xcda   : > { %9911 = vmatmul.mubr.msk.f32.vlgmr.msra.gmra.mrb[48].mxu1 %vm4601_vm3, %v4585_v30  ;;  %v10549_v30 = vpack.c.bf16 %v8963_v28, %v8962_v27 }
 0xcdb   : > { %9943 = vmatprep.mubr.msk.f32.mxu1 %vm10854_vm0, %v10855_v11  ;;  %10514 = vmatpush3.bf16.msra.mxu1 %v10513_v47  ;;  %v10546_v47 = vpack.c.bf16 %v8961_v44, %v8960_v43 }
 0xcdc   : > { %10515 = vmatprep.subr.bf16.mxu1 %v10853_v3 }
 0xcdf   : > { %10517 = vmatpush3.bf16.msra.mxu1 %v10516_v53  ;;  %v8969_v53 = vld [vmem:[%s12548_s0 + $0x2b8] sm:$0xff] }
 0xce0   : > { %10524 = vmatprep.subr.bf16.mxu1 %v10853_v3 }
 0xdad   : > { %v4671_v32 = vpop.f32.mrb[48].mxu1 }
 0xdae   : > { %v4672_v33 = vadd.f32 %v8926_v31, %v4671_v32  ;;  %v9912_v34 = vpop.f32.mrb[49].mxu1  ;;  %v8952_v31 = vld [vmem:[%s12548_s0 + $0x230] sm:$0xff]  ;;  %v8953_v32 = vld [vmem:[%s12548_s0 + $0x238] sm:$0xff] }
 0xdaf   : > { %v8965_v34 = vld [vmem:[%s12548_s0 + $0x298] sm:$0xff] }
 0xdb0   : > { %v4675_v35 = vadd.f32 %v4672_v33, %v4500_v21  ;;  %v8957_v21 = vld [vmem:[%s12548_s0 + $0x258] sm:$0xff]  ;;  %v8964_v33 = vld [vmem:[%s12548_s0 + $0x290] sm:$0xff] }
 0xdb1   : > { %v10540_v24 = vpack.c.bf16 %v8957_v21, %v8956_v20 }
 0xdb2   : > { %v4678_v36 = vsel %vm809_vm1, %v4675_v35, 0.0 }
 0xdb3   : > { %4679 = vadd.xlane.f32.xlu0 %v4678_v36  ;;  %v10552_v36 = vpack.c.bf16 %v8965_v34, %v8964_v33 }
 0xe40   : > { %v4680_v37 = vpop.xlane.xlu0 %4679 }
 0xe41   : > { %v4681_v38 = vmul.f32 0.03125, %v4680_v37  ;;  %v8958_v37 = vld [vmem:[%s12548_s0 + $0x260] sm:$0xff] }
 0xe43   : > { %v4682_v39 = vsub.f32 %v4675_v35, %v4681_v38  ;;  %v10534_v35 = vpack.c.bf16 %v8953_v32, %v8952_v31  ;;  %v8959_v38 = vld [vmem:[%s12548_s0 + $0x268] sm:$0xff] }
 0xe45   : > { %v4683_v40 = vmul.f32 %v4682_v39, %v4682_v39 }
 0xe47   : > { %v4684_v41 = vsel %vm809_vm1, %v4683_v40, 0.0  ;;  %v8971_v40 = vld [vmem:[%s12548_s0 + $0x2c8] sm:$0xff] }
 0xe48   : > { %4685 = vadd.xlane.f32.xlu1 %v4684_v41  ;;  %v10543_v41 = vpack.c.bf16 %v8959_v38, %v8958_v37 }
 0xed5   : > { %v4686_v54 = vpop.xlane.xlu1 %4685 }
 0xed6   : > { %v4687_v55 = vmul.f32 0.03125, %v4686_v54  ;;  %v10558_v54 = vpack.c.bf16 %v8969_v53, %v8968_v52 }
 0xed8   : > { %v4688_v56 = vadd.f32 1e-05, %v4687_v55  ;;  %v8974_v55 = vld [vmem:[%s12548_s0 + $0x2e0] sm:$0xff] }
 0xeda   : > { %10746 = vrsqrt.f32 %v4688_v56  ;;  %v8975_v56 = vld [vmem:[%s12548_s0 + $0x2e8] sm:$0xff] }
 0xee4   : > { %v10747_v57 = vpop.eup %10746 }
 0xee5   : > { %v4690_v18 = vmul.f32 %v10747_v57, %v4682_v39  ;;  %v8970_v39 = vld [vmem:[%s12548_s0 + $0x2c0] sm:$0xff]  ;;  %v10567_v57 = vpack.c.bf16 %v8975_v56, %v8974_v55 }
 0xee6   : > { %v10561_v42 = vpack.c.bf16 %v8971_v40, %v8970_v39 }
 0xee7   : > { %v4697_v63 = vmul.f32 %v8928_v58, %v4690_v18  ;;  %v8976_v58 = vld [vmem:[%s12548_s0 + $0x2f0] sm:$0xff]  ;;  %s740_s0 = scalar_lea.vmem [#allocation2], %s8857_s21 }
 0xee8   : > { %v10570_v18 = vpack.c.bf16 %v8977_v59, %v8976_v58  ;;  %s8758_s24 = sshll.u32 %s740_s0, 4  ;;  %s12444_s24 = int_to_ptr.vmem [resolvable:$true] %s8758_s24 }
 0xee9   : > { %v11783_v4 = vadd.f32 %v8929_v23, %v4697_v63  ;;  %s10789_s6 = scalar_lea.vmem %s12444_s24, 128 }
 0xeea   : > { %p10790_p11 = scmp.ne.s32.totalorder %s12444_s24, %s10789_s6 }
 0xeeb   : > { %9922 = vmatmul.mubr.msk.f32.vlgmr.msra.gmra.mrb[50].mxu0 %vm809_vm1, %v11783_v4  ;;  %9944 = vmatmul.mubr.msk.f32.vlgmr.msra.gmra.mrb[50].mxu1 %vm809_vm1, %v11783_v4 }
 0xeec   : > { %10508 = vmatpush3.bf16.msra.mxu0 %v10507_v0  ;;  %10526 = vmatpush3.bf16.msra.mxu1 %v10525_v1  ;;  %p10791_p12 = pnand %p10790_p11, %p11015_p5 }
 0xeed   : > { %10509 = vmatprep.subr.bf16.mxu0 %v10853_v3  ;;  %10527 = vmatprep.subr.bf16.mxu1 %v10853_v3 }
 0xeee   : > { %9932 = vmatprep.mubr.msk.f32.mxu0 %vm10854_vm0, %v10855_v11  ;;  %9965 = vmatprep.mubr.msk.f32.mxu1 %vm10854_vm0, %v10855_v11  ;;  %p10792_p13 = pneg %p10791_p12 }
 0xef0   : > { %10511 = vmatpush3.bf16.msra.mxu0 %v10510_v8  ;;  %10529 = vmatpush3.bf16.msra.mxu1 %v10528_v9 }
 0xef1   : > { %10518 = vmatprep.subr.bf16.mxu0 %v10853_v3  ;;  %10536 = vmatprep.subr.bf16.mxu1 %v10853_v3 }
 0xef3   : > { %9933 = vmatmul.mubr.msk.f32.vlgmr.msra.gmra.mrb[52].mxu0 %vm809_vm1, %v11783_v4  ;;  %9966 = vmatmul.mubr.msk.f32.vlgmr.msra.gmra.mrb[52].mxu1 %vm809_vm1, %v11783_v4 }
 0xef4   : > { %10520 = vmatpush3.bf16.msra.mxu0 %v10519_v15  ;;  %10538 = vmatpush3.bf16.msra.mxu1 %v10537_v16 }
 0xef5   : > { %10521 = vmatprep.subr.bf16.mxu0 %v10853_v3  ;;  %10539 = vmatprep.subr.bf16.mxu1 %v10853_v3 }
 0xef6   : > { %9954 = vmatprep.mubr.msk.f32.mxu0 %vm10854_vm0, %v10855_v11  ;;  %9987 = vmatprep.mubr.msk.f32.mxu1 %vm10854_vm0, %v10855_v11 }
 0xef8   : > { %10523 = vmatpush3.bf16.msra.mxu0 %v10522_v22  ;;  %10541 = vmatpush3.bf16.msra.mxu1 %v10540_v24 }
 0xef9   : > { %10530 = vmatprep.subr.bf16.mxu0 %v10853_v3  ;;  %10548 = vmatprep.subr.bf16.mxu1 %v10853_v3 }
 0xefb   : > { %9955 = vmatmul.mubr.msk.f32.vlgmr.msra.gmra.mrb[54].mxu0 %vm809_vm1, %v11783_v4  ;;  %9988 = vmatmul.mubr.msk.f32.vlgmr.msra.gmra.mrb[54].mxu1 %vm809_vm1, %v11783_v4 }
 0xefc   : > { %10532 = vmatpush3.bf16.msra.mxu0 %v10531_v29  ;;  %10550 = vmatpush3.bf16.msra.mxu1 %v10549_v30 }
 0xefd   : > { %10533 = vmatprep.subr.bf16.mxu0 %v10853_v3  ;;  %10551 = vmatprep.subr.bf16.mxu1 %v10853_v3 }
 0xefe   : > { %9976 = vmatprep.mubr.msk.f32.mxu0 %vm10854_vm0, %v10855_v11  ;;  %10009 = vmatprep.mubr.msk.f32.mxu1 %vm10854_vm0, %v10855_v11 }
 0xf00   : > { %10535 = vmatpush3.bf16.msra.mxu0 %v10534_v35  ;;  %10553 = vmatpush3.bf16.msra.mxu1 %v10552_v36 }
 0xf01   : > { %10542 = vmatprep.subr.bf16.mxu0 %v10853_v3  ;;  %10560 = vmatprep.subr.bf16.mxu1 %v10853_v3 }
 0xf03   : > { %9977 = vmatmul.mubr.msk.f32.vlgmr.msra.gmra.mrb[56].mxu0 %vm809_vm1, %v11783_v4  ;;  %10010 = vmatmul.mubr.msk.f32.vlgmr.msra.gmra.mrb[56].mxu1 %vm809_vm1, %v11783_v4 }
 0xf04   : > { %10544 = vmatpush3.bf16.msra.mxu0 %v10543_v41  ;;  %10562 = vmatpush3.bf16.msra.mxu1 %v10561_v42 }
 0xf05   : > { %10545 = vmatprep.subr.bf16.mxu0 %v10853_v3  ;;  %10563 = vmatprep.subr.bf16.mxu1 %v10853_v3 }
 0xf06   : > { %9998 = vmatprep.mubr.msk.f32.mxu0 %vm10854_vm0, %v10855_v11  ;;  %10031 = vmatprep.mubr.msk.f32.mxu1 %vm10854_vm0, %v10855_v11 }
 0xf08   : > { %10547 = vmatpush3.bf16.msra.mxu0 %v10546_v47  ;;  %10565 = vmatpush3.bf16.msra.mxu1 %v10564_v48 }
 0xf09   : > { %10554 = vmatprep.subr.bf16.mxu0 %v10853_v3  ;;  %10045 = vmatprep.subr.mxu1 %v10855_v11 }
 0xf0b   : > { %9999 = vmatmul.mubr.msk.f32.vlgmr.msra.gmra.mrb[58].mxu0 %vm809_vm1, %v11783_v4  ;;  %10032 = vmatmul.mubr.msk.f32.vlgmr.msra.gmra.mrb[58].mxu1 %vm809_vm1, %v11783_v4 }
 0xf0c   : > { %10556 = vmatpush3.bf16.msra.mxu0 %v10555_v51  ;;  %10020 = vmatprep.mubr.msk.f32.mxu0 %vm10854_vm0, %v10855_v11 }
 0xf0d   : > { %10557 = vmatprep.subr.bf16.mxu0 %v10853_v3  ;;  %10047 = vmatprep.mubr.msk.f32.mxu1 %vm10854_vm0, %v10855_v11 }
 0xf10   : > { %10559 = vmatpush3.bf16.msra.mxu0 %v10558_v54 }
 0xf11   : > { %10566 = vmatprep.subr.bf16.mxu0 %v10853_v3 }
 0xf13   : > { %10021 = vmatmul.mubr.msk.f32.vlgmr.msra.gmra.mrb[60].mxu0 %vm809_vm1, %v11783_v4 }
 0xf14   : > { %10568 = vmatpush3.bf16.msra.mxu0 %v10567_v57  ;;  %10042 = vmatprep.mubr.msk.f32.mxu0 %vm10854_vm0, %v10855_v11 }
 0xf15   : > { %10569 = vmatprep.subr.bf16.mxu0 %v10853_v3 }
 0xf18   : > { %10571 = vmatpush3.bf16.msra.mxu0 %v10570_v18 }
 0xf19   : > { %10055 = vmatprep.subr.mxu0 %v10855_v11 }
 0xf1b   : > { %10043 = vmatmul.mubr.msk.f32.vlgmr.msra.gmra.mrb[62].mxu0 %vm809_vm1, %v11783_v4 }
 0xf1c   : > { %10057 = vmatprep.mubr.msk.f32.mxu0 %vm10854_vm0, %v10855_v11 }
 0xfbe   : > { %v4823_v60 = vpop.f32.mrb[50].mxu0  ;;  %v4963_v61 = vpop.f32.mrb[50].mxu1 }
 0xfbf   : > { %v9923_v62 = vpop.f32.mrb[51].mxu0  ;;  %v9945_v23 = vpop.f32.mrb[51].mxu1 }
 0xfc6   : > { %v4893_v63 = vpop.f32.mrb[52].mxu0  ;;  %v5103_v0 = vpop.f32.mrb[52].mxu1 }
 0xfc7   : > { %v9934_v1 = vpop.f32.mrb[53].mxu0  ;;  %v9967_v2 = vpop.f32.mrb[53].mxu1  ;;  %10046 = vmatpush3.xpose.msk.msra.mxu1 %vm1658_vm2, %v5103_v0 }
 0xfc8   : > { %10050 = vmatprep.subr.mxu1 %v10855_v11 }
 0xfca   : > { %10048 = vmatmul.mubr.msk.f32.vlgmr.msra.gmra.mrb[60].mxu1 %vm1658_vm2, %v4823_v60 }
 0xfcb   : > { %10052 = vmatprep.mubr.msk.f32.mxu1 %vm10854_vm0, %v10855_v11 }
 0xfce   : > { %v5033_v5 = vpop.f32.mrb[54].mxu0  ;;  %v5243_v6 = vpop.f32.mrb[54].mxu1 }
 0xfcf   : > { %v9956_v7 = vpop.f32.mrb[55].mxu0  ;;  %v9989_v8 = vpop.f32.mrb[55].mxu1  ;;  %10056 = vmatpush3.xpose.msk.msra.mxu0 %vm1658_vm2, %v5243_v6 }
 0xfd0   : > { %10065 = vmatprep.subr.mxu0 %v10855_v11 }
 0xfd2   : > { %10058 = vmatmul.mubr.msk.f32.vlgmr.msra.gmra.mrb[64].mxu0 %vm1658_vm2, %v4963_v61 }
 0xfd3   : > { %10067 = vmatprep.mubr.msk.f32.mxu0 %vm10854_vm0, %v10855_v11 }
 0xfd6   : > { %v5173_v9 = vpop.f32.mrb[56].mxu0  ;;  %v5383_v10 = vpop.f32.mrb[56].mxu1 }
 0xfd7   : > { %v9978_v12 = vpop.f32.mrb[57].mxu0  ;;  %v10011_v13 = vpop.f32.mrb[57].mxu1  ;;  %10051 = vmatpush3.xpose.msk.msra.mxu1 %vm1658_vm2, %v5173_v9  ;;  %10066 = vmatpush3.msra.mxu0 %v5383_v10  ;;  %v8990_v9 = vld [vmem:[%s12552_s28 + $0x20] sm:$0xff]  ;;  %v8991_v10 = vld [vmem:[%s12552_s28 + $0x28] sm:$0xff] }
 0xfd8   : > { %10060 = vmatprep.subr.mxu1 %v10855_v11  ;;  %10075 = vmatprep.subr.mxu0 %v10855_v11  ;;  %v8993_v12 = vld [vmem:[%s12552_s28 + $0x38] sm:$0xff] }
 0xfda   : > { %10053 = vmatmul.mubr.msk.f32.vlgmr.msra.gmra.mrb[62].mxu1 %vm1658_vm2, %v4893_v63 }
 0xfdb   : > { %10062 = vmatprep.mubr.msk.f32.mxu1 %vm10854_vm0, %v10855_v11 }
 0xfde   : > { %v5313_v14 = vpop.f32.mrb[58].mxu0  ;;  %v11974_v15 = vpop.f32.mrb[58].mxu1 }
 0xfdf   : > { %v10000_v16 = vpop.f32.mrb[59].mxu0  ;;  %v10033_v17 = vpop.f32.mrb[59].mxu1  ;;  %10061 = vmatpush3.xpose.msk.msra.mxu1 %vm1658_vm2, %v5313_v14 }
 0xfe0   : > { %10070 = vmatprep.subr.mxu1 %v10855_v11  ;;  %v8992_v17 = vld [vmem:[%s12552_s28 + $0x30] sm:$0xff] }
 0xfe2   : > { %10063 = vmatmul.mubr.msk.f32.vlgmr.msra.gmra.mrb[64].mxu1 %vm1658_vm2, %v5033_v5 }
 0xfe3   : > { %10072 = vmatprep.mubr.msk.f32.mxu1 %vm10854_vm0, %v10855_v11 }
 0xfe6   : > { %v5453_v19 = vpop.f32.mrb[60].mxu0 }
 0xfe7   : > { %v10022_v20 = vpop.f32.mrb[61].mxu0  ;;  %10071 = vmatpush3.msra.mxu1 %v5453_v19 }
 0xfe8   : > { %10080 = vmatprep.subr.mxu1 %v10855_v11 }
 0xfee   : > { %v11982_v21 = vpop.f32.mrb[62].mxu0 }
 0xfef   : > { %v10044_v22 = vpop.f32.mrb[63].mxu0 }
0x109d   : > { %v5676_v24 = vpop.f32.mrb[60].mxu1 }
0x109e   : > { %v5677_v26 = vadd.f32 %v10786_v25, %v5676_v24  ;;  %v10049_v27 = vpop.f32.mrb[61].mxu1 }
0x10a0   : > { %v5908_v28 = vsel %vm1658_vm2, %v5677_v26, -inf }
0x10a1   : > { %5909 = vmax.xlane.f32.xlu0 %v5908_v28 }
0x10a5   : > { %v5828_v29 = vpop.f32.mrb[64].mxu0 }
0x10a6   : > { %v5829_v30 = vadd.f32 %v10786_v25, %v5828_v29  ;;  %v10059_v31 = vpop.f32.mrb[65].mxu0 }
0x10a8   : > { %v5914_v32 = vsel %vm1658_vm2, %v5829_v30, -inf }
0x10a9   : > { %5915 = vmax.xlane.f32.xlu0 %v5914_v32  ;;  %v9011_v32 = vld [vmem:[%s12554_s1 + $0x1] ss:$0 sm:$0xff] }
0x10ad   : > { %v5752_v33 = vpop.f32.mrb[62].mxu1 }
0x10ae   : > { %v5753_v34 = vadd.f32 %v10786_v25, %v5752_v33  ;;  %v10054_v35 = vpop.f32.mrb[63].mxu1 }
0x10b0   : > { %v5911_v36 = vsel %vm1658_vm2, %v5753_v34, -inf }
0x10b1   : > { %5912 = vmax.xlane.f32.xlu1 %v5911_v36 }
0x10b5   : > { %v5904_v37 = vpop.f32.mrb[64].mxu1 }
0x10b6   : > { %v5905_v38 = vadd.f32 %v10786_v25, %v5904_v37  ;;  %v10064_v39 = vpop.f32.mrb[65].mxu1 }
0x10b8   : > { %v5917_v40 = vsel %vm1658_vm2, %v5905_v38, -inf }
0x10b9   : > { %5918 = vmax.xlane.f32.xlu1 %v5917_v40 }
0x112e   : > { %v5910_v41 = vpop.xlane.xlu0 %5909 }
0x112f   : > { %v5920_v42 = vsub.f32 %v5677_v26, %v5910_v41 }
0x1131   : > { %v5924_v43 = vmul.f32 1.442695, %v5920_v42 }
0x1133   : > { %10748 = vpow2.f32 %v5924_v43 }
0x1136   : > { %v5916_v44 = vpop.xlane.xlu0 %5915 }
0x1137   : > { %v5922_v45 = vsub.f32 %v5829_v30, %v5916_v44  ;;  %v9016_v44 = vld [vmem:[%s12493_s9 + $0x80] sm:$0xff] }
0x1139   : > { %v5928_v46 = vmul.f32 1.442695, %v5922_v45  ;;  %v9017_v45 = vld [vmem:[%s12493_s9 + $0x88] sm:$0xff] }
0x113b   : > { %10750 = vpow2.f32 %v5928_v46  ;;  %v10573_v46 = vpack.c.bf16 %v9017_v45, %v9016_v44 }
0x113d   : > { %v10749_v47 = vpop.eup %10748 }
0x113e   : > { %v5913_v48 = vpop.xlane.xlu1 %5912  ;;  %v5932_v49 = vsel %vm1658_vm2, %v10749_v47, 0.0 }
0x113f   : > { %v5921_v50 = vsub.f32 %v5753_v34, %v5913_v48  ;;  %5933 = vadd.xlane.f32.xlu0 %v5932_v49  ;;  %v9018_v49 = vld [vmem:[%s12493_s9 + $0x90] sm:$0xff] }
0x1141   : > { %v5926_v51 = vmul.f32 1.442695, %v5921_v50  ;;  %v9019_v50 = vld [vmem:[%s12493_s9 + $0x98] sm:$0xff] }
0x1143   : > { %10752 = vpow2.f32 %v5926_v51  ;;  %v9022_v51 = vld [vmem:[%s12493_s9 + $0xb0] sm:$0xff] }
0x1145   : > { %v10751_v52 = vpop.eup %10750 }
0x1146   : > { %v5919_v53 = vpop.xlane.xlu1 %5918  ;;  %v5938_v54 = vsel %vm1658_vm2, %v10751_v52, 0.0 }
0x1147   : > { %v5923_v55 = vsub.f32 %v5905_v38, %v5919_v53  ;;  %5939 = vadd.xlane.f32.xlu0 %v5938_v54  ;;  %v9023_v53 = vld [vmem:[%s12493_s9 + $0xb8] sm:$0xff] }
0x1148   : > { %v10582_v54 = vpack.c.bf16 %v9023_v53, %v9022_v51  ;;  %v9060_v51 = vld [vmem:[%s12494_s10 + $0x1c0] sm:$0xff] }
0x1149   : > { %v5930_v56 = vmul.f32 1.442695, %v5923_v55  ;;  %v9064_v53 = vld [vmem:[%s12494_s10 + $0x1e0] sm:$0xff] }
0x114b   : > { %10754 = vpow2.f32 %v5930_v56 }
0x114d   : > { %v10753_v57 = vpop.eup %10752 }
0x114e   : > { %v5935_v58 = vsel %vm1658_vm2, %v10753_v57, 0.0 }
0x114f   : > { %5936 = vadd.xlane.f32.xlu1 %v5935_v58 }
0x1155   : > { %v10755_v59 = vpop.eup %10754 }
0x1156   : > { %v5941_v18 = vsel %vm1658_vm2, %v10755_v59, 0.0 }
0x1157   : > { %5942 = vadd.xlane.f32.xlu1 %v5941_v18  ;;  %v9024_v18 = vld [vmem:[%s12493_s9 + $0xc0] sm:$0xff] }
0x11cc   : > { %v5934_v60 = vpop.xlane.xlu0 %5933 }
0x11cd   : > { %10756 = vrcp.f32 %v5934_v60 }
0x11d4   : > { %v5940_v61 = vpop.xlane.xlu0 %5939 }
0x11d5   : > { %10758 = vrcp.f32 %v5940_v61  ;;  %v9025_v61 = vld [vmem:[%s12493_s9 + $0xc8] sm:$0xff] }
0x11d7   : > { %v10757_v62 = vpop.eup %10756 }
0x11d8   : > { %v5948_v23 = vmul.f32 %v10757_v62, %v10749_v47  ;;  %v9021_v47 = vld [vmem:[%s12493_s9 + $0xa8] sm:$0xff]  ;;  %v9028_v62 = vld [vmem:[%s12493_s9 + $0xe0] sm:$0xff] }
0x11da   : > { %10068 = vmatmul.mubr.msk.f32.vlgmr.msra.gmra.mrb[66].mxu0 %vm1658_vm2, %v5948_v23  ;;  %v9029_v23 = vld [vmem:[%s12493_s9 + $0xe8] sm:$0xff] }
0x11db   : > { %10076 = vmatpush3.msra.mxu0 %v11974_v15  ;;  %10077 = vmatprep.mubr.msk.f32.mxu0 %vm10854_vm0, %v10855_v11 }
0x11dc   : > { %v5937_v63 = vpop.xlane.xlu1 %5936  ;;  %10085 = vmatprep.subr.mxu0 %v10855_v11 }
0x11dd   : > { %10760 = vrcp.f32 %v5937_v63  ;;  %v9015_v63 = vld [vmem:[%s12492_s8 + $0x1] ss:$0 sm:$0xff] }
0x11df   : > { %v10759_v0 = vpop.eup %10758 }
0x11e0   : > { %v5950_v1 = vmul.f32 %v10759_v0, %v10751_v52  ;;  %v10576_v52 = vpack.c.bf16 %v9019_v50, %v9018_v49 }
0x11e2   : > { %10078 = vmatmul.mubr.msk.f32.vlgmr.msra.gmra.mrb[68].mxu0 %vm1658_vm2, %v5950_v1  ;;  %v10585_v1 = vpack.c.bf16 %v9025_v61, %v9024_v18 }
0x11e3   : > { %10087 = vmatprep.mubr.msk.f32.mxu0 %vm10854_vm0, %v10855_v11  ;;  %10086 = vmatpush3.msra.mxu0 %v8991_v10 }
0x11e4   : > { %v5943_v2 = vpop.xlane.xlu1 %5942  ;;  %10095 = vmatprep.subr.mxu0 %v10855_v11 }
0x11e5   : > { %10762 = vrcp.f32 %v5943_v2  ;;  %v10591_v2 = vpack.c.bf16 %v9029_v23, %v9028_v62 }
0x11e7   : > { %v10761_v5 = vpop.eup %10760 }
0x11e8   : > { %v5949_v6 = vmul.f32 %v10761_v5, %v10753_v57  ;;  %v9026_v5 = vld [vmem:[%s12493_s9 + $0xd0] sm:$0xff] }
0x11ea   : > { %10073 = vmatmul.mubr.msk.f32.vlgmr.msra.gmra.mrb[66].mxu1 %vm1658_vm2, %v5949_v6 }
0x11eb   : > { %10081 = vmatpush3.msra.mxu1 %v11982_v21  ;;  %10082 = vmatprep.mubr.msk.f32.mxu1 %vm10854_vm0, %v10855_v11 }
0x11ec   : > { %10090 = vmatprep.subr.mxu1 %v10855_v11 }
0x11ef   : > { %v10763_v7 = vpop.eup %10762 }
0x11f0   : > { %v5951_v8 = vmul.f32 %v10763_v7, %v10755_v59  ;;  %v9014_v59 = vld [vmem:[%s12555_s23 + $0x1] ss:$0 sm:$0xff]  ;;  %v9027_v7 = vld [vmem:[%s12493_s9 + $0xd8] sm:$0xff] }
0x11f1   : > { %v10588_v10 = vpack.c.bf16 %v9027_v7, %v9026_v5 }
0x11f2   : > { %10083 = vmatmul.mubr.msk.f32.vlgmr.msra.gmra.mrb[68].mxu1 %vm1658_vm2, %v5951_v8  ;;  %v9030_v8 = vld [vmem:[%s12493_s9 + $0xf0] sm:$0xff] }
0x11f3   : > { %10092 = vmatprep.mubr.msk.f32.mxu1 %vm10854_vm0, %v10855_v11  ;;  %10091 = vmatpush3.msra.mxu1 %v8990_v9  ;;  %v9031_v9 = vld [vmem:[%s12493_s9 + $0xf8] sm:$0xff] }
0x11f4   : > { %10100 = vmatprep.subr.mxu1 %v10855_v11 }
0x12ad   : > { %v6021_v13 = vpop.f32.mrb[66].mxu0 }
0x12ae   : > { %v10069_v14 = vpop.f32.mrb[67].mxu0  ;;  %10093 = vmatmul.mubr.msk.f32.vlgmr.msra.gmra.mrb[70].mxu1 %vm1658_vm2, %v6021_v13  ;;  %v9036_v13 = vld [vmem:[%s12494_s10 + $0x100] sm:$0xff] }
0x12af   : > { %10101 = vmatpush3.msra.mxu1 %v8993_v12  ;;  %10102 = vmatprep.mubr.msk.f32.mxu1 %vm10854_vm0, %v10855_v11  ;;  %v10594_v12 = vpack.c.bf16 %v9031_v9, %v9030_v8  ;;  %v9037_v14 = vld [vmem:[%s12494_s10 + $0x108] sm:$0xff] }
0x12b0   : > { %10578 = vmatprep.subr.bf16.mxu1 %v10853_v3 }
0x12b5   : > { %v6167_v15 = vpop.f32.mrb[68].mxu0 }
0x12b6   : > { %v10079_v16 = vpop.f32.mrb[69].mxu0 }
0x12b7   : > { %v9041_v16 = vld [vmem:[%s12494_s10 + $0x128] sm:$0xff] }
0x12bd   : > { %v6094_v19 = vpop.f32.mrb[66].mxu1 }
0x12be   : > { %v10074_v20 = vpop.f32.mrb[67].mxu1  ;;  %10088 = vmatmul.mubr.msk.f32.vlgmr.msra.gmra.mrb[70].mxu0 %vm1658_vm2, %v6094_v19 }
0x12bf   : > { %10096 = vmatpush3.msra.mxu0 %v8992_v17  ;;  %10097 = vmatprep.mubr.msk.f32.mxu0 %vm10854_vm0, %v10855_v11  ;;  %v10597_v17 = vpack.c.bf16 %v9037_v14, %v9036_v13  ;;  %v9038_v20 = vld [vmem:[%s12494_s10 + $0x110] sm:$0xff] }
0x12c0   : > { %10572 = vmatprep.subr.bf16.mxu0 %v10853_v3 }
0x12c2   : > { %10098 = vmatmul.mubr.msk.f32.vlgmr.msra.gmra.mrb[72].mxu0 %vm1658_vm2, %v6167_v15  ;;  %v9040_v15 = vld [vmem:[%s12494_s10 + $0x120] sm:$0xff] }
0x12c3   : > { %10113 = vmatprep.mubr.msk.f32.mxu0 %vm10854_vm0, %v10855_v11  ;;  %10574 = vmatpush3.bf16.msra.mxu0 %v10573_v46  ;;  %v10603_v19 = vpack.c.bf16 %v9041_v16, %v9040_v15  ;;  %v9055_v46 = vld [vmem:[%s12494_s10 + $0x198] sm:$0xff] }
0x12c4   : > { %10575 = vmatprep.subr.bf16.mxu0 %v10853_v3 }
0x12c5   : > { %v6240_v21 = vpop.f32.mrb[68].mxu1 }
0x12c6   : > { %v10084_v22 = vpop.f32.mrb[69].mxu1  ;;  %10103 = vmatmul.mubr.msk.f32.vlgmr.msra.gmra.mrb[72].mxu1 %vm1658_vm2, %v6240_v21  ;;  %v9039_v21 = vld [vmem:[%s12494_s10 + $0x118] sm:$0xff] }
0x12c7   : > { %10124 = vmatprep.mubr.msk.f32.mxu1 %vm10854_vm0, %v10855_v11  ;;  %10577 = vmatpush3.bf16.msra.mxu0 %v10576_v52  ;;  %v9042_v22 = vld [vmem:[%s12494_s10 + $0x130] sm:$0xff]  ;;  %v9061_v52 = vld [vmem:[%s12494_s10 + $0x1c8] sm:$0xff] }
0x12c8   : > { %10584 = vmatprep.subr.bf16.mxu0 %v10853_v3 }
0x1381   : > { %v6386_v24 = vpop.f32.mrb[70].mxu1 }
0x1382   : > { %v10094_v25 = vpop.f32.mrb[71].mxu1 }
0x1383   : > { %v10600_v25 = vpack.c.bf16 %v9039_v21, %v9038_v20 }
0x1391   : > { %v6313_v26 = vpop.f32.mrb[70].mxu0 }
0x1392   : > { %v6387_v27 = vadd.f32 %v6386_v24, %v6313_v26  ;;  %v10089_v28 = vpop.f32.mrb[71].mxu0  ;;  %v9043_v24 = vld [vmem:[%s12494_s10 + $0x138] sm:$0xff] }
0x1393   : > { %v10606_v26 = vpack.c.bf16 %v9043_v24, %v9042_v22  ;;  %v9045_v28 = vld [vmem:[%s12494_s10 + $0x148] sm:$0xff] }
0x1395   : > { %v6459_v29 = vpop.f32.mrb[72].mxu0 }
0x1396   : > { %v6463_v30 = vadd.f32 %v6459_v29, %v6387_v27  ;;  %v10099_v31 = vpop.f32.mrb[73].mxu0  ;;  %v9044_v27 = vld [vmem:[%s12494_s10 + $0x140] sm:$0xff] }
0x1397   : > { %v9048_v29 = vld [vmem:[%s12494_s10 + $0x160] sm:$0xff]  ;;  %v10609_v31 = vpack.c.bf16 %v9045_v28, %v9044_v27 }
0x1399   : > { %v6533_v33 = vpop.f32.mrb[72].mxu1 }
0x139a   : > { %v6537_v34 = vadd.f32 %v6533_v33, %v6463_v30  ;;  %v10104_v35 = vpop.f32.mrb[73].mxu1  ;;  %v9049_v30 = vld [vmem:[%s12494_s10 + $0x168] sm:$0xff]  ;;  %v9046_v33 = vld [vmem:[%s12494_s10 + $0x150] sm:$0xff] }
0x139b   : > { %v9050_v35 = vld [vmem:[%s12494_s10 + $0x170] sm:$0xff] }
0x139c   : > { %v6544_v36 = vadd.f32 %v9011_v32, %v6537_v34  ;;  %v10615_v32 = vpack.c.bf16 %v9049_v30, %v9048_v29  ;;  %v9047_v34 = vld [vmem:[%s12494_s10 + $0x158] sm:$0xff]  ;;  %v10788_v29 = vld [vmem:[%s11611_s7] sm:$0xff]  ;;  %s12563_s7 = sld [smem:[#allocation24_spill]] }
0x139e   : > { %v6545_v37 = vadd.f32 %v6544_v36, %v11783_v4  ;;  %v9020_v4 = vld [vmem:[%s12493_s9 + $0xa0] sm:$0xff]  ;;  %v9051_v36 = vld [vmem:[%s12494_s10 + $0x178] sm:$0xff] }
0x139f   : > { %v10579_v48 = vpack.c.bf16 %v9021_v47, %v9020_v4  ;;  %v9054_v4 = vld [vmem:[%s12494_s10 + $0x190] sm:$0xff] }
0x13a0   : > { %v6550_v38 = vsel %vm809_vm1, %v6545_v37, 0.0  ;;  %v9058_v47 = vld [vmem:[%s12494_s10 + $0x1b0] sm:$0xff]  ;;  %v10624_v49 = vpack.c.bf16 %v9055_v46, %v9054_v4 }
0x13a1   : > { %6551 = vadd.xlane.f32.xlu0 %v6550_v38  ;;  %10580 = vmatpush3.bf16.msra.mxu1 %v10579_v48  ;;  %v10612_v38 = vpack.c.bf16 %v9047_v34, %v9046_v33  ;;  %v9059_v48 = vld [vmem:[%s12494_s10 + $0x1b8] sm:$0xff] }
0x13a2   : > { %10581 = vmatprep.subr.bf16.mxu1 %v10853_v3  ;;  %v10630_v50 = vpack.c.bf16 %v9059_v48, %v9058_v47 }
0x13a5   : > { %10583 = vmatpush3.bf16.msra.mxu1 %v10582_v54  ;;  %v10633_v54 = vpack.c.bf16 %v9061_v52, %v9060_v51 }
0x13a6   : > { %10590 = vmatprep.subr.bf16.mxu1 %v10853_v3 }
0x142e   : > { %v6552_v39 = vpop.xlane.xlu0 %6551 }
0x142f   : > { %v6553_v40 = vmul.f32 0.03125, %v6552_v39  ;;  %v10618_v39 = vpack.c.bf16 %v9051_v36, %v9050_v35 }
0x1431   : > { %v6554_v41 = vsub.f32 %v6545_v37, %v6553_v40  ;;  %v12176_v37 = vld [vmem:[%s11455_s30] sm:$0xff]  ;;  %s12560_s30 = sld [smem:[#allocation9_spill]] }
0x1432   : > { %v9052_v40 = vld [vmem:[%s12494_s10 + $0x180] sm:$0xff] }
0x1433   : > { %v6555_v42 = vmul.f32 %v6554_v41, %v6554_v41 }
0x1435   : > { %v6556_v43 = vsel %vm809_vm1, %v6555_v42, 0.0  ;;  %v9056_v42 = vld [vmem:[%s12494_s10 + $0x1a0] sm:$0xff] }
0x1436   : > { %6557 = vadd.xlane.f32.xlu1 %v6556_v43  ;;  %v9057_v43 = vld [vmem:[%s12494_s10 + $0x1a8] sm:$0xff] }
0x1437   : > { %v10627_v45 = vpack.c.bf16 %v9057_v43, %v9056_v42  ;;  %s9127_s3 = sshll.u32 %s12560_s30, 7  ;;  %s10856_s30 = smov [#allocation2]  }
0x1438   : > { %s12442_s1 = scalar_lea.hbm %s12563_s7, %s9127_s3  ;;  %s10793_s21 = sshll.u32 %s10856_s30, 4  ;;  %s10794_s21 = int_to_ptr.vmem [resolvable:$false] %s10793_s21 }
0x1439   : > { %s10795_s22 = scalar_lea.vmem %s10794_s21, 256  ;;  %p10796_p0 = scmp.lt.s32.totalorder %s12444_s24, %s10794_s21 }
0x143a   : > { %p10797_p1 = scmp.lt.s32.totalorder %s10795_s22, %s10789_s6 }
0x143c   : > { %p10798_p2 = por %p10797_p1, %p10796_p0 }
0x143e   : > { %p10799_p3 = pnand %p10798_p2, %p10792_p13 }
0x14c3   : > { %v6558_v55 = vpop.xlane.xlu1 %6557 }
0x14c4   : > { %v6559_v56 = vmul.f32 0.03125, %v6558_v55  ;;  %v9065_v55 = vld [vmem:[%s12494_s10 + $0x1e8] sm:$0xff] }
0x14c6   : > { %v6560_v57 = vadd.f32 1e-05, %v6559_v56  ;;  %v10639_v56 = vpack.c.bf16 %v9065_v55, %v9064_v53 }
0x14c8   : > { %10764 = vrsqrt.f32 %v6560_v57  ;;  %v9062_v57 = vld [vmem:[%s12494_s10 + $0x1d0] sm:$0xff] }
0x14d2   : > { %v10765_v58 = vpop.eup %10764 }
0x14d3   : > { %v6562_v60 = vmul.f32 %v10765_v58, %v6554_v41  ;;  %v9053_v41 = vld [vmem:[%s12494_s10 + $0x188] sm:$0xff]  ;;  %v9063_v58 = vld [vmem:[%s12494_s10 + $0x1d8] sm:$0xff] }
0x14d4   : > { %v10621_v44 = vpack.c.bf16 %v9053_v41, %v9052_v40  ;;  %v10636_v18 = vpack.c.bf16 %v9063_v58, %v9062_v57 }
0x14d5   : > { %v6569_v0 = vmul.f32 %v9014_v59, %v6562_v60  ;;  %v9066_v59 = vld [vmem:[%s12494_s10 + $0x1f0] sm:$0xff]  ;;  %v9067_v60 = vld [vmem:[%s12494_s10 + $0x1f8] sm:$0xff] }
0x14d6   : > { %v10642_v61 = vpack.c.bf16 %v9067_v60, %v9066_v59 }
0x14d7   : > { %v12092_v6 = vadd.f32 %v9015_v63, %v6569_v0 }
0x14d9   : > { %10114 = vmatmul.mubr.msk.f32.vlgmr.msra.gmra.mrb[74].mxu0 %vm809_vm1, %v12092_v6  ;;  %10125 = vmatmul.mubr.msk.f32.vlgmr.msra.gmra.mrb[74].mxu1 %vm809_vm1, %v12092_v6 }
0x14da   : > { %10586 = vmatpush3.bf16.msra.mxu0 %v10585_v1  ;;  %10592 = vmatpush3.bf16.msra.mxu1 %v10591_v2 }
0x14db   : > { %10587 = vmatprep.subr.bf16.mxu0 %v10853_v3  ;;  %10593 = vmatprep.subr.bf16.mxu1 %v10853_v3 }
0x14dc   : > { %10135 = vmatprep.mubr.msk.f32.mxu0 %vm10854_vm0, %v10855_v11  ;;  %10146 = vmatprep.mubr.msk.f32.mxu1 %vm10854_vm0, %v10855_v11 }
0x14de   : > { %10589 = vmatpush3.bf16.msra.mxu0 %v10588_v10  ;;  %10595 = vmatpush3.bf16.msra.mxu1 %v10594_v12 }
0x14df   : > { %10596 = vmatprep.subr.bf16.mxu0 %v10853_v3  ;;  %10602 = vmatprep.subr.bf16.mxu1 %v10853_v3 }
0x14e1   : > { %10136 = vmatmul.mubr.msk.f32.vlgmr.msra.gmra.mrb[76].mxu0 %vm809_vm1, %v12092_v6  ;;  %10147 = vmatmul.mubr.msk.f32.vlgmr.msra.gmra.mrb[76].mxu1 %vm809_vm1, %v12092_v6 }
0x14e2   : > { %10598 = vmatpush3.bf16.msra.mxu0 %v10597_v17  ;;  %10604 = vmatpush3.bf16.msra.mxu1 %v10603_v19 }
0x14e3   : > { %10599 = vmatprep.subr.bf16.mxu0 %v10853_v3  ;;  %10605 = vmatprep.subr.bf16.mxu1 %v10853_v3 }
0x14e4   : > { %10157 = vmatprep.mubr.msk.f32.mxu0 %vm10854_vm0, %v10855_v11  ;;  %10168 = vmatprep.mubr.msk.f32.mxu1 %vm10854_vm0, %v10855_v11 }
0x14e6   : > { %10601 = vmatpush3.bf16.msra.mxu0 %v10600_v25  ;;  %10607 = vmatpush3.bf16.msra.mxu1 %v10606_v26 }
0x14e7   : > { %10608 = vmatprep.subr.bf16.mxu0 %v10853_v3  ;;  %10614 = vmatprep.subr.bf16.mxu1 %v10853_v3 }
0x14e9   : > { %10158 = vmatmul.mubr.msk.f32.vlgmr.msra.gmra.mrb[78].mxu0 %vm809_vm1, %v12176_v37  ;;  %10169 = vmatmul.mubr.msk.f32.vlgmr.msra.gmra.mrb[78].mxu1 %vm809_vm1, %v12176_v37 }
0x14ea   : > { %10610 = vmatpush3.bf16.msra.mxu0 %v10609_v31  ;;  %10616 = vmatpush3.bf16.msra.mxu1 %v10615_v32 }
0x14eb   : > { %10611 = vmatprep.subr.bf16.mxu0 %v10853_v3  ;;  %10617 = vmatprep.subr.bf16.mxu1 %v10853_v3 }
0x14ec   : > { %10179 = vmatprep.mubr.msk.f32.mxu0 %vm10854_vm0, %v10855_v11  ;;  %10190 = vmatprep.mubr.msk.f32.mxu1 %vm10854_vm0, %v10855_v11 }
0x14ee   : > { %10613 = vmatpush3.bf16.msra.mxu0 %v10612_v38  ;;  %10619 = vmatpush3.bf16.msra.mxu1 %v10618_v39 }
0x14ef   : > { %10620 = vmatprep.subr.bf16.mxu0 %v10853_v3  ;;  %10626 = vmatprep.subr.bf16.mxu1 %v10853_v3 }
0x14f1   : > { %10180 = vmatmul.mubr.msk.f32.vlgmr.msra.gmra.mrb[80].mxu0 %vm809_vm1, %v12176_v37  ;;  %10191 = vmatmul.mubr.msk.f32.vlgmr.msra.gmra.mrb[80].mxu1 %vm809_vm1, %v12176_v37 }
0x14f2   : > { %10622 = vmatpush3.bf16.msra.mxu0 %v10621_v44  ;;  %10628 = vmatpush3.bf16.msra.mxu1 %v10627_v45 }
0x14f3   : > { %10623 = vmatprep.subr.bf16.mxu0 %v10853_v3  ;;  %10629 = vmatprep.subr.bf16.mxu1 %v10853_v3 }
0x14f4   : > { %10201 = vmatprep.mubr.msk.f32.mxu0 %vm10854_vm0, %v10855_v11  ;;  %10212 = vmatprep.mubr.msk.f32.mxu1 %vm10854_vm0, %v10855_v11 }
0x14f6   : > { %10625 = vmatpush3.bf16.msra.mxu0 %v10624_v49  ;;  %10631 = vmatpush3.bf16.msra.mxu1 %v10630_v50 }
0x14f7   : > { %10632 = vmatprep.subr.bf16.mxu0 %v10853_v3  ;;  %10638 = vmatprep.subr.bf16.mxu1 %v10853_v3 }
0x14f9   : > { %10202 = vmatmul.mubr.msk.f32.vlgmr.msra.gmra.mrb[82].mxu0 %vm809_vm1, %v12176_v37  ;;  %10213 = vmatmul.mubr.msk.f32.vlgmr.msra.gmra.mrb[82].mxu1 %vm809_vm1, %v12176_v37 }
0x14fa   : > { %10223 = vmatprep.mubr.msk.f32.mxu0 %vm10854_vm0, %v10855_v11  ;;  %10234 = vmatprep.mubr.msk.f32.mxu1 %vm10854_vm0, %v10855_v11 }
0x14fb   : > { %10634 = vmatpush3.bf16.msra.mxu0 %v10633_v54  ;;  %10640 = vmatpush3.bf16.msra.mxu1 %v10639_v56 }
0x14fc   : > { %10635 = vmatprep.subr.bf16.mxu0 %v10853_v3  ;;  %10641 = vmatprep.subr.bf16.mxu1 %v10853_v3 }
0x14ff   : > { %10637 = vmatpush3.bf16.msra.mxu0 %v10636_v18  ;;  %10643 = vmatpush3.bf16.msra.mxu1 %v10642_v61 }
0x1500   : > { %10237 = vmatprep.subr.mxu0 %v10855_v11  ;;  %10242 = vmatprep.subr.mxu1 %v10855_v11 }
0x1502   : > { %10224 = vmatmul.mubr.msk.f32.vlgmr.msra.gmra.mrb[84].mxu0 %vm809_vm1, %v12176_v37  ;;  %10235 = vmatmul.mubr.msk.f32.vlgmr.msra.gmra.mrb[84].mxu1 %vm809_vm1, %v12176_v37 }
0x1503   : > { %10239 = vmatprep.mubr.msk.f32.mxu0 %vm10854_vm0, %v10855_v11  ;;  %10244 = vmatprep.mubr.msk.f32.mxu1 %vm10854_vm0, %v10855_v11 }
0x15ac   : > { %v6663_v62 = vpop.f32.mrb[74].mxu0  ;;  %v6733_v23 = vpop.f32.mrb[74].mxu1 }
0x15ad   : > { %v10115_v63 = vpop.f32.mrb[75].mxu0  ;;  %v10126_v0 = vpop.f32.mrb[75].mxu1 }
0x15b4   : > { %v6803_v1 = vpop.f32.mrb[76].mxu0  ;;  %v6873_v2 = vpop.f32.mrb[76].mxu1 }
0x15b5   : > { %v10137_v5 = vpop.f32.mrb[77].mxu0  ;;  %v10148_v7 = vpop.f32.mrb[77].mxu1 }
0x15bc   : > { %v6976_v8 = vpop.f32.mrb[78].mxu0  ;;  %v7046_v9 = vpop.f32.mrb[78].mxu1 }
0x15bd   : > { %v10159_v10 = vpop.f32.mrb[79].mxu0  ;;  %10238 = vmatpush3.xpose.msk.msra.mxu0 %vm1658_vm2, %v6976_v8  ;;  %10243 = vmatpush3.xpose.msk.msra.mxu1 %vm1658_vm2, %v7046_v9  ;;  %v10170_v12 = vpop.f32.mrb[79].mxu1 }
0x15be   : > { %10247 = vmatprep.subr.mxu0 %v10855_v11  ;;  %10252 = vmatprep.subr.mxu1 %v10855_v11 }
0x15c0   : > { %10240 = vmatmul.mubr.msk.f32.vlgmr.msra.gmra.mrb[86].mxu0 %vm1658_vm2, %v6663_v62  ;;  %10245 = vmatmul.mubr.msk.f32.vlgmr.msra.gmra.mrb[86].mxu1 %vm1658_vm2, %v6733_v23 }
0x15c1   : > { %10249 = vmatprep.mubr.msk.f32.mxu0 %vm10854_vm0, %v10855_v11  ;;  %10254 = vmatprep.mubr.msk.f32.mxu1 %vm10854_vm0, %v10855_v11 }
0x15c4   : > { %v7116_v13 = vpop.f32.mrb[80].mxu0  ;;  %v7186_v14 = vpop.f32.mrb[80].mxu1 }
0x15c5   : > { %v10181_v15 = vpop.f32.mrb[81].mxu0  ;;  %10248 = vmatpush3.xpose.msk.msra.mxu0 %vm1658_vm2, %v7116_v13  ;;  %10253 = vmatpush3.xpose.msk.msra.mxu1 %vm1658_vm2, %v7186_v14  ;;  %v10192_v16 = vpop.f32.mrb[81].mxu1  ;;  %v9077_v13 = vld [vmem:[%s12495_s11 + $0x28] sm:$0xff]  ;;  %v9076_v14 = vld [vmem:[%s12495_s11 + $0x20] sm:$0xff] }
0x15c6   : > { %10257 = vmatprep.subr.mxu0 %v10855_v11  ;;  %10262 = vmatprep.subr.mxu1 %v10855_v11  ;;  %v9078_v15 = vld [vmem:[%s12495_s11 + $0x30] sm:$0xff] }
0x15c8   : > { %10250 = vmatmul.mubr.msk.f32.vlgmr.msra.gmra.mrb[88].mxu0 %vm1658_vm2, %v6803_v1  ;;  %10255 = vmatmul.mubr.msk.f32.vlgmr.msra.gmra.mrb[88].mxu1 %vm1658_vm2, %v6873_v2 }
0x15c9   : > { %10259 = vmatprep.mubr.msk.f32.mxu0 %vm10854_vm0, %v10855_v11  ;;  %10264 = vmatprep.mubr.msk.f32.mxu1 %vm10854_vm0, %v10855_v11 }
0x15cc   : > { %v7256_v17 = vpop.f32.mrb[82].mxu0  ;;  %v7326_v19 = vpop.f32.mrb[82].mxu1 }
0x15cd   : > { %v10203_v20 = vpop.f32.mrb[83].mxu0  ;;  %v10214_v21 = vpop.f32.mrb[83].mxu1  ;;  %10258 = vmatpush3.msra.mxu0 %v7256_v17  ;;  %10263 = vmatpush3.msra.mxu1 %v7326_v19  ;;  %v9079_v17 = vld [vmem:[%s12495_s11 + $0x38] sm:$0xff] }
0x15ce   : > { %10267 = vmatprep.subr.mxu0 %v10855_v11  ;;  %10272 = vmatprep.subr.mxu1 %v10855_v11 }
0x15d5   : > { %v12292_v22 = vpop.f32.mrb[84].mxu0  ;;  %v12294_v24 = vpop.f32.mrb[84].mxu1 }
0x15d6   : > { %v10225_v25 = vpop.f32.mrb[85].mxu0  ;;  %v10236_v26 = vpop.f32.mrb[85].mxu1 }
0x1693   : > { %v7549_v27 = vpop.f32.mrb[86].mxu0  ;;  %v7625_v28 = vpop.f32.mrb[86].mxu1 }
0x1694   : > { %v7550_v30 = vadd.f32 %v10788_v29, %v7549_v27  ;;  %v7626_v31 = vadd.f32 %v10788_v29, %v7625_v28  ;;  %v10241_v32 = vpop.f32.mrb[87].mxu0  ;;  %v10246_v33 = vpop.f32.mrb[87].mxu1 }
0x1696   : > { %v7784_v34 = vsel %vm1658_vm2, %v7626_v31, -inf  ;;  %v7781_v35 = vsel %vm1658_vm2, %v7550_v30, -inf }
0x1697   : > { %7785 = vmax.xlane.f32.xlu1 %v7784_v34  ;;  %7782 = vmax.xlane.f32.xlu0 %v7781_v35 }
0x169b   : > { %v7701_v36 = vpop.f32.mrb[88].mxu0  ;;  %v7777_v37 = vpop.f32.mrb[88].mxu1 }
0x169c   : > { %v7702_v38 = vadd.f32 %v10788_v29, %v7701_v36  ;;  %v7778_v39 = vadd.f32 %v10788_v29, %v7777_v37  ;;  %v10251_v40 = vpop.f32.mrb[89].mxu0  ;;  %v10256_v41 = vpop.f32.mrb[89].mxu1  ;;  %v9097_v37 = vld [vmem:[%s12496_s12 + $0x1] ss:$0 sm:$0xff] }
0x169e   : > { %v7790_v42 = vsel %vm1658_vm2, %v7778_v39, -inf  ;;  %v7787_v43 = vsel %vm1658_vm2, %v7702_v38, -inf }
0x169f   : > { %7791 = vmax.xlane.f32.xlu1 %v7790_v42  ;;  %7788 = vmax.xlane.f32.xlu0 %v7787_v43 }
0x1724   : > { %v7786_v44 = vpop.xlane.xlu1 %7785  ;;  %v7783_v45 = vpop.xlane.xlu0 %7782 }
0x1725   : > { %v7794_v4 = vsub.f32 %v7626_v31, %v7786_v44  ;;  %v7793_v46 = vsub.f32 %v7550_v30, %v7783_v45 }
0x1727   : > { %v7799_v47 = vmul.f32 1.442695, %v7794_v4  ;;  %v7797_v48 = vmul.f32 1.442695, %v7793_v46  ;;  %v9102_v46 = vld [vmem:[%s12499_s15 + $0x20] sm:$0xff] }
0x1729   : > { %10766 = vpow2.f32 %v7799_v47  ;;  %v9103_v47 = vld [vmem:[%s12499_s15 + $0x28] sm:$0xff] }
0x172a   : > { %10768 = vpow2.f32 %v7797_v48  ;;  %v10645_v48 = vpack.c.bf16 %v9103_v47, %v9102_v46 }
0x172c   : > { %v7792_v49 = vpop.xlane.xlu1 %7791  ;;  %v7789_v50 = vpop.xlane.xlu0 %7788 }
0x172d   : > { %v7796_v51 = vsub.f32 %v7778_v39, %v7792_v49  ;;  %v7795_v52 = vsub.f32 %v7702_v38, %v7789_v50  ;;  %v9105_v49 = vld [vmem:[%s12499_s15 + $0x38] sm:$0xff] }
0x172f   : > { %v7803_v53 = vmul.f32 1.442695, %v7796_v51  ;;  %v7801_v54 = vmul.f32 1.442695, %v7795_v52  ;;  %v9109_v51 = vld [vmem:[%s12501_s17 + $0x40] sm:$0xff]  ;;  %v9110_v52 = vld [vmem:[%s12501_s17 + $0x48] sm:$0xff] }
0x1731   : > { %10770 = vpow2.f32 %v7803_v53  ;;  %v9111_v53 = vld [vmem:[%s12501_s17 + $0x50] sm:$0xff] }
0x1732   : > { %10772 = vpow2.f32 %v7801_v54  ;;  %v10651_v54 = vpack.c.bf16 %v9110_v52, %v9109_v51 }
0x1733   : > { %v10767_v55 = vpop.eup %10766 }
0x1734   : > { %v10769_v56 = vpop.eup %10768  ;;  %v7808_v57 = vsel %vm1658_vm2, %v10767_v55, 0.0 }
0x1735   : > { %7809 = vadd.xlane.f32.xlu1 %v7808_v57  ;;  %v7805_v58 = vsel %vm1658_vm2, %v10769_v56, 0.0  ;;  %v9113_v57 = vld [vmem:[%s12501_s17 + $0x60] sm:$0xff] }
0x1736   : > { %7806 = vadd.xlane.f32.xlu0 %v7805_v58  ;;  %v9114_v58 = vld [vmem:[%s12501_s17 + $0x68] sm:$0xff] }
0x173b   : > { %v10771_v59 = vpop.eup %10770 }
0x173c   : > { %v10773_v18 = vpop.eup %10772  ;;  %v7814_v60 = vsel %vm1658_vm2, %v10771_v59, 0.0 }
0x173d   : > { %7815 = vadd.xlane.f32.xlu1 %v7814_v60  ;;  %v7811_v61 = vsel %vm1658_vm2, %v10773_v18, 0.0 }
0x173e   : > { %7812 = vadd.xlane.f32.xlu0 %v7811_v61 }
0x17c2   : > { %v7810_v62 = vpop.xlane.xlu1 %7809 }
0x17c3   : > { %10774 = vrcp.f32 %v7810_v62  ;;  %v7807_v23 = vpop.xlane.xlu0 %7806 }
0x17c4   : > { %10776 = vrcp.f32 %v7807_v23  ;;  %v9100_v23 = vld [vmem:[%s12497_s13 + $0x1] ss:$0 sm:$0xff] }
0x17ca   : > { %v7816_v63 = vpop.xlane.xlu1 %7815 }
0x17cb   : > { %10778 = vrcp.f32 %v7816_v63  ;;  %v7813_v0 = vpop.xlane.xlu0 %7812 }
0x17cc   : > { %10780 = vrcp.f32 %v7813_v0  ;;  %v9101_v0 = vld [vmem:[%s12498_s14 + $0x1] ss:$0 sm:$0xff] }
0x17cd   : > { %v10775_v1 = vpop.eup %10774 }
0x17ce   : > { %v10777_v2 = vpop.eup %10776  ;;  %v7822_v5 = vmul.f32 %v10775_v1, %v10767_v55  ;;  %v9112_v55 = vld [vmem:[%s12501_s17 + $0x58] sm:$0xff] }
0x17cf   : > { %v7821_v7 = vmul.f32 %v10777_v2, %v10769_v56  ;;  %v10654_v56 = vpack.c.bf16 %v9112_v55, %v9111_v53 }
0x17d0   : > { %10265 = vmatmul.mubr.msk.f32.vlgmr.msra.gmra.mrb[90].mxu1 %vm1658_vm2, %v7822_v5  ;;  %v9115_v5 = vld [vmem:[%s12501_s17 + $0x70] sm:$0xff] }
0x17d1   : > { %10260 = vmatmul.mubr.msk.f32.vlgmr.msra.gmra.mrb[90].mxu0 %vm1658_vm2, %v7821_v7  ;;  %10273 = vmatpush3.msra.mxu1 %v12294_v24  ;;  %v9116_v7 = vld [vmem:[%s12501_s17 + $0x78] sm:$0xff] }
0x17d2   : > { %10268 = vmatpush3.msra.mxu0 %v12292_v22  ;;  %10269 = vmatprep.mubr.msk.f32.mxu0 %vm10854_vm0, %v10855_v11 }
0x17d3   : > { %10274 = vmatprep.mubr.msk.f32.mxu1 %vm10854_vm0, %v10855_v11  ;;  %10277 = vmatprep.subr.mxu0 %v10855_v11 }
0x17d4   : > { %10282 = vmatprep.subr.mxu1 %v10855_v11 }
0x17d5   : > { %v10779_v8 = vpop.eup %10778 }
0x17d6   : > { %v10781_v9 = vpop.eup %10780  ;;  %v7824_v10 = vmul.f32 %v10779_v8, %v10771_v59  ;;  %v10657_v59 = vpack.c.bf16 %v9114_v58, %v9113_v57  ;;  %v10660_v8 = vpack.c.bf16 %v9116_v7, %v9115_v5 }
0x17d7   : > { %v7823_v12 = vmul.f32 %v10781_v9, %v10773_v18  ;;  %v9107_v9 = vld [vmem:[%s12500_s16 + $0x1] ss:$0 sm:$0xff] }
0x17d8   : > { %10275 = vmatmul.mubr.msk.f32.vlgmr.msra.gmra.mrb[92].mxu1 %vm1658_vm2, %v7824_v10 }
0x17d9   : > { %10270 = vmatmul.mubr.msk.f32.vlgmr.msra.gmra.mrb[92].mxu0 %vm1658_vm2, %v7823_v12  ;;  %10284 = vmatprep.mubr.msk.f32.mxu1 %vm10854_vm0, %v10855_v11 }
0x17da   : > { %10279 = vmatprep.mubr.msk.f32.mxu0 %vm10854_vm0, %v10855_v11  ;;  %10278 = vmatpush3.msra.mxu0 %v9077_v13 }
0x17db   : > { %10283 = vmatpush3.msra.mxu1 %v9076_v14  ;;  %10287 = vmatprep.subr.mxu0 %v10855_v11 }
0x17dc   : > { %10292 = vmatprep.subr.mxu1 %v10855_v11 }
0x18a3   : > { %v7967_v16 = vpop.f32.mrb[90].mxu1 }
0x18a4   : > { %v7894_v19 = vpop.f32.mrb[90].mxu0  ;;  %v10266_v20 = vpop.f32.mrb[91].mxu1  ;;  %10280 = vmatmul.mubr.msk.f32.vlgmr.msra.gmra.mrb[94].mxu0 %vm1658_vm2, %v7967_v16 }
0x18a5   : > { %v10261_v21 = vpop.f32.mrb[91].mxu0  ;;  %10285 = vmatmul.mubr.msk.f32.vlgmr.msra.gmra.mrb[94].mxu1 %vm1658_vm2, %v7894_v19  ;;  %10288 = vmatpush3.msra.mxu0 %v9078_v15 }
0x18a6   : > { %10289 = vmatprep.mubr.msk.f32.mxu0 %vm10854_vm0, %v10855_v11  ;;  %10293 = vmatpush3.msra.mxu1 %v9079_v17 }
0x18a7   : > { %10294 = vmatprep.mubr.msk.f32.mxu1 %vm10854_vm0, %v10855_v11  ;;  %10644 = vmatprep.subr.bf16.mxu0 %v10853_v3 }
0x18a8   : > { %10650 = vmatprep.subr.bf16.mxu1 %v10853_v3 }
0x18ab   : > { %v8113_v22 = vpop.f32.mrb[92].mxu1 }
0x18ac   : > { %v8040_v24 = vpop.f32.mrb[92].mxu0  ;;  %v10276_v25 = vpop.f32.mrb[93].mxu1  ;;  %10295 = vmatmul.mubr.msk.f32.vlgmr.msra.gmra.mrb[96].mxu1 %vm1658_vm2, %v8113_v22 }
0x18ad   : > { %v10271_v26 = vpop.f32.mrb[93].mxu0  ;;  %10290 = vmatmul.mubr.msk.f32.vlgmr.msra.gmra.mrb[96].mxu0 %vm1658_vm2, %v8040_v24  ;;  %10324 = vmatprep.mubr.msk.f32.mxu1 %vm10854_vm0, %v10855_v11 }
0x18ae   : > { %10305 = vmatprep.mubr.msk.f32.mxu0 %vm10854_vm0, %v10855_v11  ;;  %10646 = vmatpush3.bf16.msra.mxu0 %v10645_v48 }
0x18af   : > { %10647 = vmatprep.subr.bf16.mxu0 %v10853_v3  ;;  %10652 = vmatpush3.bf16.msra.mxu1 %v10651_v54 }
0x18b0   : > { %10653 = vmatprep.subr.bf16.mxu1 %v10853_v3 }
0x18b3   : > { %10655 = vmatpush3.bf16.msra.mxu1 %v10654_v56 }
0x18b4   : > { %10656 = vmatprep.subr.bf16.mxu1 %v10853_v3 }
0x18b7   : > { %10658 = vmatpush3.bf16.msra.mxu1 %v10657_v59 }
0x18b8   : > { %10659 = vmatprep.subr.bf16.mxu1 %v10853_v3 }
0x18bb   : > { %10661 = vmatpush3.bf16.msra.mxu1 %v10660_v8 }
0x1977   : > { %v8186_v27 = vpop.f32.mrb[94].mxu0 }
0x1978   : > { %v8259_v28 = vpop.f32.mrb[94].mxu1  ;;  %v10281_v29 = vpop.f32.mrb[95].mxu0 }
0x1979   : > { %v8260_v30 = vadd.f32 %v8259_v28, %v8186_v27  ;;  %v10286_v31 = vpop.f32.mrb[95].mxu1  ;;  %v8659_v27 = vld [vmem:[%s12558_s26] sm:$0xff]  ;;  %v8660_v28 = vld [vmem:[%s12558_s26 + $0x8] sm:$0xff] }
0x197a   : > { %v10663_v29 = vpack.c.bf16 %v8660_v28, %v8659_v27  ;;  %v8662_v31 = vld [vmem:[%s12558_s26 + $0x18] sm:$0xff] }
0x197f   : > { %v8406_v32 = vpop.f32.mrb[96].mxu1 }
0x1980   : > { %v8332_v33 = vpop.f32.mrb[96].mxu0  ;;  %v10296_v34 = vpop.f32.mrb[97].mxu1 }
0x1981   : > { %v8336_v35 = vadd.f32 %v8332_v33, %v8260_v30  ;;  %v10291_v36 = vpop.f32.mrb[97].mxu0  ;;  %v8661_v30 = vld [vmem:[%s12558_s26 + $0x10] sm:$0xff] }
0x1983   : > { %v8410_v38 = vadd.f32 %v8406_v32, %v8336_v35  ;;  %v10666_v32 = vpack.c.bf16 %v8662_v31, %v8661_v30 }
0x1985   : > { %v8417_v39 = vadd.f32 %v9097_v37, %v8410_v38  ;;  %v9123_v38 = vld [vmem:[%s12504_s20 + $0x1] ss:$0 sm:$0xff] }
0x1987   : > { %v8418_v40 = vadd.f32 %v8417_v39, %v12092_v6  ;;  %v9104_v6 = vld [vmem:[%s12499_s15 + $0x30] sm:$0xff] }
0x1988   : > { %v10648_v50 = vpack.c.bf16 %v9105_v49, %v9104_v6 }
0x1989   : > { %v8423_v41 = vsel %vm809_vm1, %v8418_v40, 0.0 }
0x198a   : > { %8424 = vadd.xlane.f32.xlu0 %v8423_v41  ;;  %10649 = vmatpush3.bf16.msra.mxu0 %v10648_v50  ;;  %v9124_v41 = vld [vmem:[%s12562_s5] ss:$0 sm:$0xff] }
0x198b   : > { %10662 = vmatprep.subr.bf16.mxu0 %v10853_v3 }
0x1a17   : > { %v8425_v42 = vpop.xlane.xlu0 %8424 }
0x1a18   : > { %v8426_v43 = vmul.f32 0.03125, %v8425_v42 }
0x1a1a   : > { %v8427_v44 = vsub.f32 %v8418_v40, %v8426_v43 }
0x1a1c   : > { %v8428_v45 = vmul.f32 %v8427_v44, %v8427_v44 }
0x1a1e   : > { %v8429_v4 = vsel %vm809_vm1, %v8428_v45, 0.0 }
0x1a1f   : > { %8430 = vadd.xlane.f32.xlu1 %v8429_v4 }
0x1aac   : > { %v8431_v18 = vpop.xlane.xlu1 %8430 }
0x1aad   : > { %v8432_v60 = vmul.f32 0.03125, %v8431_v18 }
0x1aaf   : > { %v8433_v61 = vadd.f32 1e-05, %v8432_v60 }
0x1ab1   : > { %10782 = vrsqrt.f32 %v8433_v61 }
0x1abb   : > { %v10783_v62 = vpop.eup %10782 }
0x1abc   : > { %v8435_v63 = vmul.f32 %v10783_v62, %v8427_v44 }
0x1abe   : > { %v8442_v1 = vmul.f32 %v9100_v23, %v8435_v63 }
0x1ac0   : > { %v8449_v2 = vadd.f32 %v9101_v0, %v8442_v1 }
0x1ac2   : > { %10306 = vmatmul.mubr.msk.f32.vlgmr.msra.gmra.mrb[98].mxu0 %vm809_vm1, %v8449_v2 }
0x1ac3   : > { %10335 = vmatprep.mubr.msk.f32.mxu0 %vm10854_vm0, %v10855_v11  ;;  %v9118_v11 = vld [vmem:[%s12502_s18 + $0x1] ss:$0 sm:$0xff]  ;;  %10664 = vmatpush3.bf16.msra.mxu0 %v10663_v29 }
0x1ac4   : > { %10665 = vmatprep.subr.bf16.mxu0 %v10853_v3  ;;  %v9122_v3 = vld [vmem:[%s12503_s19 + $0x1] ss:$0 sm:$0xff] }
0x1ac7   : > { %10667 = vmatpush3.bf16.msra.mxu0 %v10666_v32 }
0x1b95   : > { %v8532_v10 = vpop.f32.mrb[98].mxu0 }
0x1b96   : > { %v8533_v12 = vadd.f32 %v9107_v9, %v8532_v10  ;;  %v10307_v13 = vpop.f32.mrb[99].mxu0 }
0x1b98   : > { %v8536_v14 = vmax.f32 %v8533_v12, 0.0 }
0x1b9a   : > { %10325 = vmatmul.mubr.msk.f32.vlgmr.msra.gmra.mrb[98].mxu1 %vm4601_vm3, %v8536_v14 }
0x1c6d   : > { %v8623_v15 = vpop.f32.mrb[98].mxu1 }
0x1c6e   : > { %v8624_v16 = vadd.f32 %v9118_v11, %v8623_v15  ;;  %v10326_v17 = vpop.f32.mrb[99].mxu1 }
0x1c70   : > { %v8627_v19 = vadd.f32 %v8624_v16, %v8449_v2 }
0x1c72   : > { %v8632_v20 = vsel %vm809_vm1, %v8627_v19, 0.0 }
0x1c73   : > { %8633 = vadd.xlane.f32.xlu0 %v8632_v20 }
0x1d00   : > { %v8634_v21 = vpop.xlane.xlu0 %8633 }
0x1d01   : > { %v8635_v22 = vmul.f32 0.03125, %v8634_v21 }
0x1d03   : > { %v8636_v24 = vsub.f32 %v8627_v19, %v8635_v22 }
0x1d05   : > { %v8637_v25 = vmul.f32 %v8636_v24, %v8636_v24 }
0x1d07   : > { %v8638_v26 = vsel %vm809_vm1, %v8637_v25, 0.0 }
0x1d08   : > { %8639 = vadd.xlane.f32.xlu1 %v8638_v26 }
0x1d95   : > { %v8640_v33 = vpop.xlane.xlu1 %8639 }
0x1d96   : > { %v8641_v34 = vmul.f32 0.03125, %v8640_v33 }
0x1d98   : > { %v8642_v35 = vadd.f32 1e-05, %v8641_v34 }
0x1d9a   : > { %10784 = vrsqrt.f32 %v8642_v35 }
0x1da4   : > { %v10785_v36 = vpop.eup %10784 }
0x1da5   : > { %v8644_v37 = vmul.f32 %v10785_v36, %v8636_v24 }
0x1da7   : > { %v8651_v39 = vmul.f32 %v9122_v3, %v8644_v37 }
0x1da9   : > { %v8658_v40 = vadd.f32 %v9123_v38, %v8651_v39 }
0x1dab   : > { %10336 = vmatmul.mubr.msk.f32.vlgmr.msra.gmra.mrb[100].mxu0 %vm809_vm1, %v8658_v40 }
0x1e7e   : > { %v8739_v42 = vpop.f32.mrb[100].mxu0 }
0x1e7f   : > { %v8740_v43 = vadd.f32 %v9124_v41, %v8739_v42  ;;  %v10337_v44 = vpop.f32.mrb[101].mxu0 }
0x1e81   : > { %8743 = vst [vmem:[%s740_s0] sm:$0xff] %v8740_v43 }
0x1e82   : > { %10802 = shalt.err (!%p10799_p3)
}
0x1e83   : > { %s10803_s0 = scalar_lea.hbm %s12442_s1, 128  ;;  %s10807_s3 = scalar_lea.hbm %s12563_s7, 256 }
0x1e84   : > { %p10804_p4 = scmp.ne.s32.totalorder %s12442_s1, %s10803_s0  ;;  %p10808_p9 = scmp.lt.u32.totalorder %s12442_s1, %s12563_s7 }
0x1e85   : > { %p10809_p10 = scmp.lt.u32.totalorder %s10807_s3, %s10803_s0  ;;  %p10811_p12 = scmp.lt.u32.totalorder %s10803_s0, %s12442_s1 }
0x1e86   : > { %p10805_p7 = pnand %p10804_p4, %p11015_p5 }
0x1e87   : > { %p10810_p11 = por %p10809_p10, %p10808_p9 }
0x1e88   : > { %p10806_p8 = pneg %p10805_p7 }
0x1e89   : > { %p10812_p13 = por %p10811_p12, %p10810_p11 }
0x1e8b   : > { %p10813_p0 = pnand %p10812_p13, %p10806_p8 }
0x1e8d   : > { %10816 = shalt.err (!%p10813_p0)
}
0x1e8e   : > { %10668 = dma.vmem_to_hbm [thread:$0]  (%p11015_p5), %s12444_s24, 128, %s12442_s1, %s8745_s29  }
0x1e8f PF: > { %s12564_s6 = sld [smem:[#allocation8_spill]]  ;;  %s12565_s30 = sld [smem:[#allocation5_spill]] }
0x1e95   : > { %p10674_p1 = scmp.ge.s32.totalorder %s12564_s6, 2  ;;  %s8770_s22 = sand.u32 1, %s12565_s30  }
0x1e96   : > { %s8771_s27 = scalar_lea.sflag [#allocation3], %s8770_s22 }
0x1e97   : > { %p10671_p2 = pnand %p10674_p1, %p11019_p6 }
0x1e99   : > { %10834 = dma.done.wait (!%p10671_p2), %s8771_s27, 128  }
0x1e9a   : > { %10836 = vsyncadd (!%p10671_p2), %s8771_s27, 4294967168  ;;  %s12567_s25 = sld [smem:[#allocation10_spill]]  ;;  %s12568_s4 = sld [smem:[#allocation6_spill]] }
0x1e9b   : > { %s12569_s30 = sld [smem:[#allocation7_spill]]  ;;  %s12570_s24 = sld [smem:[#allocation11_spill]] }
0x1ea0   : > { %p33_p3 = scmp.ge.s32.totalorder %s12567_s25, 4  }
0x1ea2   :  { %35 = sbr.rel (!%p33_p3) target bundleno = 15 (0xf), region = 173 }
0x1ea9   :  { %8776 = vsyncpa [#allocation3], 1 }
0x1eaa   :  { %8778 = vsyncpa [#allocation3 + $0x1], 1 }

</bundles_post_ra>
